<compile_context>
chip_gen: v5e
topology: v5e:2x2
jax: 0.10.0
libtpu: 0.0.40
codegen_flags: <defaults>
</compile_context>

<pallas_src>
import functools

import jax
import jax.numpy as jnp
from jax.experimental import pallas as pl
from jax.experimental.pallas import tpu as pltpu


def _round_up(x, m):
    return (x + m - 1) // m * m


# ---------------------------------------------------------------------------
# Fused path (stride == 1): in-VMEM im2col, one batch element per grid step.
# ---------------------------------------------------------------------------
def _fused_conv_kernel(x_ref, w_ref, shift_ref, *rest,
                       kh, kw, oh, ow, residual, use_act):
    # x_ref:     [1, Hp, Wp, Cinp]   padded input image, bf16
    # w_ref:     [KH*KW, Cinp, TC]   BN-scale-folded weights, bf16
    # shift_ref: [1, TC]             folded BN shift (includes conv bias), f32
    # res_ref:   [1, OH*OW, TC]      residual (only present when residual=True)
    # o_ref:     [1, OH*OW, TC]
    # acc_ref:   [OH*OW, TC]         f32 scratch accumulator
    if residual:
        res_ref, o_ref, acc_ref = rest
    else:
        o_ref, acc_ref = rest

    cinp = x_ref.shape[-1]
    acc_ref[...] = jnp.zeros_like(acc_ref)
    # Static unroll over the kh*kw taps: shifted window (in VMEM) x weight slice.
    for r in range(kh * kw):
        i, j = divmod(r, kw)
        win = x_ref[0, i:i + oh, j:j + ow, :].reshape(oh * ow, cinp)
        acc_ref[...] += jnp.dot(win, w_ref[r],
                                preferred_element_type=jnp.float32)

    out = acc_ref[...] + shift_ref[...]
    if residual:
        out = out + res_ref[0].astype(jnp.float32)
    if use_act:
        out = jnp.maximum(out, 0.0)
    o_ref[...] = out[None].astype(o_ref.dtype)


# ---------------------------------------------------------------------------
# Fallback path (stride != 1): materialized im2col + tiled matmul w/ K axis.
# ---------------------------------------------------------------------------
def _matmul_bn_kernel(p_ref, w_ref, shift_ref, o_ref, acc_ref, *, use_act):
    # p_ref: [TM, TK] patches   w_ref: [TK, TC] folded weights
    # shift_ref: [1, TC]        o_ref: [TM, TC]   acc_ref: [TM, TC] f32 scratch
    @pl.when(pl.program_id(2) == 0)
    def _():
        acc_ref[...] = jnp.zeros_like(acc_ref)

    acc_ref[...] += jnp.dot(p_ref[...], w_ref[...],
                            preferred_element_type=jnp.float32)

    @pl.when(pl.program_id(2) == pl.num_programs(2) - 1)
    def _():
        out = acc_ref[...] + shift_ref[...]
        if use_act:
            out = jnp.maximum(out, 0.0)
        o_ref[...] = out.astype(o_ref.dtype)


def _extract_patches(x_nhwc, kh, kw, sh, sw, ph, pw):
    """Materialized im2col (fallback only). Returns ([N*OH*OW, KH*KW*C], OH, OW)."""
    n, h, w, c = x_nhwc.shape
    x_pad = jnp.pad(x_nhwc, ((0, 0), (ph, ph), (pw, pw), (0, 0)))
    oh = (h + 2 * ph - kh) // sh + 1
    ow = (w + 2 * pw - kw) // sw + 1
    cols = []
    for i in range(kh):
        for j in range(kw):
            sl = x_pad[:, i:i + (oh - 1) * sh + 1:sh,
                          j:j + (ow - 1) * sw + 1:sw, :]
            cols.append(sl)
    patches = jnp.stack(cols, axis=3)                     # [N, OH, OW, KH*KW, C]
    return patches.reshape(n * oh * ow, kh * kw * c), oh, ow


# ---------------------------------------------------------------------------
# Wrapper
# ---------------------------------------------------------------------------
def conv2d_bn_act(x_nchw, w, b, gamma, beta, run_mean, run_var,
                  *, stride, padding, residual=False, use_act=True, eps=1e-5):
    n, cin, h, wdt = x_nchw.shape
    cout, _, kh, kw = w.shape
    sh, sw = (stride, stride) if isinstance(stride, int) else tuple(stride)
    ph, pw = (padding, padding) if isinstance(padding, int) else tuple(padding)

    # Fold conv bias + eval-mode BN:  y = scale * conv(x, w) + shift
    inv_std = 1.0 / jnp.sqrt(run_var + eps)
    scale = gamma * inv_std                                # [Cout]
    shift = (gamma * (b - run_mean) * inv_std + beta).astype(jnp.float32)
    # Fold scale directly into the weights (epilogue keeps only the shift).
    wmat = jnp.transpose(w, (2, 3, 1, 0)) * scale          # [KH, KW, Cin, Cout]

    x_nhwc = jnp.transpose(x_nchw, (0, 2, 3, 1))           # NCHW -> NHWC
    coutp = _round_up(cout, 128)
    tc = 256 if coutp % 256 == 0 else 128

    if sh == 1 and sw == 1:
        # -------- fused path: im2col happens inside the kernel (in VMEM) --------
        hp, wp = h + 2 * ph, wdt + 2 * pw
        oh, ow = hp - kh + 1, wp - kw + 1
        cinp = _round_up(cin, 16)

        x_pad = jnp.pad(x_nhwc.astype(jnp.bfloat16),
                        ((0, 0), (ph, ph), (pw, pw), (0, cinp - cin)))
        wk = jnp.pad(wmat, ((0, 0), (0, 0), (0, cinp - cin), (0, coutp - cout)))
        wk = wk.reshape(kh * kw, cinp, coutp).astype(jnp.bfloat16)
        shift_p = jnp.pad(shift, (0, coutp - cout)).reshape(1, coutp)

        inputs = [x_pad, wk, shift_p]
        in_specs = [
            pl.BlockSpec((1, hp, wp, cinp), lambda ni, ci: (ni, 0, 0, 0)),
            pl.BlockSpec((kh * kw, cinp, tc), lambda ni, ci: (0, 0, ci)),
            pl.BlockSpec((1, tc), lambda ni, ci: (0, ci)),
        ]
        if residual:
            assert cin == cout and oh == h and ow == wdt, \
                "residual requires matching shapes"
            res = jnp.pad(x_nhwc.reshape(n, h * wdt, cin),
                          ((0, 0), (0, 0), (0, coutp - cout)))
            inputs.append(res)                              # f32, only when needed
            in_specs.append(pl.BlockSpec((1, oh * ow, tc),
                                         lambda ni, ci: (ni, 0, ci)))

        kernel = functools.partial(_fused_conv_kernel, kh=kh, kw=kw, oh=oh, ow=ow,
                                   residual=residual, use_act=use_act)
        out_arr = pl.pallas_call(
            kernel,
            out_shape=jax.ShapeDtypeStruct((n, oh * ow, coutp), x_nchw.dtype),
            grid_spec=pltpu.PrefetchScalarGridSpec(
                num_scalar_prefetch=0,
                grid=(n, coutp // tc),
                in_specs=in_specs,
                out_specs=pl.BlockSpec((1, oh * ow, tc),
                                       lambda ni, ci: (ni, 0, ci)),
                scratch_shapes=[pltpu.VMEM((oh * ow, tc), jnp.float32)]),
            compiler_params=pltpu.CompilerParams(
                dimension_semantics=("parallel", "parallel")),
        )(*inputs)
        out = out_arr[:, :, :cout].reshape(n, oh, ow, cout)
        return jnp.transpose(out, (0, 3, 1, 2))             # back to NCHW

    # -------- fallback path: strided convs via materialized im2col matmul --------
    # TODO(synk): fuse the strided-window gather into the kernel as well.
    assert not residual, "residual requires stride 1"
    patches, oh, ow = _extract_patches(x_nhwc.astype(jnp.bfloat16),
                                       kh, kw, sh, sw, ph, pw)
    m = n * oh * ow
    k = kh * kw * cin
    wflat = wmat.reshape(k, cout)

    tm = 256 if m >= 256 else 128
    tk = 256 if k >= 256 else 128
    mp, kp, cp = _round_up(m, tm), _round_up(k, tk), _round_up(cout, tc)

    patches_p = jnp.pad(patches, ((0, mp - m), (0, kp - k)))
    w_p = jnp.pad(wflat, ((0, kp - k), (0, cp - cout))).astype(jnp.bfloat16)
    shift_p = jnp.pad(shift, (0, cp - cout)).reshape(1, cp)

    kernel = functools.partial(_matmul_bn_kernel, use_act=use_act)
    out_p = pl.pallas_call(
        kernel,
        out_shape=jax.ShapeDtypeStruct((mp, cp), x_nchw.dtype),
        grid_spec=pltpu.PrefetchScalarGridSpec(
            num_scalar_prefetch=0,
            grid=(mp // tm, cp // tc, kp // tk),
            in_specs=[pl.BlockSpec((tm, tk), lambda i, j, kk: (i, kk)),
                      pl.BlockSpec((tk, tc), lambda i, j, kk: (kk, j)),
                      pl.BlockSpec((1, tc), lambda i, j, kk: (0, j))],
            out_specs=pl.BlockSpec((tm, tc), lambda i, j, kk: (i, j)),
            scratch_shapes=[pltpu.VMEM((tm, tc), jnp.float32)]),
        compiler_params=pltpu.CompilerParams(
            dimension_semantics=("parallel", "parallel", "arbitrary")),
    )(patches_p, w_p, shift_p)
    out = out_p[:m, :cout].reshape(n, oh, ow, cout)
    return jnp.transpose(out, (0, 3, 1, 2))                  # back to NCHW


# ---------------------------------------------------------------------------
# Reference + test
# ---------------------------------------------------------------------------
def _reference(x, w, b, gamma, beta, run_mean, run_var,
               *, stride, padding, residual, use_act, eps=1e-5):
    sh, sw = (stride, stride) if isinstance(stride, int) else tuple(stride)
    ph, pw = (padding, padding) if isinstance(padding, int) else tuple(padding)
    out = jax.lax.conv_general_dilated(
        x, w, (sh, sw), [(ph, ph), (pw, pw)],
        dimension_numbers=("NCHW", "OIHW", "NCHW"),
        precision=jax.lax.Precision.HIGHEST)
    out = out + b[None, :, None, None]
    out = (gamma[None, :, None, None] * (out - run_mean[None, :, None, None])
           / jnp.sqrt(run_var[None, :, None, None] + eps)
           + beta[None, :, None, None])
    if residual:
        out = out + x
    if use_act:
        out = jnp.maximum(out, 0.0)
    return out


def _run_case(key, *, n, cin, cout, h, w, ksz, stride, padding, residual, use_act):
    ks = jax.random.split(key, 7)
    x = jax.random.normal(ks[0], (n, cin, h, w), jnp.float32)
    wt = jax.random.normal(ks[1], (cout, cin, ksz, ksz), jnp.float32) * 0.1
    b = jax.random.normal(ks[2], (cout,), jnp.float32) * 0.1
    gamma = 1.0 + 0.1 * jax.random.normal(ks[3], (cout,), jnp.float32)
    beta = 0.1 * jax.random.normal(ks[4], (cout,), jnp.float32)
    run_mean = 0.1 * jax.random.normal(ks[5], (cout,), jnp.float32)
    run_var = jnp.abs(1.0 + 0.1 * jax.random.normal(ks[6], (cout,), jnp.float32))

    out = conv2d_bn_act(x, wt, b, gamma, beta, run_mean, run_var,
                        stride=stride, padding=padding,
                        residual=residual, use_act=use_act)
    out = jax.block_until_ready(out)
    ref = _reference(x, wt, b, gamma, beta, run_mean, run_var,
                     stride=stride, padding=padding,
                     residual=residual, use_act=use_act)
    assert out.shape == ref.shape, (out.shape, ref.shape)
    # bf16 MXU operands -> loosened tolerance (per review guidance).
    assert jnp.allclose(out, ref, atol=2e-2, rtol=2e-2), \
        f"mismatch: max abs err {jnp.max(jnp.abs(out - ref))}"


if __name__ == "__main__":
    key = jax.random.PRNGKey(0)
    k1, k2, k3 = jax.random.split(key, 3)
    # 3x3 / stride 1 / residual block -> fused in-VMEM-im2col path
    _run_case(k1, n=2, cin=4, cout=4, h=16, w=16, ksz=3, stride=1, padding=1,
              residual=True, use_act=True)
    # 1x1 pointwise conv, no activation -> fused path (no patch extraction at all)
    _run_case(k2, n=2, cin=4, cout=8, h=16, w=16, ksz=1, stride=1, padding=0,
              residual=False, use_act=False)
    # strided 3x3 downsampling conv -> fallback tiled-matmul path
    _run_case(k3, n=2, cin=4, cout=8, h=16, w=16, ksz=3, stride=2, padding=1,
              residual=False, use_act=True)
    print("KERNEL_OK")
</pallas_src>

<mosaic_0001>
module attributes {stable_mosaic.version = 11 : i64} {
  func.func @_fused_conv_kernel(%arg0: i32, %arg1: i32, %arg2: memref<1x18x18x16xbf16, #tpu.memory_space<vmem>>, %arg3: memref<9x16x128xbf16, #tpu.memory_space<vmem>>, %arg4: memref<1x128xf32, #tpu.memory_space<vmem>>, %arg5: memref<1x256x128xf32, #tpu.memory_space<vmem>>, %arg6: memref<1x256x128xf32, #tpu.memory_space<vmem>>, %arg7: memref<256x128xf32, #tpu.memory_space<vmem>>) attributes {dimension_semantics = [#tpu.dimension_semantics<parallel>, #tpu.dimension_semantics<parallel>], iteration_bounds = array<i64: 2, 1>, scalar_prefetch = 0 : i64, scratch_operands = 1 : i64, tpu.core_type = #tpu.core_type<tc>, window_params = [{transform_indices = @transform_0, window_bounds = array<i64: 1, 18, 18, 16>}, {transform_indices = @transform_1, window_bounds = array<i64: 9, 16, 128>}, {transform_indices = @transform_2, window_bounds = array<i64: 1, 128>}, {transform_indices = @transform_3, window_bounds = array<i64: 1, 256, 128>}, {transform_indices = @transform_4, window_bounds = array<i64: 1, 256, 128>}]} {
    %cst = arith.constant 0.000000e+00 : f32
    %0 = vector.broadcast %cst : f32 to vector<256x128xf32>
    %c0 = arith.constant 0 : index
    %c0_0 = arith.constant 0 : index
    %1 = vector.load %arg7[%c0, %c0_0] : memref<256x128xf32, #tpu.memory_space<vmem>>, vector<256x128xf32>
    tpu.vector_store %arg7[%c0, %c0_0], %0 {strides = array<i32>} : memref<256x128xf32, #tpu.memory_space<vmem>>, vector<256x128xf32>,
    %c0_1 = arith.constant 0 : index
    %c0_2 = arith.constant 0 : index
    %c0_3 = arith.constant 0 : index
    %c0_4 = arith.constant 0 : index
    %2 = vector.load %arg2[%c0_1, %c0_2, %c0_3, %c0_4] : memref<1x18x18x16xbf16, #tpu.memory_space<vmem>>, vector<1x16x16x16xbf16>
    %3 = vector.shape_cast %2 : vector<1x16x16x16xbf16> to vector<16x16x16xbf16>
    %4 = vector.shape_cast %3 : vector<16x16x16xbf16> to vector<256x16xbf16>
    %c0_5 = arith.constant 0 : index
    %c0_6 = arith.constant 0 : index
    %5 = vector.load %arg7[%c0_5, %c0_6] : memref<256x128xf32, #tpu.memory_space<vmem>>, vector<256x128xf32>
    %c0_7 = arith.constant 0 : index
    %c0_8 = arith.constant 0 : index
    %c0_9 = arith.constant 0 : index
    %6 = vector.load %arg3[%c0_7, %c0_8, %c0_9] : memref<9x16x128xbf16, #tpu.memory_space<vmem>>, vector<1x16x128xbf16>
    %7 = vector.shape_cast %6 : vector<1x16x128xbf16> to vector<16x128xbf16>
    %cst_10 = arith.constant dense<0.000000e+00> : vector<256x128xf32>
    %8 = tpu.matmul %4, %7, %cst_10 {dimension_numbers = #tpu.dot_dimension_numbers<[1], [0], [0], [1], [0, 0, 1, 1], [], []>} : vector<256x16xbf16>, vector<16x128xbf16>, vector<256x128xf32> -> vector<256x128xf32>
    %9 = arith.addf %5, %8 : vector<256x128xf32>
    %c0_11 = arith.constant 0 : index
    %c0_12 = arith.constant 0 : index
    %10 = vector.load %arg7[%c0_11, %c0_12] : memref<256x128xf32, #tpu.memory_space<vmem>>, vector<256x128xf32>
    tpu.vector_store %arg7[%c0_11, %c0_12], %9 {strides = array<i32>} : memref<256x128xf32, #tpu.memory_space<vmem>>, vector<256x128xf32>,
    %c0_13 = arith.constant 0 : index
    %c0_14 = arith.constant 0 : index
    %c1 = arith.constant 1 : index
    %c0_15 = arith.constant 0 : index
    %11 = vector.load %arg2[%c0_13, %c0_14, %c1, %c0_15] : memref<1x18x18x16xbf16, #tpu.memory_space<vmem>>, vector<1x16x16x16xbf16>
    %12 = vector.shape_cast %11 : vector<1x16x16x16xbf16> to vector<16x16x16xbf16>
    %13 = vector.shape_cast %12 : vector<16x16x16xbf16> to vector<256x16xbf16>
    %c0_16 = arith.constant 0 : index
    %c0_17 = arith.constant 0 : index
    %14 = vector.load %arg7[%c0_16, %c0_17] : memref<256x128xf32, #tpu.memory_space<vmem>>, vector<256x128xf32>
    %c1_18 = arith.constant 1 : index
    %c0_19 = arith.constant 0 : index
    %c0_20 = arith.constant 0 : index
    %15 = vector.load %arg3[%c1_18, %c0_19, %c0_20] : memref<9x16x128xbf16, #tpu.memory_space<vmem>>, vector<1x16x128xbf16>
    %16 = vector.shape_cast %15 : vector<1x16x128xbf16> to vector<16x128xbf16>
    %cst_21 = arith.constant dense<0.000000e+00> : vector<256x128xf32>
    %17 = tpu.matmul %13, %16, %cst_21 {dimension_numbers = #tpu.dot_dimension_numbers<[1], [0], [0], [1], [0, 0, 1, 1], [], []>} : vector<256x16xbf16>, vector<16x128xbf16>, vector<256x128xf32> -> vector<256x128xf32>
    %18 = arith.addf %14, %17 : vector<256x128xf32>
    %c0_22 = arith.constant 0 : index
    %c0_23 = arith.constant 0 : index
    %19 = vector.load %arg7[%c0_22, %c0_23] : memref<256x128xf32, #tpu.memory_space<vmem>>, vector<256x128xf32>
    tpu.vector_store %arg7[%c0_22, %c0_23], %18 {strides = array<i32>} : memref<256x128xf32, #tpu.memory_space<vmem>>, vector<256x128xf32>,
    %c0_24 = arith.constant 0 : index
    %c0_25 = arith.constant 0 : index
    %c2 = arith.constant 2 : index
    %c0_26 = arith.constant 0 : index
    %20 = vector.load %arg2[%c0_24, %c0_25, %c2, %c0_26] : memref<1x18x18x16xbf16, #tpu.memory_space<vmem>>, vector<1x16x16x16xbf16>
    %21 = vector.shape_cast %20 : vector<1x16x16x16xbf16> to vector<16x16x16xbf16>
    %22 = vector.shape_cast %21 : vector<16x16x16xbf16> to vector<256x16xbf16>
    %c0_27 = arith.constant 0 : index
    %c0_28 = arith.constant 0 : index
    %23 = vector.load %arg7[%c0_27, %c0_28] : memref<256x128xf32, #tpu.memory_space<vmem>>, vector<256x128xf32>
    %c2_29 = arith.constant 2 : index
    %c0_30 = arith.constant 0 : index
    %c0_31 = arith.constant 0 : index
    %24 = vector.load %arg3[%c2_29, %c0_30, %c0_31] : memref<9x16x128xbf16, #tpu.memory_space<vmem>>, vector<1x16x128xbf16>
    %25 = vector.shape_cast %24 : vector<1x16x128xbf16> to vector<16x128xbf16>
    %cst_32 = arith.constant dense<0.000000e+00> : vector<256x128xf32>
    %26 = tpu.matmul %22, %25, %cst_32 {dimension_numbers = #tpu.dot_dimension_numbers<[1], [0], [0], [1], [0, 0, 1, 1], [], []>} : vector<256x16xbf16>, vector<16x128xbf16>, vector<256x128xf32> -> vector<256x128xf32>
    %27 = arith.addf %23, %26 : vector<256x128xf32>
    %c0_33 = arith.constant 0 : index
    %c0_34 = arith.constant 0 : index
    %28 = vector.load %arg7[%c0_33, %c0_34] : memref<256x128xf32, #tpu.memory_space<vmem>>, vector<256x128xf32>
    tpu.vector_store %arg7[%c0_33, %c0_34], %27 {strides = array<i32>} : memref<256x128xf32, #tpu.memory_space<vmem>>, vector<256x128xf32>,
    %c0_35 = arith.constant 0 : index
    %c1_36 = arith.constant 1 : index
    %c0_37 = arith.constant 0 : index
    %c0_38 = arith.constant 0 : index
    %29 = vector.load %arg2[%c0_35, %c1_36, %c0_37, %c0_38] : memref<1x18x18x16xbf16, #tpu.memory_space<vmem>>, vector<1x16x16x16xbf16>
    %30 = vector.shape_cast %29 : vector<1x16x16x16xbf16> to vector<16x16x16xbf16>
    %31 = vector.shape_cast %30 : vector<16x16x16xbf16> to vector<256x16xbf16>
    %c0_39 = arith.constant 0 : index
    %c0_40 = arith.constant 0 : index
    %32 = vector.load %arg7[%c0_39, %c0_40] : memref<256x128xf32, #tpu.memory_space<vmem>>, vector<256x128xf32>
    %c3 = arith.constant 3 : index
    %c0_41 = arith.constant 0 : index
    %c0_42 = arith.constant 0 : index
    %33 = vector.load %arg3[%c3, %c0_41, %c0_42] : memref<9x16x128xbf16, #tpu.memory_space<vmem>>, vector<1x16x128xbf16>
    %34 = vector.shape_cast %33 : vector<1x16x128xbf16> to vector<16x128xbf16>
    %cst_43 = arith.constant dense<0.000000e+00> : vector<256x128xf32>
    %35 = tpu.matmul %31, %34, %cst_43 {dimension_numbers = #tpu.dot_dimension_numbers<[1], [0], [0], [1], [0, 0, 1, 1], [], []>} : vector<256x16xbf16>, vector<16x128xbf16>, vector<256x128xf32> -> vector<256x128xf32>
    %36 = arith.addf %32, %35 : vector<256x128xf32>
    %c0_44 = arith.constant 0 : index
    %c0_45 = arith.constant 0 : index
    %37 = vector.load %arg7[%c0_44, %c0_45] : memref<256x128xf32, #tpu.memory_space<vmem>>, vector<256x128xf32>
    tpu.vector_store %arg7[%c0_44, %c0_45], %36 {strides = array<i32>} : memref<256x128xf32, #tpu.memory_space<vmem>>, vector<256x128xf32>,
    %c0_46 = arith.constant 0 : index
    %c1_47 = arith.constant 1 : index
    %c1_48 = arith.constant 1 : index
    %c0_49 = arith.constant 0 : index
    %38 = vector.load %arg2[%c0_46, %c1_47, %c1_48, %c0_49] : memref<1x18x18x16xbf16, #tpu.memory_space<vmem>>, vector<1x16x16x16xbf16>
    %39 = vector.shape_cast %38 : vector<1x16x16x16xbf16> to vector<16x16x16xbf16>
    %40 = vector.shape_cast %39 : vector<16x16x16xbf16> to vector<256x16xbf16>
    %c0_50 = arith.constant 0 : index
    %c0_51 = arith.constant 0 : index
    %41 = vector.load %arg7[%c0_50, %c0_51] : memref<256x128xf32, #tpu.memory_space<vmem>>, vector<256x128xf32>
    %c4 = arith.constant 4 : index
    %c0_52 = arith.constant 0 : index
    %c0_53 = arith.constant 0 : index
    %42 = vector.load %arg3[%c4, %c0_52, %c0_53] : memref<9x16x128xbf16, #tpu.memory_space<vmem>>, vector<1x16x128xbf16>
    %43 = vector.shape_cast %42 : vector<1x16x128xbf16> to vector<16x128xbf16>
    %cst_54 = arith.constant dense<0.000000e+00> : vector<256x128xf32>
    %44 = tpu.matmul %40, %43, %cst_54 {dimension_numbers = #tpu.dot_dimension_numbers<[1], [0], [0], [1], [0, 0, 1, 1], [], []>} : vector<256x16xbf16>, vector<16x128xbf16>, vector<256x128xf32> -> vector<256x128xf32>
    %45 = arith.addf %41, %44 : vector<256x128xf32>
    %c0_55 = arith.constant 0 : index
    %c0_56 = arith.constant 0 : index
    %46 = vector.load %arg7[%c0_55, %c0_56] : memref<256x128xf32, #tpu.memory_space<vmem>>, vector<256x128xf32>
    tpu.vector_store %arg7[%c0_55, %c0_56], %45 {strides = array<i32>} : memref<256x128xf32, #tpu.memory_space<vmem>>, vector<256x128xf32>,
    %c0_57 = arith.constant 0 : index
    %c1_58 = arith.constant 1 : index
    %c2_59 = arith.constant 2 : index
    %c0_60 = arith.constant 0 : index
    %47 = vector.load %arg2[%c0_57, %c1_58, %c2_59, %c0_60] : memref<1x18x18x16xbf16, #tpu.memory_space<vmem>>, vector<1x16x16x16xbf16>
    %48 = vector.shape_cast %47 : vector<1x16x16x16xbf16> to vector<16x16x16xbf16>
    %49 = vector.shape_cast %48 : vector<16x16x16xbf16> to vector<256x16xbf16>
    %c0_61 = arith.constant 0 : index
    %c0_62 = arith.constant 0 : index
    %50 = vector.load %arg7[%c0_61, %c0_62] : memref<256x128xf32, #tpu.memory_space<vmem>>, vector<256x128xf32>
    %c5 = arith.constant 5 : index
    %c0_63 = arith.constant 0 : index
    %c0_64 = arith.constant 0 : index
    %51 = vector.load %arg3[%c5, %c0_63, %c0_64] : memref<9x16x128xbf16, #tpu.memory_space<vmem>>, vector<1x16x128xbf16>
    %52 = vector.shape_cast %51 : vector<1x16x128xbf16> to vector<16x128xbf16>
    %cst_65 = arith.constant dense<0.000000e+00> : vector<256x128xf32>
    %53 = tpu.matmul %49, %52, %cst_65 {dimension_numbers = #tpu.dot_dimension_numbers<[1], [0], [0], [1], [0, 0, 1, 1], [], []>} : vector<256x16xbf16>, vector<16x128xbf16>, vector<256x128xf32> -> vector<256x128xf32>
    %54 = arith.addf %50, %53 : vector<256x128xf32>
    %c0_66 = arith.constant 0 : index
    %c0_67 = arith.constant 0 : index
    %55 = vector.load %arg7[%c0_66, %c0_67] : memref<256x128xf32, #tpu.memory_space<vmem>>, vector<256x128xf32>
    tpu.vector_store %arg7[%c0_66, %c0_67], %54 {strides = array<i32>} : memref<256x128xf32, #tpu.memory_space<vmem>>, vector<256x128xf32>,
    %c0_68 = arith.constant 0 : index
    %c2_69 = arith.constant 2 : index
    %c0_70 = arith.constant 0 : index
    %c0_71 = arith.constant 0 : index
    %56 = vector.load %arg2[%c0_68, %c2_69, %c0_70, %c0_71] : memref<1x18x18x16xbf16, #tpu.memory_space<vmem>>, vector<1x16x16x16xbf16>
    %57 = vector.shape_cast %56 : vector<1x16x16x16xbf16> to vector<16x16x16xbf16>
    %58 = vector.shape_cast %57 : vector<16x16x16xbf16> to vector<256x16xbf16>
    %c0_72 = arith.constant 0 : index
    %c0_73 = arith.constant 0 : index
    %59 = vector.load %arg7[%c0_72, %c0_73] : memref<256x128xf32, #tpu.memory_space<vmem>>, vector<256x128xf32>
    %c6 = arith.constant 6 : index
    %c0_74 = arith.constant 0 : index
    %c0_75 = arith.constant 0 : index
    %60 = vector.load %arg3[%c6, %c0_74, %c0_75] : memref<9x16x128xbf16, #tpu.memory_space<vmem>>, vector<1x16x128xbf16>
    %61 = vector.shape_cast %60 : vector<1x16x128xbf16> to vector<16x128xbf16>
    %cst_76 = arith.constant dense<0.000000e+00> : vector<256x128xf32>
    %62 = tpu.matmul %58, %61, %cst_76 {dimension_numbers = #tpu.dot_dimension_numbers<[1], [0], [0], [1], [0, 0, 1, 1], [], []>} : vector<256x16xbf16>, vector<16x128xbf16>, vector<256x128xf32> -> vector<256x128xf32>
    %63 = arith.addf %59, %62 : vector<256x128xf32>
    %c0_77 = arith.constant 0 : index
    %c0_78 = arith.constant 0 : index
    %64 = vector.load %arg7[%c0_77, %c0_78] : memref<256x128xf32, #tpu.memory_space<vmem>>, vector<256x128xf32>
    tpu.vector_store %arg7[%c0_77, %c0_78], %63 {strides = array<i32>} : memref<256x128xf32, #tpu.memory_space<vmem>>, vector<256x128xf32>,
    %c0_79 = arith.constant 0 : index
    %c2_80 = arith.constant 2 : index
    %c1_81 = arith.constant 1 : index
    %c0_82 = arith.constant 0 : index
    %65 = vector.load %arg2[%c0_79, %c2_80, %c1_81, %c0_82] : memref<1x18x18x16xbf16, #tpu.memory_space<vmem>>, vector<1x16x16x16xbf16>
    %66 = vector.shape_cast %65 : vector<1x16x16x16xbf16> to vector<16x16x16xbf16>
    %67 = vector.shape_cast %66 : vector<16x16x16xbf16> to vector<256x16xbf16>
    %c0_83 = arith.constant 0 : index
    %c0_84 = arith.constant 0 : index
    %68 = vector.load %arg7[%c0_83, %c0_84] : memref<256x128xf32, #tpu.memory_space<vmem>>, vector<256x128xf32>
    %c7 = arith.constant 7 : index
    %c0_85 = arith.constant 0 : index
    %c0_86 = arith.constant 0 : index
    %69 = vector.load %arg3[%c7, %c0_85, %c0_86] : memref<9x16x128xbf16, #tpu.memory_space<vmem>>, vector<1x16x128xbf16>
    %70 = vector.shape_cast %69 : vector<1x16x128xbf16> to vector<16x128xbf16>
    %cst_87 = arith.constant dense<0.000000e+00> : vector<256x128xf32>
    %71 = tpu.matmul %67, %70, %cst_87 {dimension_numbers = #tpu.dot_dimension_numbers<[1], [0], [0], [1], [0, 0, 1, 1], [], []>} : vector<256x16xbf16>, vector<16x128xbf16>, vector<256x128xf32> -> vector<256x128xf32>
    %72 = arith.addf %68, %71 : vector<256x128xf32>
    %c0_88 = arith.constant 0 : index
    %c0_89 = arith.constant 0 : index
    %73 = vector.load %arg7[%c0_88, %c0_89] : memref<256x128xf32, #tpu.memory_space<vmem>>, vector<256x128xf32>
    tpu.vector_store %arg7[%c0_88, %c0_89], %72 {strides = array<i32>} : memref<256x128xf32, #tpu.memory_space<vmem>>, vector<256x128xf32>,
    %c0_90 = arith.constant 0 : index
    %c2_91 = arith.constant 2 : index
    %c2_92 = arith.constant 2 : index
    %c0_93 = arith.constant 0 : index
    %74 = vector.load %arg2[%c0_90, %c2_91, %c2_92, %c0_93] : memref<1x18x18x16xbf16, #tpu.memory_space<vmem>>, vector<1x16x16x16xbf16>
    %75 = vector.shape_cast %74 : vector<1x16x16x16xbf16> to vector<16x16x16xbf16>
    %76 = vector.shape_cast %75 : vector<16x16x16xbf16> to vector<256x16xbf16>
    %c0_94 = arith.constant 0 : index
    %c0_95 = arith.constant 0 : index
    %77 = vector.load %arg7[%c0_94, %c0_95] : memref<256x128xf32, #tpu.memory_space<vmem>>, vector<256x128xf32>
    %c8 = arith.constant 8 : index
    %c0_96 = arith.constant 0 : index
    %c0_97 = arith.constant 0 : index
    %78 = vector.load %arg3[%c8, %c0_96, %c0_97] : memref<9x16x128xbf16, #tpu.memory_space<vmem>>, vector<1x16x128xbf16>
    %79 = vector.shape_cast %78 : vector<1x16x128xbf16> to vector<16x128xbf16>
    %cst_98 = arith.constant dense<0.000000e+00> : vector<256x128xf32>
    %80 = tpu.matmul %76, %79, %cst_98 {dimension_numbers = #tpu.dot_dimension_numbers<[1], [0], [0], [1], [0, 0, 1, 1], [], []>} : vector<256x16xbf16>, vector<16x128xbf16>, vector<256x128xf32> -> vector<256x128xf32>
    %81 = arith.addf %77, %80 : vector<256x128xf32>
    %c0_99 = arith.constant 0 : index
    %c0_100 = arith.constant 0 : index
    %82 = vector.load %arg7[%c0_99, %c0_100] : memref<256x128xf32, #tpu.memory_space<vmem>>, vector<256x128xf32>
    tpu.vector_store %arg7[%c0_99, %c0_100], %81 {strides = array<i32>} : memref<256x128xf32, #tpu.memory_space<vmem>>, vector<256x128xf32>,
    %c0_101 = arith.constant 0 : index
    %c0_102 = arith.constant 0 : index
    %83 = vector.load %arg7[%c0_101, %c0_102] : memref<256x128xf32, #tpu.memory_space<vmem>>, vector<256x128xf32>
    %c0_103 = arith.constant 0 : index
    %c0_104 = arith.constant 0 : index
    %84 = vector.load %arg4[%c0_103, %c0_104] : memref<1x128xf32, #tpu.memory_space<vmem>>, vector<1x128xf32>
    %85 = vector.broadcast %84 : vector<1x128xf32> to vector<256x128xf32>
    %86 = arith.addf %83, %85 : vector<256x128xf32>
    %c0_105 = arith.constant 0 : index
    %c0_106 = arith.constant 0 : index
    %c0_107 = arith.constant 0 : index
    %87 = vector.load %arg5[%c0_105, %c0_106, %c0_107] : memref<1x256x128xf32, #tpu.memory_space<vmem>>, vector<1x256x128xf32>
    %88 = vector.shape_cast %87 : vector<1x256x128xf32> to vector<256x128xf32>
    %89 = arith.addf %86, %88 : vector<256x128xf32>
    %cst_108 = arith.constant 0.000000e+00 : f32
    %90 = vector.broadcast %cst_108 : f32 to vector<256x128xf32>
    %91 = arith.maximumf %89, %90 : vector<256x128xf32>
    %92 = vector.shape_cast %91 : vector<256x128xf32> to vector<1x256x128xf32>
    %c0_109 = arith.constant 0 : index
    %c0_110 = arith.constant 0 : index
    %c0_111 = arith.constant 0 : index
    %93 = vector.load %arg6[%c0_109, %c0_110, %c0_111] : memref<1x256x128xf32, #tpu.memory_space<vmem>>, vector<1x256x128xf32>
    tpu.vector_store %arg6[%c0_109, %c0_110, %c0_111], %92 {strides = array<i32>} : memref<1x256x128xf32, #tpu.memory_space<vmem>>, vector<1x256x128xf32>,
    return
  }
  func.func @transform_0(%arg0: i32, %arg1: i32) -> (i32, i32, i32, i32) {
    %c0_i32 = arith.constant 0 : i32
    %c0_i32_0 = arith.constant 0 : i32
    %c0_i32_1 = arith.constant 0 : i32
    %c0_i32_2 = arith.constant 0 : i32
    return %arg0, %c0_i32, %c0_i32_0, %c0_i32_1 : i32, i32, i32, i32
  }
  func.func @transform_1(%arg0: i32, %arg1: i32) -> (i32, i32, i32) {
    %c0_i32 = arith.constant 0 : i32
    %c0_i32_0 = arith.constant 0 : i32
    %c0_i32_1 = arith.constant 0 : i32
    return %c0_i32, %c0_i32_0, %arg1 : i32, i32, i32
  }
  func.func @transform_2(%arg0: i32, %arg1: i32) -> (i32, i32) {
    %c0_i32 = arith.constant 0 : i32
    %c0_i32_0 = arith.constant 0 : i32
    return %c0_i32, %arg1 : i32, i32
  }
  func.func @transform_3(%arg0: i32, %arg1: i32) -> (i32, i32, i32) {
    %c0_i32 = arith.constant 0 : i32
    %c0_i32_0 = arith.constant 0 : i32
    return %arg0, %c0_i32, %arg1 : i32, i32, i32
  }
  func.func @transform_4(%arg0: i32, %arg1: i32) -> (i32, i32, i32) {
    %c0_i32 = arith.constant 0 : i32
    %c0_i32_0 = arith.constant 0 : i32
    return %arg0, %c0_i32, %arg1 : i32, i32, i32
  }
}

</mosaic_0001>

<bundles_post_ra>
// kernel: tpu_custom_call.1
= control target key start
LH: loop header
LB: loop body
LE: loop exit
PB: predicated region body
PF: predicated region fallthrough
CT: control target
= control target key end

     0   :  { %9 = vsyncpa [#allocation4], 0  ;;  %s7778_s0 = inlined_call_operand.vmem [shape: bf16[2,18,18,16], index: 0, kind: input, shape index: {}]   ;;  %s7779_s1 = inlined_call_operand.vmem [shape: bf16[9,16,128], index: 1, kind: input, shape index: {}]   ;;  %s7780_s2 = inlined_call_operand.vmem [shape: f32[1,128], index: 2, kind: input, shape index: {}]   ;;  %s7781_s3 = inlined_call_operand.vmem [shape: f32[2,256,128], index: 3, kind: input, shape index: {}]   ;;  %s7782_s4 = inlined_call_operand.hbm [shape: f32[2,256,128], index: 4, kind: output, shape index: {}]  }
   0x1   :  { %11 = vsyncpa [#allocation4 + $0x1], 0  ;;  %s6302_s15 = smov 0   ;;  %s6304_s16 = smov 0  }
   0x2   :  { %s6306_s17 = smov 0   ;;  %s6308_s18 = smov 0  }
   0x3   :  { %s6310_s19 = smov 0   ;;  %s6312_s20 = smov 0  }
   0x4 LB: > { %s5365_s21 = sadd.s32 4294967295, %s6273_s20   ;;  %s5366_s22 = sadd.s32 4294967294, %s6273_s20   ;;  %s6273_s20 = sphi %s6312_s20, %s17_s20   ;;  %s6269_s19 = sphi %s6310_s19, %s7819_s19   ;;  %s6265_s18 = sphi %s6308_s18, %s7818_s18   ;;  %s6261_s17 = sphi %s6306_s17, %s7817_s17   ;;  %s6257_s16 = sphi %s6304_s16, %s7816_s16   ;;  %s6253_s15 = sphi %s6302_s15, %s7815_s15  }
   0x5   : > { %s29_s23 = sadd.s32 1, %s6269_s19  ;;  %s144_s24 = sadd.s32 1, %s6261_s17 }
   0x6   : > { %p31_p0 = scmp.ge.s32.totalorder %s29_s23, 2  ;;  %p154_p1 = scmp.ne.s32.totalorder %s6261_s17, %s6257_s16 }
   0x7   : > { %p155_p2 = scmp.eq.s32.totalorder %s5365_s21, 1  ;;  %p160_p3 = scmp.ne.s32.totalorder %s6257_s16, %s6253_s15 }
   0x8   : > { %s7821_s23 = smov (%p31_p0, %s29_s23), 0  ;;  %p161_p5 = scmp.eq.s32.totalorder %s5366_s22, 1 }
   0x9   : > { %p6342_p4 = por %p155_p2, %p154_p1  ;;  %s139_s26 = ssub.s32 %s6269_s19, %s7821_s23 }
   0xa   : > { %p5371_p6 = scmp.ge.s32.totalorder %s6273_s20, 1  ;;  %p142_p7 = scmp.eq.s32.totalorder %s139_s26, 0 }
   0xb   : > { %p6349_p8 = por %p161_p5, %p160_p3  ;;  %p211_p9 = scmp.lt.s32.totalorder %s6273_s20, 3 }
   0xc   : > { %s6355_s28 = scalar_select %p142_p7, %s6261_s17, %s144_s24  }
   0xd   : > { %p212_p10 = pnand %p5371_p6, %p211_p9 }
   0xf   : > { %215 = sbr.rel (%p212_p10) target bundleno = 744 (0x2e8), region = 36 }
  0x14   : > { %v6090_v0 = vld [vmem:[%s7779_s1] sm:$0xff]  ;;  %p252_p11 = scmp.lt.s32.totalorder %s6265_s18, 1  ;;  %v6092_v1 = vld [vmem:[%s7779_s1 + $0x10] sm:$0xff]  ;;  %v6109_v2 = vld [vmem:[%s7779_s1 + $0x18] sm:$0xff]  ;;  %vm457_vm0 = vcmask 130048   ;;  %vm1480_vm3 = vcmask 1042432  }
  0x15   : > { %v6091_v3 = vld [vmem:[%s7779_s1 + $0x8] sm:$0xff]  ;;  %v6110_v4 = vld [vmem:[%s7779_s1 + $0x20] sm:$0xff]  ;;  %6132 = vmatpush.bf16.msra.mxu1 %v6090_v0  ;;  %6133 = vmatpush.bf16.msra.mxu2 %v6090_v0  ;;  %v6128_v23 = vld [vmem:[%s7779_s1 + $0x30] sm:$0xff]  ;;  %vm707_vm1 = vsmask.f32 3328  ;;  %vm1481_vm4 = vcmask 1046532  }
  0x16   : > { %s6374_s13 = scalar_select %p252_p11, %s6265_s18, 1  ;;  %6134 = vmatpush.bf16.msra.mxu3 %v6090_v0  ;;  %513 = vmatpush.bf16.msra.mxu0 %v6090_v0  ;;  %v6129_v24 = vld [vmem:[%s7779_s1 + $0x38] sm:$0xff]  ;;  %v6111_v25 = vld [vmem:[%s7779_s1 + $0x28] sm:$0xff]  ;;  %v6130_v26 = vld [vmem:[%s7779_s1 + $0x40] sm:$0xff]  ;;  %vm708_vm2 = vsmask.f32 7440 }
  0x17   : > { %vm6433_vm5 = vmor %vm707_vm1, %vm708_vm2  ;;  %s249_s11 = sand.u32 1, %s6257_s16   ;;  %s6131_s5 = sshll.u32 %s6265_s18, 8 }
  0x18   : > { %s6135_s14 = smul.u32 216, %s6374_s13  ;;  %vm6437_vm6 = vmor %vm1480_vm3, %vm1481_vm4  ;;  %s6073_s10 = sshll.u32 %s6374_s13, 8 }
  0x19   : > { %1739 = vmatpush.bf16.msrb.mxu2 %v6092_v1  ;;  %1238 = vmatpush.bf16.msrb.mxu1 %v6091_v3  ;;  %s5372_s26 = sshll.u32 %s249_s11, 8  ;;  %s5244_s8 = scalar_lea.hbm %s7782_s4, %s6131_s5 }
  0x1a   : > { %2094 = vmatpush.bf16.msrb.mxu3 %v6109_v2  ;;  %2816 = vmatpush.bf16.msrb.mxu0 %v6110_v4  ;;  %s6380_s24 = scalar_lea.vmem %s7778_s0, %s6135_s14  ;;  %s7404_s14 = scalar_lea.vmem %s7781_s3, %s6073_s10 }
  0x1b   : > { %v6078_v5 = vld [vmem:[%s6380_s24 + $0x30] sm:$0xff]  ;;  %v6082_v6 = vld [vmem:[%s6380_s24 + $0x60] sm:$0xff]  ;;  %v6080_v13 = vld [vmem:[%s6380_s24 + $0x48] sm:$0xff]  ;;  %s7436_s29 = scalar_lea.vmem [#allocation3], %s5372_s26  ;;  %s5247_s10 = sshll.u32 %s5244_s8, 4  ;;  %s5248_s10 = int_to_ptr.hbm [resolvable:$true] %s5247_s10 }
  0x1c   : > { %v6086_v7 = vld [vmem:[%s6380_s24 + $0x90] sm:$0xff]  ;;  %v6074_v8 = vld [vmem:[%s6380_s24] sm:$0xff]  ;;  %5448 = vmatmul.msk.bf16.vlgmr.msra.gmra.mxu1 %vm457_vm0, %v6078_v5  ;;  %5452 = vmatmul.msk.bf16.vlgmr.msra.gmra.mxu2 %vm457_vm0, %v6082_v6  ;;  %v6084_v14 = vld [vmem:[%s6380_s24 + $0x78] sm:$0xff]  ;;  %s5245_s9 = sshll.u32 %s7436_s29, 4  ;;  %s5232_s18 = scalar_lea.sflag [#allocation4], %s249_s11  ;;  %s5246_s9 = int_to_ptr.vmem [resolvable:$true] %s5245_s9 }
  0x1d   : > { %5456 = vmatmul.msk.bf16.vlgmr.msra.gmra.mxu3 %vm457_vm0, %v6086_v7  ;;  %5444 = vmatmul.msk.bf16.vlgmr.msra.gmra.mxu0 %vm457_vm0, %v6074_v8  ;;  %v6079_v9 = vld [vmem:[%s6380_s24 + $0x3c] sm:$0xff]  ;;  %v6083_v10 = vld [vmem:[%s6380_s24 + $0x6c] sm:$0xff]  ;;  %v660_v18 = vld [vmem:[%s6380_s24 + $0x4] sm:$0xf]  ;;  %s6209_s12 = sshra.s32 %s5248_s10, 4  ;;  %s6215_s22 = scalar_lea.hbm %s7782_s4, 512  ;;  %s6210_s12 = int_to_ptr.hbm [resolvable:$true] %s6209_s12 }
  0x1e   : > { %v6087_v11 = vld [vmem:[%s6380_s24 + $0x9c] sm:$0xff]  ;;  %v6075_v12 = vld [vmem:[%s6380_s24 + $0xc] sm:$0xff]  ;;  %v720_v21 = vshll.u32 %v660_v18, 16  ;;  %v724_v22 = vshrl.u32 %v660_v18, 16  ;;  %3669 = vmatpush.bf16.msra.mxu2 %v6128_v23  ;;  %4391 = vmatpush.bf16.msra.mxu3 %v6129_v24  ;;  %v661_v29 = vld [vmem:[%s6380_s24 + $0x8] sm:$0x1]  ;;  %p6216_p1 = scmp.lt.s32.totalorder %s6210_s12, %s7782_s4 }
  0x1f   : > { %v6088_v15 = vld [vmem:[%s6380_s24 + $0xa8] sm:$0xff]  ;;  %v6076_v16 = vld [vmem:[%s6380_s24 + $0x18] sm:$0xff]  ;;  %v659_v17 = vld [vmem:[%s6380_s24] sm:$0xf]  ;;  %3314 = vmatpush.bf16.msra.mxu1 %v6111_v25  ;;  %4889 = vmatpush.bf16.msra.mxu0 %v6130_v26  ;;  %v730_v39 = vshll.u32 %v661_v29, 16  ;;  %s6211_s13 = scalar_lea.hbm %s6210_s12, 256 }
  0x20   : > { %v711_v19 = vshrl.u32 %v659_v17, 16  ;;  %v714_v20 = vshll.u32 %v659_v17, 16  ;;  %v5638_v27 = vld [vmem:[%s6380_s24 + $0xc] sm:$0xf]  ;;  %v5639_v28 = vld [vmem:[%s6380_s24 + $0x10] sm:$0xf]  ;;  %p6212_p12 = scmp.ne.s32.totalorder %s6210_s12, %s6211_s13  ;;  %p6217_p2 = scmp.lt.s32.totalorder %s6215_s22, %s6211_s13 }
  0x21   : > { %v722_v32 = vrot.slane %v720_v21, 5  ;;  %v726_v33 = vrot.slane %v724_v22, 4  ;;  %v1385_v34 = vld [vmem:[%s6380_s24 + $0x4] sm:$0xf]  ;;  %v2289_v35 = vshrl.u32 %v5638_v27, 16  ;;  %v2292_v36 = vshll.u32 %v5638_v27, 16 }
  0x22   : > { %v713_v30 = vrot.slane %v711_v19, 4  ;;  %v716_v31 = vrot.slane %v714_v20, 5  ;;  %v2298_v37 = vshll.u32 %v5639_v28, 16  ;;  %v2302_v38 = vshrl.u32 %v5639_v28, 16  ;;  %v1384_v43 = vld [vmem:[%s6380_s24] sm:$0xe]  ;;  %p6213_p13 = pnand %p6212_p12, %p6342_p4  ;;  %p6218_p3 = por %p6217_p2, %p6216_p1 }
  0x23   : > { %v727_v41 = vor.u32 %v726_v33, %v722_v32  ;;  %v1485_v42 = vrot.slane %v1385_v34, 5  ;;  %v2291_v44 = vrot.slane %v2289_v35, 4  ;;  %v2294_v45 = vrot.slane %v2292_v36, 5  ;;  %v1386_v48 = vld [vmem:[%s6380_s24 + $0x8] sm:$0x1]  ;;  %v6081_v50 = vld [vmem:[%s6380_s24 + $0x54] sm:$0xff] }
  0x24   : > { %v717_v40 = vor.u32 %v716_v31, %v713_v30  ;;  %v2300_v46 = vrot.slane %v2298_v37, 5  ;;  %v2304_v47 = vrot.slane %v2302_v38, 4  ;;  %v5640_v49 = vld [vmem:[%s6380_s24 + $0x14] sm:$0x1]  ;;  %v6085_v51 = vld [vmem:[%s6380_s24 + $0x84] sm:$0xff]  ;;  %v732_v52 = vrot.slane %v730_v39, 5  ;;  %p6214_p0 = pneg %p6213_p13 }
  0x25   : > { %v6089_v53 = vld [vmem:[%s6380_s24 + $0xb4] sm:$0xff]  ;;  %v6077_v54 = vld [vmem:[%s6380_s24 + $0x24] sm:$0xff]  ;;  %v728_v57 = vrot.slane %v727_v41, 4  ;;  %v5482_v58 = vrot.slane %v1384_v43, 9  ;;  %v1487_v59 = vrot.slane %v1485_v42, 4  ;;  %v1488_v61 = vrot.slane %v1386_v48, 5 }
  0x26   : > { %v718_v56 = vrot.slane %v717_v40, 4  ;;  %v2295_v62 = vor.u32 %v2294_v45, %v2291_v44  ;;  %v2305_v63 = vor.u32 %v2304_v47, %v2300_v46  ;;  %v2308_v0 = vshll.u32 %v5640_v49, 16  ;;  %v662_v1 = vld [vmem:[%s6380_s24 + $0xc] sm:$0xf]  ;;  %v663_v2 = vld [vmem:[%s6380_s24 + $0x10] sm:$0xf]  ;;  %p6219_p5 = pnand %p6218_p3, %p6214_p0 }
  0x27   : > { %v733_v4 = vsel %vm6433_vm5, %v728_v57, %v732_v52  ;;  %v1486_v5 = vsel %vm6437_vm6, %v5482_v58, %v1485_v42  ;;  %v5641_v6 = vld [vmem:[%s6380_s24 + $0x18] sm:$0xf]  ;;  %v5642_v7 = vld [vmem:[%s6380_s24 + $0x1c] sm:$0xf]  ;;  %v1489_v8 = vsel %vm6437_vm6, %v1487_v59, %v1488_v61  ;;  %v664_v26 = vld [vmem:[%s6380_s24 + $0x14] sm:$0x1] }
  0x28   : > { %v723_v3 = vsel %vm6433_vm5, %v718_v56, %v722_v32  ;;  %v2316_v17 = vshll.u32 %v5641_v6, 16  ;;  %v2322_v18 = vshll.u32 %v5642_v7, 16  ;;  %v2326_v19 = vshrl.u32 %v5642_v7, 16  ;;  %v1388_v31 = vld [vmem:[%s6380_s24 + $0x10] sm:$0xf] }
  0x29   : > { %v1129_v20 = vunpack.c.l.b16 %v723_v3  ;;  %v1130_v21 = vunpack.c.l.b16 %v733_v4  ;;  %v1630_v22 = vunpack.c.l.b16 %v1486_v5  ;;  %v1631_v23 = vunpack.c.l.b16 %v1489_v8  ;;  %v5643_v38 = vld [vmem:[%s6380_s24 + $0x20] sm:$0x1]  ;;  %v1387_v45 = vld [vmem:[%s6380_s24 + $0xc] sm:$0xe]  ;;  %v5644_v7 = vld [vmem:[%s6380_s24 + $0x24] sm:$0xf] }
  0x2a   : > { %v2318_v33 = vrot.slane %v2316_v17, 5  ;;  %v2324_v34 = vrot.slane %v2322_v18, 5  ;;  %v2328_v35 = vrot.slane %v2326_v19, 4  ;;  %v754_v39 = vshll.u32 %v664_v26, 16  ;;  %v6093_v49 = vld [vmem:[%s6380_s24 + $0xc] sm:$0xff] }
  0x2b   : > { %v1161_v40 = vpack.c.b16 %v1130_v21, %v1129_v20  ;;  %v1492_v43 = vrot.slane %v1388_v31, 5  ;;  %v1662_v44 = vpack.c.b16 %v1631_v23, %v1630_v22  ;;  %v2332_v48 = vshll.u32 %v5643_v38, 16  ;;  %v5645_v8 = vld [vmem:[%s6380_s24 + $0x28] sm:$0xf]  ;;  %v667_v17 = vld [vmem:[%s6380_s24 + $0x20] sm:$0x1] }
  0x2c   : > { %5449 = vmatmul.msk.bf16.gmra.mxu1 %vm457_vm0, %v6079_v9  ;;  %5453 = vmatmul.msk.bf16.gmra.mxu2 %vm457_vm0, %v6083_v10  ;;  %v2296_v9 = vrot.slane %v2295_v62, 4  ;;  %v2306_v10 = vrot.slane %v2305_v63, 4  ;;  %v2329_v47 = vor.u32 %v2328_v35, %v2324_v34  ;;  %v756_v52 = vrot.slane %v754_v39, 5  ;;  %v1391_v31 = vld [vmem:[%s6380_s24 + $0x1c] sm:$0xf] }
  0x2d   : > { %5457 = vmatmul.msk.bf16.gmra.mxu3 %vm457_vm0, %v6087_v11  ;;  %5445 = vmatmul.msk.bf16.gmra.mxu0 %vm457_vm0, %v6075_v12  ;;  %v2310_v11 = vrot.slane %v2308_v0, 5  ;;  %v735_v12 = vshrl.u32 %v662_v1, 16  ;;  %v5483_v58 = vrot.slane %v1387_v45, 9  ;;  %v1494_v59 = vrot.slane %v1492_v43, 4  ;;  %v6094_v39 = vld [vmem:[%s6380_s24 + $0x18] sm:$0xff] }
  0x2e   : > { %v2301_v24 = vsel %vm6433_vm5, %v2296_v9, %v2300_v46  ;;  %v2330_v63 = vrot.slane %v2329_v47, 4  ;;  %v2334_v0 = vrot.slane %v2332_v48, 5  ;;  %v2337_v18 = vshrl.u32 %v5644_v7, 16  ;;  %v1390_v45 = vld [vmem:[%s6380_s24 + $0x18] sm:$0xe] }
  0x2f   : > { %v2311_v25 = vsel %vm6433_vm5, %v2306_v10, %v2310_v11  ;;  %v737_v27 = vrot.slane %v735_v12, 4  ;;  %v2707_v36 = vunpack.c.l.b16 %v2301_v24  ;;  %v1493_v9 = vsel %vm6437_vm6, %v5483_v58, %v1492_v43 }
  0x30   : > { %v2708_v37 = vunpack.c.l.b16 %v2311_v25  ;;  %v2335_v12 = vsel %vm6433_vm5, %v2330_v63, %v2334_v0  ;;  %v2340_v19 = vshll.u32 %v5644_v7, 16  ;;  %v2346_v20 = vshll.u32 %v5645_v8, 16  ;;  %v5648_v63 = vld [vmem:[%s6380_s24 + $0x34] sm:$0xf] }
  0x31   : > { %v2350_v21 = vshrl.u32 %v5645_v8, 16  ;;  %v1632_v24 = vunpack.c.l.b16 %v1493_v9  ;;  %v1499_v43 = vrot.slane %v1391_v31, 5  ;;  %v2370_v8 = vshll.u32 %v5648_v63, 16 }
  0x32   : > { %v2374_v9 = vshrl.u32 %v5648_v63, 16 }
  0x33   : > { %v2352_v35 = vrot.slane %v2350_v21, 4 }
  0x3c   : > { %5450 = vmatmul.msk.bf16.gmra.mxu1 %vm457_vm0, %v6080_v13  ;;  %5454 = vmatmul.msk.bf16.gmra.mxu2 %vm457_vm0, %v6084_v14  ;;  %v738_v13 = vshll.u32 %v662_v1, 16  ;;  %v744_v14 = vshll.u32 %v663_v2, 16 }
  0x3d   : > { %5458 = vmatmul.msk.bf16.gmra.mxu3 %vm457_vm0, %v6088_v15  ;;  %5446 = vmatmul.msk.bf16.gmra.mxu0 %vm457_vm0, %v6076_v16  ;;  %v748_v15 = vshrl.u32 %v663_v2, 16  ;;  %v2313_v16 = vshrl.u32 %v5641_v6, 16 }
  0x3e   : > { %v740_v28 = vrot.slane %v738_v13, 5  ;;  %v746_v29 = vrot.slane %v744_v14, 5 }
  0x3f   : > { %v750_v30 = vrot.slane %v748_v15, 4  ;;  %v2315_v32 = vrot.slane %v2313_v16, 4 }
  0x40   : > { %v741_v41 = vor.u32 %v740_v28, %v737_v27  ;;  %v2710_v27 = vunpack.c.l.b16 %v2335_v12 }
  0x41   : > { %v751_v42 = vor.u32 %v750_v30, %v746_v29  ;;  %v2319_v46 = vor.u32 %v2318_v33, %v2315_v32  ;;  %v778_v30 = vshll.u32 %v667_v17, 16  ;;  %v2339_v32 = vrot.slane %v2337_v18, 4 }
  0x42   : > { %v742_v56 = vrot.slane %v741_v41, 4  ;;  %v2342_v33 = vrot.slane %v2340_v19, 5 }
  0x43   : > { %v752_v57 = vrot.slane %v751_v42, 4  ;;  %v2320_v62 = vrot.slane %v2319_v46, 4  ;;  %v780_v42 = vrot.slane %v778_v30, 5  ;;  %v1392_v46 = vld [vmem:[%s6380_s24 + $0x20] sm:$0x1] }
  0x44   : > { %v747_v5 = vsel %vm6433_vm5, %v742_v56, %v746_v29  ;;  %v2343_v47 = vor.u32 %v2342_v33, %v2339_v32  ;;  %v1502_v56 = vrot.slane %v1392_v46, 5 }
  0x45   : > { %v757_v6 = vsel %vm6433_vm5, %v752_v57, %v756_v52  ;;  %v2325_v11 = vsel %vm6433_vm5, %v2320_v62, %v2324_v34  ;;  %v1131_v22 = vunpack.c.l.b16 %v747_v5  ;;  %v2348_v34 = vrot.slane %v2346_v20, 5  ;;  %v5647_v57 = vld [vmem:[%s6380_s24 + $0x30] sm:$0xf]  ;;  %v670_v20 = vld [vmem:[%s6380_s24 + $0x2c] sm:$0x1] }
  0x46   : > { %v1132_v23 = vunpack.c.l.b16 %v757_v6  ;;  %v2709_v26 = vunpack.c.l.b16 %v2325_v11  ;;  %v2364_v5 = vshll.u32 %v5647_v57, 16  ;;  %v802_v31 = vshll.u32 %v670_v20, 16  ;;  %v1396_v20 = vld [vmem:[%s6380_s24 + $0x30] sm:$0xe] }
  0x47   : > { %v2353_v48 = vor.u32 %v2352_v35, %v2348_v34 }
  0x4c   : > { %5451 = vmatmul.msk.bf16.gmra.mxu1 %vm457_vm0, %v6081_v50  ;;  %5455 = vmatmul.msk.bf16.gmra.mxu2 %vm457_vm0, %v6085_v51  ;;  %v2739_v50 = vpack.c.b16 %v2708_v37, %v2707_v36  ;;  %v1389_v51 = vld [vmem:[%s6380_s24 + $0x14] sm:$0x1]  ;;  %v5646_v36 = vld [vmem:[%s6380_s24 + $0x2c] sm:$0x1]  ;;  %v1162_v37 = vpack.c.b16 %v1132_v23, %v1131_v22  ;;  %v2366_v22 = vrot.slane %v2364_v5, 5 }
  0x4d   : > { %5459 = vmatmul.msk.bf16.gmra.mxu3 %vm457_vm0, %v6089_v53  ;;  %5447 = vmatmul.msk.bf16.gmra.mxu0 %vm457_vm0, %v6077_v54  ;;  %v665_v53 = vld [vmem:[%s6380_s24 + $0x18] sm:$0xf]  ;;  %v666_v54 = vld [vmem:[%s6380_s24 + $0x1c] sm:$0xf]  ;;  %v1495_v61 = vrot.slane %v1389_v51, 5 }
  0x4e   : > { %v759_v1 = vshrl.u32 %v665_v53, 16  ;;  %v762_v2 = vshll.u32 %v665_v53, 16  ;;  %v768_v3 = vshll.u32 %v666_v54, 16  ;;  %v772_v4 = vshrl.u32 %v666_v54, 16  ;;  %v669_v51 = vld [vmem:[%s6380_s24 + $0x28] sm:$0xf] }
  0x4f   : > { %v1496_v10 = vsel %vm6437_vm6, %v1494_v59, %v1495_v61  ;;  %v5484_v53 = vrot.slane %v1390_v45, 9  ;;  %v1501_v54 = vrot.slane %v1499_v43, 4  ;;  %v2344_v59 = vrot.slane %v2343_v47, 4 }
  0x50   : > { %v761_v13 = vrot.slane %v759_v1, 4  ;;  %v764_v14 = vrot.slane %v762_v2, 5  ;;  %v770_v15 = vrot.slane %v768_v3, 5  ;;  %v774_v16 = vrot.slane %v772_v4, 4 }
  0x51   : > { %v1633_v25 = vunpack.c.l.b16 %v1496_v10  ;;  %v2354_v61 = vrot.slane %v2353_v48, 4  ;;  %v792_v2 = vshll.u32 %v669_v51, 16  ;;  %v796_v3 = vshrl.u32 %v669_v51, 16 }
  0x52   : > { %v765_v28 = vor.u32 %v764_v14, %v761_v13  ;;  %v775_v29 = vor.u32 %v774_v16, %v770_v15  ;;  %v2361_v4 = vshrl.u32 %v5647_v57, 16  ;;  %v1500_v6 = vsel %vm6437_vm6, %v5484_v53, %v1499_v43 }
  0x53   : > { %v1663_v38 = vpack.c.b16 %v1633_v25, %v1632_v24  ;;  %v1503_v7 = vsel %vm6437_vm6, %v1501_v54, %v1502_v56  ;;  %v2349_v12 = vsel %vm6433_vm5, %v2344_v59, %v2348_v34  ;;  %v794_v16 = vrot.slane %v792_v2, 5  ;;  %v1394_v25 = vld [vmem:[%s6380_s24 + $0x28] sm:$0xf]  ;;  %v5651_v59 = vld [vmem:[%s6380_s24 + $0x40] sm:$0xf] }
  0x54   : > { %v766_v41 = vrot.slane %v765_v28, 4  ;;  %v798_v17 = vrot.slane %v796_v3, 4  ;;  %v1634_v18 = vunpack.c.l.b16 %v1500_v6  ;;  %v1635_v19 = vunpack.c.l.b16 %v1503_v7  ;;  %v5649_v28 = vld [vmem:[%s6380_s24 + $0x38] sm:$0x1] }
  0x55   : > { %v2363_v21 = vrot.slane %v2361_v4, 4  ;;  %v2711_v23 = vunpack.c.l.b16 %v2349_v12  ;;  %v1506_v34 = vrot.slane %v1394_v25, 5  ;;  %v804_v45 = vrot.slane %v802_v31, 5  ;;  %v1398_v31 = vld [vmem:[%s6380_s24 + $0x38] sm:$0x1] }
  0x56   : > { %v771_v52 = vsel %vm6433_vm5, %v766_v41, %v770_v15  ;;  %v799_v30 = vor.u32 %v798_v17, %v794_v16  ;;  %v1664_v33 = vpack.c.b16 %v1635_v19, %v1634_v18  ;;  %v2380_v41 = vshll.u32 %v5649_v28, 16 }
  0x57   : > { %v1133_v10 = vunpack.c.l.b16 %v771_v52  ;;  %v2367_v35 = vor.u32 %v2366_v22, %v2363_v21  ;;  %v1508_v47 = vrot.slane %v1506_v34, 4  ;;  %v2394_v7 = vshll.u32 %v5651_v59, 16  ;;  %v5652_v21 = vld [vmem:[%s6380_s24 + $0x44] sm:$0x1] }
  0x58   : > { %v2382_v52 = vrot.slane %v2380_v41, 5 }
  0x5c   : > { %5466 = vmatmul.msk.bf16.vlgmr.msrb.gmra.mxu1 %vm457_vm0, %v1161_v40  ;;  %5504 = vmatmul.msk.bf16.vlgmr.msrb.gmra.mxu2 %vm457_vm0, %v1662_v44  ;;  %v2740_v40 = vpack.c.b16 %v2710_v27, %v2709_v26  ;;  %v776_v44 = vrot.slane %v775_v29, 4  ;;  %v2372_v26 = vrot.slane %v2370_v8, 5  ;;  %v2376_v27 = vrot.slane %v2374_v9, 4 }
  0x5d   : > { %5622 = vmatmul.msk.bf16.vlgmr.msrb.gmra.mxu3 %vm457_vm0, %v6093_v49  ;;  %5692 = vmatmul.msk.bf16.vlgmr.msrb.gmra.mxu0 %vm457_vm0, %v2739_v50  ;;  %v2356_v49 = vshll.u32 %v5646_v36, 16  ;;  %v668_v50 = vld [vmem:[%s6380_s24 + $0x24] sm:$0xf]  ;;  %v2398_v8 = vshrl.u32 %v5651_v59, 16 }
  0x5e   : > { %v781_v58 = vsel %vm6433_vm5, %v776_v44, %v780_v42  ;;  %v783_v0 = vshrl.u32 %v668_v50, 16  ;;  %v786_v1 = vshll.u32 %v668_v50, 16  ;;  %v6095_v36 = vld [vmem:[%s6380_s24 + $0x24] sm:$0xff]  ;;  %v671_v42 = vld [vmem:[%s6380_s24 + $0x30] sm:$0xf]  ;;  %v800_v44 = vrot.slane %v799_v30, 4 }
  0x5f   : > { %v2358_v62 = vrot.slane %v2356_v49, 5  ;;  %v1134_v11 = vunpack.c.l.b16 %v781_v58  ;;  %v2368_v49 = vrot.slane %v2367_v35, 4  ;;  %v672_v50 = vld [vmem:[%s6380_s24 + $0x34] sm:$0xf]  ;;  %v807_v53 = vshrl.u32 %v671_v42, 16 }
  0x60   : > { %v785_v14 = vrot.slane %v783_v0, 4  ;;  %v788_v15 = vrot.slane %v786_v1, 5  ;;  %v810_v54 = vshll.u32 %v671_v42, 16  ;;  %v816_v56 = vshll.u32 %v672_v50, 16  ;;  %v5650_v58 = vld [vmem:[%s6380_s24 + $0x3c] sm:$0xf] }
  0x61   : > { %v2359_v13 = vsel %vm6433_vm5, %v2354_v61, %v2358_v62  ;;  %v1163_v32 = vpack.c.b16 %v1134_v11, %v1133_v10  ;;  %v820_v57 = vshrl.u32 %v672_v50, 16  ;;  %v805_v62 = vsel %vm6433_vm5, %v800_v44, %v804_v45  ;;  %v675_v44 = vld [vmem:[%s6380_s24 + $0x40] sm:$0xf] }
  0x62   : > { %v2712_v24 = vunpack.c.l.b16 %v2359_v13  ;;  %v789_v29 = vor.u32 %v788_v15, %v785_v14  ;;  %v2373_v1 = vsel %vm6433_vm5, %v2368_v49, %v2372_v26  ;;  %v809_v3 = vrot.slane %v807_v53, 4  ;;  %v673_v15 = vld [vmem:[%s6380_s24 + $0x38] sm:$0x1]  ;;  %v5654_v49 = vld [vmem:[%s6380_s24 + $0x4c] sm:$0xf] }
  0x63   : > { %v812_v4 = vrot.slane %v810_v54, 5  ;;  %v2385_v5 = vshrl.u32 %v5650_v58, 16  ;;  %v2388_v6 = vshll.u32 %v5650_v58, 16  ;;  %v818_v9 = vrot.slane %v816_v56, 5 }
  0x64   : > { %v790_v43 = vrot.slane %v789_v29, 4  ;;  %v822_v10 = vrot.slane %v820_v57, 4  ;;  %v1136_v12 = vunpack.c.l.b16 %v805_v62  ;;  %v2713_v17 = vunpack.c.l.b16 %v2373_v1 }
  0x65   : > { %v813_v19 = vor.u32 %v812_v4, %v809_v3  ;;  %v2387_v22 = vrot.slane %v2385_v5, 4  ;;  %v2400_v25 = vrot.slane %v2398_v8, 4  ;;  %v5486_v35 = vrot.slane %v1396_v20, 9  ;;  %v676_v8 = vld [vmem:[%s6380_s24 + $0x44] sm:$0x1] }
  0x66   : > { %v795_v61 = vsel %vm6433_vm5, %v790_v43, %v794_v16  ;;  %v1397_v16 = vld [vmem:[%s6380_s24 + $0x34] sm:$0xf]  ;;  %v1516_v42 = vrot.slane %v1398_v31, 5  ;;  %v674_v43 = vld [vmem:[%s6380_s24 + $0x3c] sm:$0xf]  ;;  %v840_v57 = vshll.u32 %v675_v44, 16 }
  0x67   : > { %v1135_v11 = vunpack.c.l.b16 %v795_v61  ;;  %v1513_v28 = vrot.slane %v1397_v16, 5  ;;  %v834_v53 = vshll.u32 %v674_v43, 16  ;;  %v844_v58 = vshrl.u32 %v675_v44, 16  ;;  %v6097_v31 = vld [vmem:[%s6380_s24 + $0x3c] sm:$0xff]  ;;  %v678_v44 = vld [vmem:[%s6380_s24 + $0x4c] sm:$0xf] }
  0x68   : > { %v2418_v62 = vshll.u32 %v5654_v49, 16 }
  0x69   : > { %v1164_v29 = vpack.c.b16 %v1136_v12, %v1135_v11  ;;  %v1515_v41 = vrot.slane %v1513_v28, 4  ;;  %v836_v5 = vrot.slane %v834_v53, 5  ;;  %v1400_v11 = vld [vmem:[%s6380_s24 + $0x40] sm:$0xf] }
  0x6b   : > { %v1517_v56 = vsel %vm6437_vm6, %v1515_v41, %v1516_v42 }
  0x6c   : > { %5467 = vmatmul.msk.bf16.gmra.mxu1 %vm457_vm0, %v1162_v37  ;;  %5505 = vmatmul.msk.bf16.gmra.mxu2 %vm457_vm0, %v1663_v38  ;;  %v2741_v37 = vpack.c.b16 %v2712_v24, %v2711_v23  ;;  %v1393_v38 = vld [vmem:[%s6380_s24 + $0x24] sm:$0xe]  ;;  %v2390_v23 = vrot.slane %v2388_v6, 5  ;;  %v2396_v24 = vrot.slane %v2394_v7, 5  ;;  %v1639_v7 = vunpack.c.l.b16 %v1517_v56 }
  0x6d   : > { %5623 = vmatmul.msk.bf16.gmra.mxu3 %vm457_vm0, %v6094_v39  ;;  %5693 = vmatmul.msk.bf16.gmra.mxu0 %vm457_vm0, %v2740_v40  ;;  %v1395_v39 = vld [vmem:[%s6380_s24 + $0x2c] sm:$0x1]  ;;  %v2377_v40 = vor.u32 %v2376_v27, %v2372_v26  ;;  %v5485_v46 = vrot.slane %v1393_v38, 9  ;;  %v823_v26 = vor.u32 %v822_v10, %v818_v9  ;;  %v826_v27 = vshll.u32 %v673_v15, 16 }
  0x6e   : > { %v1509_v48 = vrot.slane %v1395_v39, 5  ;;  %v2401_v38 = vor.u32 %v2400_v25, %v2396_v24  ;;  %v846_v10 = vrot.slane %v844_v58, 4  ;;  %v864_v58 = vshll.u32 %v678_v44, 16 }
  0x6f   : > { %v2378_v51 = vrot.slane %v2377_v40, 4  ;;  %v1507_v63 = vsel %vm6437_vm6, %v5485_v46, %v1506_v34  ;;  %v814_v34 = vrot.slane %v813_v19, 4  ;;  %v824_v39 = vrot.slane %v823_v26, 4  ;;  %v1401_v26 = vld [vmem:[%s6380_s24 + $0x44] sm:$0x1] }
  0x70   : > { %v1510_v0 = vsel %vm6437_vm6, %v1508_v47, %v1509_v48  ;;  %v1636_v13 = vunpack.c.l.b16 %v1507_v63  ;;  %v828_v40 = vrot.slane %v826_v27, 5  ;;  %v1514_v46 = vsel %vm6437_vm6, %v5486_v35, %v1513_v28  ;;  %v5653_v48 = vld [vmem:[%s6380_s24 + $0x48] sm:$0xf] }
  0x71   : > { %v2383_v2 = vsel %vm6433_vm5, %v2378_v51, %v2382_v52  ;;  %v1637_v14 = vunpack.c.l.b16 %v1510_v0  ;;  %v819_v45 = vsel %vm6433_vm5, %v814_v34, %v818_v9  ;;  %v2402_v51 = vrot.slane %v2401_v38, 4 }
  0x72   : > { %v2714_v18 = vunpack.c.l.b16 %v2383_v2  ;;  %v831_v52 = vshrl.u32 %v674_v43, 16  ;;  %v829_v54 = vsel %vm6433_vm5, %v824_v39, %v828_v40  ;;  %v2409_v59 = vshrl.u32 %v5653_v48, 16  ;;  %v677_v43 = vld [vmem:[%s6380_s24 + $0x48] sm:$0xf] }
  0x73   : > { %v1665_v30 = vpack.c.b16 %v1637_v14, %v1636_v13  ;;  %v2412_v61 = vshll.u32 %v5653_v48, 16  ;;  %v2422_v63 = vshrl.u32 %v5654_v49, 16  ;;  %v1137_v0 = vunpack.c.l.b16 %v819_v45  ;;  %v5657_v48 = vld [vmem:[%s6380_s24 + $0x58] sm:$0xf] }
  0x74   : > { %v1638_v1 = vunpack.c.l.b16 %v1514_v46  ;;  %v833_v4 = vrot.slane %v831_v52, 4  ;;  %v1138_v6 = vunpack.c.l.b16 %v829_v54  ;;  %v842_v9 = vrot.slane %v840_v57, 5 }
  0x75   : > { %v2411_v12 = vrot.slane %v2409_v59, 4  ;;  %v2414_v13 = vrot.slane %v2412_v61, 5  ;;  %v2420_v14 = vrot.slane %v2418_v62, 5  ;;  %v2424_v15 = vrot.slane %v2422_v63, 4 }
  0x76   : > { %v837_v19 = vor.u32 %v836_v5, %v833_v4  ;;  %v1165_v20 = vpack.c.b16 %v1138_v6, %v1137_v0  ;;  %v1666_v25 = vpack.c.b16 %v1639_v7, %v1638_v1  ;;  %v1523_v39 = vrot.slane %v1401_v26, 5 }
  0x77   : > { %v2415_v27 = vor.u32 %v2414_v13, %v2411_v12  ;;  %v2425_v28 = vor.u32 %v2424_v15, %v2420_v14  ;;  %v855_v52 = vshrl.u32 %v677_v43, 16  ;;  %v858_v53 = vshll.u32 %v677_v43, 16  ;;  %v5658_v15 = vld [vmem:[%s6380_s24 + $0x5c] sm:$0x1] }
  0x78   : > { %v838_v34 = vrot.slane %v837_v19, 4  ;;  %v868_v59 = vshrl.u32 %v678_v44, 16  ;;  %v2442_v0 = vshll.u32 %v5657_v48, 16  ;;  %v2446_v1 = vshrl.u32 %v5657_v48, 16 }
  0x79   : > { %v2416_v40 = vrot.slane %v2415_v27, 4  ;;  %v2426_v41 = vrot.slane %v2425_v28, 4  ;;  %v857_v7 = vrot.slane %v855_v52, 4  ;;  %v6604_v12 = vrot.slane %v864_v58, 5  ;;  %v1402_v27 = vld [vmem:[%s6380_s24 + $0x48] sm:$0xe] }
  0x7a   : > { %v843_v45 = vsel %vm6433_vm5, %v838_v34, %v842_v9  ;;  %v870_v13 = vrot.slane %v868_v59, 4  ;;  %v2448_v19 = vrot.slane %v2446_v1, 4  ;;  %v5659_v58 = vld [vmem:[%s6380_s24 + $0x60] sm:$0xf]  ;;  %v5660_v59 = vld [vmem:[%s6380_s24 + $0x64] sm:$0xf] }
  0x7b   : > { %v2421_v56 = vsel %vm6433_vm5, %v2416_v40, %v2420_v14  ;;  %v1403_v14 = vld [vmem:[%s6380_s24 + $0x4c] sm:$0xf] }
  0x7c   : > { %5468 = vmatmul.msk.bf16.gmra.mxu1 %vm457_vm0, %v1163_v32  ;;  %5506 = vmatmul.msk.bf16.gmra.mxu2 %vm457_vm0, %v1664_v33  ;;  %v6096_v32 = vld [vmem:[%s6380_s24 + $0x30] sm:$0xff]  ;;  %v2742_v33 = vpack.c.b16 %v2714_v18, %v2713_v17  ;;  %v871_v26 = vor.u32 %v870_v13, %v6604_v12  ;;  %v1527_v28 = vrot.slane %v1403_v14, 5  ;;  %v2470_v13 = vshrl.u32 %v5660_v59, 16 }
  0x7d   : > { %5624 = vmatmul.msk.bf16.gmra.mxu3 %vm457_vm0, %v6095_v36  ;;  %5694 = vmatmul.msk.bf16.gmra.mxu0 %vm457_vm0, %v2741_v37  ;;  %v2404_v36 = vshll.u32 %v5652_v21, 16  ;;  %v2391_v37 = vor.u32 %v2390_v23, %v2387_v22  ;;  %v5655_v18 = vld [vmem:[%s6380_s24 + $0x50] sm:$0x1]  ;;  %v847_v21 = vor.u32 %v846_v10, %v842_v9  ;;  %v850_v22 = vshll.u32 %v676_v8, 16  ;;  %v1399_v23 = vld [vmem:[%s6380_s24 + $0x3c] sm:$0xe] }
  0x7e   : > { %v5487_v35 = vrot.slane %v1399_v23, 9  ;;  %v860_v8 = vrot.slane %v858_v53, 5  ;;  %v2717_v9 = vunpack.c.l.b16 %v2421_v56  ;;  %v872_v43 = vrot.slane %v871_v26, 4 }
  0x7f   : > { %v2406_v47 = vrot.slane %v2404_v36, 5  ;;  %v2392_v50 = vrot.slane %v2391_v37, 4  ;;  %v848_v36 = vrot.slane %v847_v21, 4  ;;  %v852_v37 = vrot.slane %v850_v22, 5 }
  0x80   : > { %v861_v22 = vor.u32 %v860_v8, %v857_v7  ;;  %v1529_v44 = vrot.slane %v1527_v28, 4 }
  0x81   : > { %v2397_v2 = vsel %vm6433_vm5, %v2392_v50, %v2396_v24  ;;  %v2407_v3 = vsel %vm6433_vm5, %v2402_v51, %v2406_v47  ;;  %v1520_v24 = vrot.slane %v1400_v11, 5  ;;  %v5656_v47 = vld [vmem:[%s6380_s24 + $0x54] sm:$0xf]  ;;  %v853_v50 = vsel %vm6433_vm5, %v848_v36, %v852_v37  ;;  %v679_v11 = vld [vmem:[%s6380_s24 + $0x50] sm:$0x1] }
  0x82   : > { %v2715_v16 = vunpack.c.l.b16 %v2397_v2  ;;  %v2716_v17 = vunpack.c.l.b16 %v2407_v3  ;;  %v2433_v62 = vshrl.u32 %v5656_v47, 16  ;;  %v2436_v63 = vshll.u32 %v5656_v47, 16  ;;  %v681_v47 = vld [vmem:[%s6380_s24 + $0x58] sm:$0xf] }
  0x83   : > { %v1522_v38 = vrot.slane %v1520_v24, 4  ;;  %v1521_v46 = vsel %vm6437_vm6, %v5487_v35, %v1520_v24  ;;  %v1139_v3 = vunpack.c.l.b16 %v843_v45  ;;  %v1140_v5 = vunpack.c.l.b16 %v853_v50  ;;  %v1404_v35 = vld [vmem:[%s6380_s24 + $0x50] sm:$0x1] }
  0x84   : > { %v1640_v4 = vunpack.c.l.b16 %v1521_v46  ;;  %v874_v23 = vshll.u32 %v679_v11, 16  ;;  %v862_v40 = vrot.slane %v861_v22, 4  ;;  %v1530_v45 = vrot.slane %v1404_v35, 5  ;;  %v1406_v22 = vld [vmem:[%s6380_s24 + $0x58] sm:$0xf] }
  0x85   : > { %v1524_v51 = vsel %vm6437_vm6, %v1522_v38, %v1523_v39  ;;  %v1166_v21 = vpack.c.b16 %v1140_v5, %v1139_v3  ;;  %v680_v39 = vld [vmem:[%s6380_s24 + $0x54] sm:$0xf]  ;;  %v888_v56 = vshll.u32 %v681_v47, 16  ;;  %v2460_v11 = vshll.u32 %v5659_v58, 16 }
  0x86   : > { %v1641_v6 = vunpack.c.l.b16 %v1524_v51  ;;  %v879_v51 = vshrl.u32 %v680_v39, 16  ;;  %v882_v52 = vshll.u32 %v680_v39, 16  ;;  %v1531_v3 = vsel %vm6437_vm6, %v1529_v44, %v1530_v45  ;;  %v1407_v44 = vld [vmem:[%s6380_s24 + $0x5c] sm:$0x1] }
  0x87   : > { %v6653_v14 = vrot.slane %v888_v56, 5  ;;  %v2472_v35 = vrot.slane %v2470_v13, 4 }
  0x88   : > { %v881_v7 = vrot.slane %v879_v51, 4  ;;  %v884_v8 = vrot.slane %v882_v52, 5 }
  0x8a   : > { %v885_v26 = vor.u32 %v884_v8, %v881_v7  ;;  %v5662_v8 = vld [vmem:[%s6380_s24 + $0x6c] sm:$0xf] }
  0x8c   : > { %5469 = vmatmul.msk.bf16.gmra.mxu1 %vm457_vm0, %v1164_v29  ;;  %5507 = vmatmul.msk.bf16.gmra.mxu2 %vm457_vm0, %v1665_v30  ;;  %v2428_v29 = vshll.u32 %v5655_v18, 16  ;;  %v6608_v18 = vrot.slane %v2442_v0, 5 }
  0x8d   : > { %5625 = vmatmul.msk.bf16.gmra.mxu3 %vm457_vm0, %v6096_v32  ;;  %5695 = vmatmul.msk.bf16.gmra.mxu0 %vm457_vm0, %v2742_v33  ;;  %v2743_v32 = vpack.c.b16 %v2716_v17, %v2715_v16  ;;  %v2435_v16 = vrot.slane %v2433_v62, 4  ;;  %v2438_v17 = vrot.slane %v2436_v63, 5  ;;  %v867_v63 = vsel %vm6433_vm5, %v862_v40, %v6604_v12 }
  0x8e   : > { %v2430_v42 = vrot.slane %v2428_v29, 5  ;;  %v2452_v29 = vshll.u32 %v5658_v15, 16  ;;  %v2449_v37 = vor.u32 %v2448_v19, %v6608_v18  ;;  %v2466_v12 = vshll.u32 %v5660_v59, 16 }
  0x8f   : > { %v2439_v36 = vor.u32 %v2438_v17, %v2435_v16  ;;  %v1141_v16 = vunpack.c.l.b16 %v867_v63  ;;  %v1643_v19 = vunpack.c.l.b16 %v1531_v3  ;;  %v1534_v40 = vrot.slane %v1406_v22, 5  ;;  %v684_v3 = vld [vmem:[%s6380_s24 + $0x64] sm:$0xf] }
  0x90   : > { %v2431_v57 = vsel %vm6433_vm5, %v2426_v41, %v2430_v42  ;;  %v876_v41 = vrot.slane %v874_v23, 5  ;;  %v5488_v42 = vrot.slane %v1402_v27, 9  ;;  %v2454_v46 = vrot.slane %v2452_v29, 5  ;;  %v1405_v27 = vld [vmem:[%s6380_s24 + $0x54] sm:$0xe] }
  0x91   : > { %v2718_v10 = vunpack.c.l.b16 %v2431_v57  ;;  %v2440_v48 = vrot.slane %v2439_v36, 4  ;;  %v2450_v50 = vrot.slane %v2449_v37, 4  ;;  %v892_v57 = vshrl.u32 %v681_v47, 16 }
  0x92   : > { %v877_v0 = vsel %vm6433_vm5, %v872_v43, %v876_v41  ;;  %v1528_v1 = vsel %vm6437_vm6, %v5488_v42, %v1527_v28  ;;  %v5661_v28 = vld [vmem:[%s6380_s24 + $0x68] sm:$0x1]  ;;  %v1536_v63 = vrot.slane %v1534_v40, 4  ;;  %v2481_v22 = vshrl.u32 %v5662_v8, 16 }
  0x93   : > { %v2744_v34 = vpack.c.b16 %v2718_v10, %v2717_v9  ;;  %v2445_v5 = vsel %vm6433_vm5, %v2440_v48, %v6608_v18  ;;  %v2457_v10 = vshrl.u32 %v5659_v58, 16  ;;  %v894_v15 = vrot.slane %v892_v57, 4 }
  0x94   : > { %v1142_v17 = vunpack.c.l.b16 %v877_v0  ;;  %v1642_v18 = vunpack.c.l.b16 %v1528_v1  ;;  %v2719_v23 = vunpack.c.l.b16 %v2445_v5  ;;  %v886_v48 = vrot.slane %v885_v26, 4  ;;  %v683_v1 = vld [vmem:[%s6380_s24 + $0x60] sm:$0xf] }
  0x95   : > { %v2459_v29 = vrot.slane %v2457_v10, 4  ;;  %v895_v37 = vor.u32 %v894_v15, %v6653_v14  ;;  %v2476_v51 = vshll.u32 %v5661_v28, 16  ;;  %v1537_v0 = vrot.slane %v1407_v44, 5  ;;  %v5663_v10 = vld [vmem:[%s6380_s24 + $0x70] sm:$0xf] }
  0x96   : > { %v1167_v42 = vpack.c.b16 %v1142_v17, %v1141_v16  ;;  %v1668_v43 = vpack.c.b16 %v1643_v19, %v1642_v18  ;;  %v891_v5 = vsel %vm6433_vm5, %v886_v48, %v6653_v14  ;;  %v903_v13 = vshrl.u32 %v683_v1, 16  ;;  %v685_v44 = vld [vmem:[%s6380_s24 + $0x68] sm:$0x1]  ;;  %v1409_v48 = vld [vmem:[%s6380_s24 + $0x64] sm:$0xf] }
  0x97   : > { %v896_v58 = vrot.slane %v895_v37, 4  ;;  %v2478_v7 = vrot.slane %v2476_v51, 5  ;;  %v906_v15 = vshll.u32 %v683_v1, 16  ;;  %v1538_v18 = vsel %vm6437_vm6, %v1536_v63, %v1537_v0 }
  0x98   : > { %v912_v19 = vshll.u32 %v684_v3, 16  ;;  %v916_v14 = vshrl.u32 %v684_v3, 16  ;;  %v2494_v26 = vshrl.u32 %v5663_v10, 16  ;;  %v1143_v28 = vunpack.c.l.b16 %v891_v5 }
  0x99   : > { %v6570_v30 = vpop.f32.mrf.mxu1  ;;  %v922_v5 = vshll.u32 %v685_v44, 16 }
  0x9a   : > { %v6573_v33 = vpop.f32.mrf.mxu0 }
  0x9c   : > { %5470 = vmatmul.msk.bf16.gmra.mxu1 %vm457_vm0, %v1165_v20  ;;  %5508 = vmatmul.msk.bf16.gmra.mxu2 %vm457_vm0, %v1666_v25  ;;  %v1667_v25 = vpack.c.b16 %v1641_v6, %v1640_v4  ;;  %v2455_v6 = vsel %vm6433_vm5, %v2450_v50, %v2454_v46  ;;  %v6099_v46 = vld [vmem:[%s6380_s24 + $0x54] sm:$0xff]  ;;  %v5489_v50 = vrot.slane %v1405_v27, 9 }
  0x9d   : > { %5626 = vmatmul.msk.bf16.gmra.mxu3 %vm457_vm0, %v6097_v31  ;;  %5696 = vmatmul.msk.bf16.gmra.mxu0 %vm457_vm0, %v2743_v32  ;;  %v6098_v32 = vld [vmem:[%s6380_s24 + $0x48] sm:$0xff] }
  0x9f   : > { %v6587_v49 = vpop.f32.mrf.mxu2 }
  0xa0   : > { %v6593_v54 = vpop.f32.mrf.mxu3 }
  0xa1   : > { %v6599_v61 = vpop.f32.mrf.mxu1 }
  0xa2   : > { %v6601_v2 = vpop.f32.mrf.mxu0 }
  0xa7   : > { %v6610_v20 = vpop.f32.mrf.mxu2 }
  0xa8   : > { %v6612_v24 = vpop.f32.mrf.mxu3 }
  0xa9   : > { %7789 = vst [vmem:[#allocation6_spill] sm:$0xff] %v6612_v24  ;;  %v6616_v31 = vpop.f32.mrf.mxu1 }
  0xaa   : > { %v6621_v38 = vpop.f32.mrf.mxu0 }
  0xac   : > { %5471 = vmatmul.msk.bf16.gmra.mxu1 %vm457_vm0, %v1166_v21  ;;  %5509 = vmatmul.msk.bf16.gmra.mxu2 %vm457_vm0, %v1667_v25  ;;  %v682_v21 = vld [vmem:[%s6380_s24 + $0x5c] sm:$0x1]  ;;  %v2720_v25 = vunpack.c.l.b16 %v2455_v6  ;;  %v1535_v6 = vsel %vm6437_vm6, %v5489_v50, %v1534_v40  ;;  %v908_v40 = vrot.slane %v906_v15, 5  ;;  %v2483_v50 = vrot.slane %v2481_v22, 4 }
  0xad   : > { %5627 = vmatmul.msk.bf16.gmra.mxu3 %vm457_vm0, %v6098_v32  ;;  %5697 = vmatmul.msk.bf16.gmra.mxu0 %vm457_vm0, %v2744_v34  ;;  %v2462_v32 = vrot.slane %v2460_v11, 5  ;;  %v6659_v34 = vrot.slane %v2466_v12, 5  ;;  %v898_v39 = vshll.u32 %v682_v21, 16 }
  0xae   : > { %v2745_v47 = vpack.c.b16 %v2720_v25, %v2719_v23  ;;  %v2484_v23 = vshll.u32 %v5662_v8, 16  ;;  %v2490_v25 = vshll.u32 %v5663_v10, 16  ;;  %v1408_v10 = vld [vmem:[%s6380_s24 + $0x60] sm:$0xe] }
  0xaf   : > { %v6629_v53 = vpop.f32.mrf.mxu2  ;;  %v2463_v56 = vor.u32 %v2462_v32, %v2459_v29  ;;  %v2473_v57 = vor.u32 %v2472_v35, %v6659_v34  ;;  %v900_v59 = vrot.slane %v898_v39, 5  ;;  %v1644_v29 = vunpack.c.l.b16 %v1535_v6 }
  0xb0   : > { %v6633_v62 = vpop.f32.mrf.mxu3  ;;  %v905_v39 = vrot.slane %v903_v13, 4  ;;  %v2486_v51 = vrot.slane %v2484_v23, 5  ;;  %v1541_v6 = vrot.slane %v1409_v48, 5  ;;  %v5666_v48 = vld [vmem:[%s6380_s24 + $0x7c] sm:$0xf] }
  0xb1   : > { %7790 = vst [vmem:[#allocation7_spill] sm:$0xff] %v6633_v62  ;;  %v6644_v4 = vpop.f32.mrf.mxu1  ;;  %v2464_v11 = vrot.slane %v2463_v56, 4  ;;  %v2474_v12 = vrot.slane %v2473_v57, 4  ;;  %v901_v17 = vsel %vm6433_vm5, %v896_v58, %v900_v59  ;;  %v6707_v56 = vrot.slane %v2490_v25, 5  ;;  %v5664_v59 = vld [vmem:[%s6380_s24 + $0x74] sm:$0x1] }
  0xb2   : > { %v6651_v9 = vpop.f32.mrf.mxu0  ;;  %v2496_v57 = vrot.slane %v2494_v26, 4  ;;  %v909_v63 = vor.u32 %v908_v40, %v905_v39  ;;  %v2500_v13 = vshll.u32 %v5664_v59, 16  ;;  %v924_v25 = vrot.slane %v922_v5, 5  ;;  %v692_v62 = vld [vmem:[%s6380_s24 + $0x84] sm:$0xf] }
  0xb3   : > { %v2469_v35 = vsel %vm6433_vm5, %v2464_v11, %v6659_v34  ;;  %v2479_v37 = vsel %vm6433_vm5, %v2474_v12, %v2478_v7  ;;  %v2487_v11 = vor.u32 %v2486_v51, %v2483_v50  ;;  %v5490_v26 = vrot.slane %v1408_v10, 9 }
  0xb4   : > { %v2721_v34 = vunpack.c.l.b16 %v2469_v35  ;;  %v2722_v58 = vunpack.c.l.b16 %v2479_v37  ;;  %v2497_v12 = vor.u32 %v2496_v57, %v6707_v56  ;;  %v910_v22 = vrot.slane %v909_v63, 4 }
  0xb5   : > { %v2488_v37 = vrot.slane %v2487_v11, 4  ;;  %v2502_v40 = vrot.slane %v2500_v13, 5  ;;  %v1542_v57 = vsel %vm6437_vm6, %v5490_v26, %v1541_v6  ;;  %v2514_v10 = vshll.u32 %v5666_v48, 16 }
  0xb6   : > { %v2498_v39 = vrot.slane %v2497_v12, 4  ;;  %v2518_v11 = vshrl.u32 %v5666_v48, 16 }
  0xb7   : > { %v6661_v36 = vpop.f32.mrf.mxu2 }
  0xb8   : > { %v6664_v41 = vpop.f32.mrf.mxu3 }
  0xb9   : > { %7791 = vst [vmem:[#allocation8_spill] sm:$0xff] %v6664_v41  ;;  %v6667_v45 = vpop.f32.mrf.mxu1  ;;  %v1416_v41 = vld [vmem:[%s6380_s24 + $0x80] sm:$0x1] }
  0xba   : > { %v6670_v52 = vpop.f32.mrf.mxu0 }
  0xbc   : > { %5472 = vmatmul.msk.bf16.gmra.mxu1 %vm457_vm0, %v1167_v42  ;;  %5510 = vmatmul.msk.bf16.gmra.mxu2 %vm457_vm0, %v1668_v43  ;;  %v1144_v42 = vunpack.c.l.b16 %v901_v17  ;;  %v1645_v43 = vunpack.c.l.b16 %v1538_v18  ;;  %v6100_v17 = vld [vmem:[%s6380_s24 + $0x60] sm:$0xff]  ;;  %v2746_v18 = vpack.c.b16 %v2722_v58, %v2721_v34 }
  0xbd   : > { %5628 = vmatmul.msk.bf16.gmra.mxu3 %vm457_vm0, %v6099_v46  ;;  %5698 = vmatmul.msk.bf16.gmra.mxu0 %vm457_vm0, %v2745_v47  ;;  %v6704_v46 = vrot.slane %v912_v19, 5  ;;  %v918_v47 = vrot.slane %v916_v14, 4  ;;  %v1410_v19 = vld [vmem:[%s6380_s24 + $0x68] sm:$0x1] }
  0xbe   : > { %v1168_v1 = vpack.c.b16 %v1144_v42, %v1143_v28  ;;  %v1669_v8 = vpack.c.b16 %v1645_v43, %v1644_v29  ;;  %v1543_v28 = vrot.slane %v1541_v6, 4  ;;  %v686_v29 = vld [vmem:[%s6380_s24 + $0x6c] sm:$0xf]  ;;  %v1544_v35 = vrot.slane %v1410_v19, 5  ;;  %v687_v42 = vld [vmem:[%s6380_s24 + $0x70] sm:$0xf] }
  0xbf   : > { %v6686_v16 = vpop.f32.mrf.mxu2  ;;  %v919_v3 = vor.u32 %v918_v47, %v6704_v46  ;;  %v927_v43 = vshrl.u32 %v686_v29, 16  ;;  %v930_v44 = vshll.u32 %v686_v29, 16  ;;  %v5665_v47 = vld [vmem:[%s6380_s24 + $0x78] sm:$0xf]  ;;  %v915_v51 = vsel %vm6433_vm5, %v910_v22, %v6704_v46  ;;  %v688_v29 = vld [vmem:[%s6380_s24 + $0x74] sm:$0x1] }
  0xc0   : > { %v6692_v21 = vpop.f32.mrf.mxu3  ;;  %v936_v34 = vshll.u32 %v687_v42, 16  ;;  %v940_v58 = vshrl.u32 %v687_v42, 16  ;;  %v2503_v46 = vsel %vm6433_vm5, %v2498_v39, %v2502_v40  ;;  %v2505_v6 = vshrl.u32 %v5665_v47, 16 }
  0xc1   : > { %7792 = vst [vmem:[#allocation9_spill] sm:$0xff] %v6692_v21  ;;  %v6694_v27 = vpop.f32.mrf.mxu1  ;;  %v920_v23 = vrot.slane %v919_v3, 4  ;;  %v2493_v3 = vsel %vm6433_vm5, %v2488_v37, %v6707_v56  ;;  %v929_v13 = vrot.slane %v927_v43, 4  ;;  %v1646_v19 = vunpack.c.l.b16 %v1542_v57  ;;  %v5667_v37 = vld [vmem:[%s6380_s24 + $0x80] sm:$0x1] }
  0xc2   : > { %v6696_v32 = vpop.f32.mrf.mxu0  ;;  %v6753_v22 = vrot.slane %v936_v34, 5  ;;  %v942_v56 = vrot.slane %v940_v58, 4  ;;  %v2723_v26 = vunpack.c.l.b16 %v2493_v3  ;;  %v2507_v39 = vrot.slane %v2505_v6, 4  ;;  %v6101_v6 = vld [vmem:[%s6380_s24 + $0x6c] sm:$0xff] }
  0xc3   : > { %v925_v63 = vsel %vm6433_vm5, %v920_v23, %v924_v25  ;;  %v6758_v42 = vrot.slane %v2514_v10, 5  ;;  %v2520_v43 = vrot.slane %v2518_v11, 4  ;;  %v2524_v3 = vshll.u32 %v5667_v37, 16  ;;  %v1413_v10 = vld [vmem:[%s6380_s24 + $0x74] sm:$0x1] }
  0xc4   : > { %v1146_v23 = vunpack.c.l.b16 %v925_v63  ;;  %v943_v48 = vor.u32 %v942_v56, %v6753_v22  ;;  %v690_v37 = vld [vmem:[%s6380_s24 + $0x7c] sm:$0xf] }
  0xc7   : > { %v6710_v0 = vpop.f32.mrf.mxu2 }
  0xc8   : > { %v6713_v7 = vpop.f32.mrf.mxu3 }
  0xc9   : > { %7793 = vst [vmem:[#allocation10_spill] sm:$0xff] %v6713_v7  ;;  %v6717_v15 = vpop.f32.mrf.mxu1 }
  0xca   : > { %v6721_v14 = vpop.f32.mrf.mxu0 }
  0xcc   : > { %5473 = vmatmul.msk.bf16.gmra.mxu1 %vm457_vm0, %v1168_v1  ;;  %5511 = vmatmul.msk.bf16.gmra.mxu2 %vm457_vm0, %v1669_v8  ;;  %v1545_v1 = vsel %vm6437_vm6, %v1543_v28, %v1544_v35  ;;  %v2508_v8 = vshll.u32 %v5665_v47, 16  ;;  %v2724_v28 = vunpack.c.l.b16 %v2503_v46  ;;  %v1412_v35 = vld [vmem:[%s6380_s24 + $0x70] sm:$0xf] }
  0xcd   : > { %5629 = vmatmul.msk.bf16.gmra.mxu3 %vm457_vm0, %v6100_v17  ;;  %5699 = vmatmul.msk.bf16.gmra.mxu0 %vm457_vm0, %v2746_v18  ;;  %v932_v17 = vrot.slane %v930_v44, 5  ;;  %v1145_v18 = vunpack.c.l.b16 %v915_v51  ;;  %v1647_v25 = vunpack.c.l.b16 %v1545_v1  ;;  %v946_v51 = vshll.u32 %v688_v29, 16  ;;  %v1411_v1 = vld [vmem:[%s6380_s24 + $0x6c] sm:$0xe] }
  0xce   : > { %v2510_v40 = vrot.slane %v2508_v8, 5  ;;  %v1548_v57 = vrot.slane %v1412_v35, 5  ;;  %v2747_v8 = vpack.c.b16 %v2724_v28, %v2723_v26  ;;  %v689_v35 = vld [vmem:[%s6380_s24 + $0x78] sm:$0xf]  ;;  %v1551_v26 = vrot.slane %v1413_v10, 5 }
  0xcf   : > { %v6731_v50 = vpop.f32.mrf.mxu2  ;;  %v933_v44 = vor.u32 %v932_v17, %v929_v13  ;;  %v1169_v58 = vpack.c.b16 %v1146_v23, %v1145_v18  ;;  %v1670_v63 = vpack.c.b16 %v1647_v25, %v1646_v19  ;;  %v2521_v13 = vor.u32 %v2520_v43, %v6758_v42 }
  0xd0   : > { %v6738_v59 = vpop.f32.mrf.mxu3  ;;  %v2511_v11 = vor.u32 %v2510_v40, %v2507_v39  ;;  %v944_v18 = vrot.slane %v943_v48, 4  ;;  %v948_v19 = vrot.slane %v946_v51, 5  ;;  %v5491_v23 = vrot.slane %v1411_v1, 9  ;;  %v5668_v39 = vld [vmem:[%s6380_s24 + $0x84] sm:$0xf] }
  0xd1   : > { %7794 = vst [vmem:[#allocation11_spill] sm:$0xff] %v6738_v59  ;;  %v6749_v5 = vpop.f32.mrf.mxu1  ;;  %v934_v29 = vrot.slane %v933_v44, 4  ;;  %v1550_v25 = vrot.slane %v1548_v57, 4  ;;  %v2526_v28 = vrot.slane %v2524_v3, 5  ;;  %v5669_v40 = vld [vmem:[%s6380_s24 + $0x88] sm:$0xf] }
  0xd2   : > { %v6751_v12 = vpop.f32.mrf.mxu0  ;;  %v2522_v43 = vrot.slane %v2521_v13, 4  ;;  %v951_v44 = vshrl.u32 %v689_v35, 16  ;;  %v954_v48 = vshll.u32 %v689_v35, 16  ;;  %v960_v1 = vshll.u32 %v690_v37, 16 }
  0xd3   : > { %v939_v51 = vsel %vm6433_vm5, %v934_v29, %v6753_v22  ;;  %v2532_v10 = vshll.u32 %v5668_v39, 16  ;;  %v2538_v3 = vshll.u32 %v5669_v40, 16  ;;  %v1552_v22 = vsel %vm6437_vm6, %v1550_v25, %v1551_v26  ;;  %v1415_v25 = vld [vmem:[%s6380_s24 + $0x7c] sm:$0xf] }
  0xd4   : > { %v2527_v35 = vsel %vm6433_vm5, %v2522_v43, %v2526_v28  ;;  %v1555_v21 = vrot.slane %v1415_v25, 5 }
  0xd5   : > { %v6799_v7 = vrot.slane %v2538_v3, 5 }
  0xd7   : > { %v6760_v47 = vpop.f32.mrf.mxu2 }
  0xd8   : > { %v6763_v34 = vpop.f32.mrf.mxu3 }
  0xd9   : > { %7795 = vst [vmem:[#allocation12_spill] sm:$0xff] %v6763_v34  ;;  %v1240_v46 = vpop.f32.mrf.mxu1  ;;  %v2542_v34 = vshrl.u32 %v5669_v40, 16  ;;  %v691_v40 = vld [vmem:[%s6380_s24 + $0x80] sm:$0x1] }
  0xda   : > { %v1320_v17 = vadd.f32 %v1240_v46, %v6573_v33  ;;  %v6770_v56 = vpop.f32.mrf.mxu0  ;;  %v2512_v33 = vrot.slane %v2511_v11, 4  ;;  %v1549_v11 = vsel %vm6437_vm6, %v5491_v23, %v1548_v57  ;;  %v6796_v57 = vrot.slane %v960_v1, 5 }
  0xdb   : > { %v1648_v43 = vunpack.c.l.b16 %v1549_v11  ;;  %v970_v1 = vshll.u32 %v691_v40, 16 }
  0xdc   : > { %5474 = vmatmul.msk.bf16.gmra.mxu1 %vm457_vm0, %v1169_v58  ;;  %5512 = vmatmul.msk.bf16.gmra.mxu2 %vm457_vm0, %v1670_v63  ;;  %v964_v58 = vshrl.u32 %v690_v37, 16  ;;  %v2529_v63 = vshrl.u32 %v5668_v39, 16  ;;  %v2517_v29 = vsel %vm6433_vm5, %v2512_v33, %v6758_v42  ;;  %v956_v37 = vrot.slane %v954_v48, 5  ;;  %v5670_v48 = vld [vmem:[%s6380_s24 + $0x8c] sm:$0x1] }
  0xdd   : > { %5630 = vmatmul.msk.bf16.gmra.mxu3 %vm457_vm0, %v6101_v6  ;;  %5700 = vmatmul.msk.bf16.gmra.mxu0 %vm457_vm0, %v2747_v8  ;;  %v949_v8 = vsel %vm6433_vm5, %v944_v18, %v948_v19  ;;  %v2544_v42 = vrot.slane %v2542_v34, 4  ;;  %v1147_v33 = vunpack.c.l.b16 %v939_v51  ;;  %v2548_v51 = vshll.u32 %v5670_v48, 16 }
  0xde   : > { %v966_v23 = vrot.slane %v964_v58, 4  ;;  %v2531_v26 = vrot.slane %v2529_v63, 4  ;;  %v1148_v28 = vunpack.c.l.b16 %v949_v8  ;;  %v972_v40 = vrot.slane %v970_v1, 5 }
  0xdf   : > { %v1741_v46 = vpop.f32.mrf.mxu2  ;;  %v2545_v34 = vor.u32 %v2544_v42, %v6799_v7  ;;  %v1557_v42 = vrot.slane %v1555_v21, 4  ;;  %v975_v48 = vshrl.u32 %v692_v62, 16 }
  0xe0   : > { %v1821_v59 = vadd.f32 %v1741_v46, %v1320_v17  ;;  %v2096_v6 = vpop.f32.mrf.mxu3  ;;  %v953_v17 = vrot.slane %v951_v44, 4  ;;  %v2534_v46 = vrot.slane %v2532_v10, 5  ;;  %v1649_v44 = vunpack.c.l.b16 %v1552_v22 }
  0xe1   : > { %v1242_v13 = vpop.f32.mrf.mxu1  ;;  %v967_v58 = vor.u32 %v966_v23, %v6796_v57  ;;  %v1170_v11 = vpack.c.b16 %v1148_v28, %v1147_v33  ;;  %v2546_v28 = vrot.slane %v2545_v34, 4 }
  0xe2   : > { %v2176_v39 = vadd.f32 %v2096_v6, %v1821_v59  ;;  %v1321_v18 = vadd.f32 %v1242_v13, %v6601_v2  ;;  %v2820_v19 = vpop.f32.mrf.mxu0  ;;  %v2725_v59 = vunpack.c.l.b16 %v2517_v29  ;;  %v2726_v2 = vunpack.c.l.b16 %v2527_v35  ;;  %v1414_v13 = vld [vmem:[%s6380_s24 + $0x78] sm:$0xe] }
  0xe3   : > { %v957_v6 = vor.u32 %v956_v37, %v953_v17  ;;  %v2535_v10 = vor.u32 %v2534_v46, %v2531_v26  ;;  %v1671_v22 = vpack.c.b16 %v1649_v44, %v1648_v43  ;;  %v6102_v35 = vld [vmem:[%s6380_s24 + $0x78] sm:$0xff]  ;;  %v5492_v23 = vrot.slane %v1414_v13, 9  ;;  %v693_v44 = vld [vmem:[%s6380_s24 + $0x88] sm:$0xf]  ;;  %v5672_v13 = vld [vmem:[%s6380_s24 + $0x94] sm:$0xf] }
  0xe4   : > { %v2748_v17 = vpack.c.b16 %v2726_v2, %v2725_v59  ;;  %v968_v46 = vrot.slane %v967_v58, 4  ;;  %v2550_v43 = vrot.slane %v2548_v51, 5  ;;  %v978_v59 = vshll.u32 %v692_v62, 16  ;;  %v5671_v58 = vld [vmem:[%s6380_s24 + $0x90] sm:$0xf] }
  0xe5   : > { %v958_v37 = vrot.slane %v957_v6, 4  ;;  %v2536_v33 = vrot.slane %v2535_v10, 4  ;;  %v6815_v2 = vadd.f32 %v6770_v56, %v2176_v39  ;;  %v984_v6 = vshll.u32 %v693_v44, 16 }
  0xe6   : > { %v988_v1 = vshrl.u32 %v693_v44, 16  ;;  %v973_v62 = vsel %vm6433_vm5, %v968_v46, %v972_v40  ;;  %v1556_v56 = vsel %vm6437_vm6, %v5492_v23, %v1555_v21  ;;  %v2551_v34 = vsel %vm6433_vm5, %v2546_v28, %v2550_v43  ;;  %v1418_v43 = vld [vmem:[%s6380_s24 + $0x88] sm:$0xf] }
  0xe7   : > { %v1743_v63 = vpop.f32.mrf.mxu2  ;;  %v977_v51 = vrot.slane %v975_v48, 4  ;;  %v2562_v21 = vshll.u32 %v5672_v13, 16  ;;  %v6839_v23 = vrot.slane %v984_v6, 5  ;;  %v1650_v46 = vunpack.c.l.b16 %v1556_v56 }
  0xe8   : > { %v1822_v3 = vadd.f32 %v1743_v63, %v1321_v18  ;;  %v2098_v8 = vpop.f32.mrf.mxu3  ;;  %v1558_v18 = vrot.slane %v1416_v41, 5  ;;  %v963_v41 = vsel %vm6433_vm5, %v958_v37, %v6796_v57 }
  0xe9   : > { %v1245_v29 = vpop.f32.mrf.mxu1 }
  0xea   : > { %v2177_v25 = vadd.f32 %v2098_v8, %v1822_v3  ;;  %v1322_v24 = vadd.f32 %v1245_v29, %v6621_v38  ;;  %v6809_v26 = vpop.f32.mrf.mxu0  ;;  %v1559_v39 = vsel %vm6437_vm6, %v1557_v42, %v1558_v18  ;;  %v980_v3 = vrot.slane %v978_v59, 5 }
  0xeb   : > { %v2556_v29 = vshll.u32 %v5671_v58, 16  ;;  %v1651_v42 = vunpack.c.l.b16 %v1559_v39  ;;  %v6842_v59 = vrot.slane %v2562_v21, 5 }
  0xec   : > { %5475 = vmatmul.msk.bf16.gmra.mxu1 %vm457_vm0, %v1170_v11  ;;  %5513 = vmatmul.msk.bf16.gmra.mxu2 %vm457_vm0, %v1671_v22  ;;  %v6817_v38 = vadd.f32 %v2820_v19, %v2177_v25  ;;  %v2541_v19 = vsel %vm6433_vm5, %v2536_v33, %v6799_v7  ;;  %v694_v11 = vld [vmem:[%s6380_s24 + $0x8c] sm:$0x1]  ;;  %v2553_v22 = vshrl.u32 %v5671_v58, 16  ;;  %v1149_v7 = vunpack.c.l.b16 %v963_v41 }
  0xed   : > { %5631 = vmatmul.msk.bf16.gmra.mxu3 %vm457_vm0, %v6102_v35  ;;  %5701 = vmatmul.msk.bf16.gmra.mxu0 %vm457_vm0, %v2748_v17  ;;  %v2566_v35 = vshrl.u32 %v5672_v13, 16  ;;  %v1150_v25 = vunpack.c.l.b16 %v973_v62  ;;  %v2727_v18 = vunpack.c.l.b16 %v2541_v19  ;;  %v2728_v33 = vunpack.c.l.b16 %v2551_v34  ;;  %v5673_v13 = vld [vmem:[%s6380_s24 + $0x98] sm:$0x1] }
  0xee   : > { %v994_v28 = vshll.u32 %v694_v11, 16  ;;  %v2555_v44 = vrot.slane %v2553_v22, 4  ;;  %v2558_v48 = vrot.slane %v2556_v29, 5  ;;  %v981_v6 = vor.u32 %v980_v3, %v977_v51  ;;  %v1419_v11 = vld [vmem:[%s6380_s24 + $0x8c] sm:$0x1] }
  0xef   : > { %v1746_v63 = vpop.f32.mrf.mxu2  ;;  %v1672_v62 = vpack.c.b16 %v1651_v42, %v1650_v46  ;;  %v2749_v19 = vpack.c.b16 %v2728_v33, %v2727_v18  ;;  %v2572_v29 = vshll.u32 %v5673_v13, 16  ;;  %v1565_v42 = vrot.slane %v1419_v11, 5  ;;  %v696_v18 = vld [vmem:[%s6380_s24 + $0x94] sm:$0xf]  ;;  %v5674_v33 = vld [vmem:[%s6380_s24 + $0x9c] sm:$0xf] }
  0xf0   : > { %v1823_v57 = vadd.f32 %v1746_v63, %v1322_v24  ;;  %v2101_v10 = vpop.f32.mrf.mxu3  ;;  %v990_v24 = vrot.slane %v988_v1, 4  ;;  %v1417_v1 = vld [vmem:[%s6380_s24 + $0x84] sm:$0xe]  ;;  %v1171_v63 = vpack.c.b16 %v1150_v25, %v1149_v7  ;;  %v2559_v51 = vor.u32 %v2558_v48, %v2555_v44  ;;  %v695_v25 = vld [vmem:[%s6380_s24 + $0x90] sm:$0xf] }
  0xf1   : > { %v1247_v8 = vpop.f32.mrf.mxu1  ;;  %v5493_v22 = vrot.slane %v1417_v1, 9  ;;  %v1008_v13 = vshll.u32 %v696_v18, 16 }
  0xf2   : > { %v2178_v17 = vadd.f32 %v2101_v10, %v1823_v57  ;;  %v1323_v37 = vadd.f32 %v1247_v8, %v6651_v9  ;;  %v2825_v40 = vpop.f32.mrf.mxu0  ;;  %v2568_v9 = vrot.slane %v2566_v35, 4  ;;  %v991_v58 = vor.u32 %v990_v24, %v6839_v23  ;;  %v6103_v8 = vld [vmem:[%s6380_s24 + $0x84] sm:$0xff] }
  0xf3   : > { %v996_v57 = vrot.slane %v994_v28, 5  ;;  %v1562_v10 = vrot.slane %v1418_v43, 5  ;;  %v2560_v44 = vrot.slane %v2559_v51, 4 }
  0xf4   : > { %v2569_v3 = vor.u32 %v2568_v9, %v6842_v59  ;;  %v992_v7 = vrot.slane %v991_v58, 4  ;;  %v6859_v28 = vadd.f32 %v6809_v26, %v2178_v17  ;;  %v2574_v9 = vrot.slane %v2572_v29, 5 }
  0xf5   : > { %v1564_v46 = vrot.slane %v1562_v10, 4  ;;  %v999_v17 = vshrl.u32 %v695_v25, 16 }
  0xf6   : > { %v2570_v48 = vrot.slane %v2569_v3, 4  ;;  %v997_v26 = vsel %vm6433_vm5, %v992_v7, %v996_v57  ;;  %v2565_v57 = vsel %vm6433_vm5, %v2560_v44, %v6842_v59  ;;  %v6882_v7 = vrot.slane %v1008_v13, 5  ;;  %v1420_v13 = vld [vmem:[%s6380_s24 + $0x90] sm:$0xe] }
  0xf7   : > { %v1748_v41 = vpop.f32.mrf.mxu2  ;;  %v1152_v11 = vunpack.c.l.b16 %v997_v26 }
  0xf8   : > { %v1824_v56 = vadd.f32 %v1748_v41, %v1323_v37  ;;  %v2103_v39 = vpop.f32.mrf.mxu3  ;;  %v982_v37 = vrot.slane %v981_v6, 4  ;;  %v5675_v6 = vld [vmem:[%s6380_s24 + $0xa0] sm:$0xf]  ;;  %v1012_v41 = vshrl.u32 %v696_v18, 16 }
  0xf9   : > { %v1250_v34 = vpop.f32.mrf.mxu1 }
  0xfa   : > { %v2179_v21 = vadd.f32 %v2103_v39, %v1824_v56  ;;  %v1324_v35 = vadd.f32 %v1250_v34, %v6670_v52  ;;  %v6851_v24 = vpop.f32.mrf.mxu0  ;;  %v1563_v52 = vsel %vm6437_vm6, %v5493_v22, %v1562_v10  ;;  %v987_v58 = vsel %vm6433_vm5, %v982_v37, %v6839_v23 }
  0xfb   : > { %v2586_v10 = vshll.u32 %v5675_v6, 16  ;;  %v2590_v34 = vshrl.u32 %v5675_v6, 16  ;;  %v1151_v23 = vunpack.c.l.b16 %v987_v58  ;;  %v2575_v22 = vsel %vm6433_vm5, %v2570_v48, %v2574_v9  ;;  %v5676_v58 = vld [vmem:[%s6380_s24 + $0xa4] sm:$0x1] }
  0xfc   : > { %5476 = vmatmul.msk.bf16.gmra.mxu1 %vm457_vm0, %v1171_v63  ;;  %5514 = vmatmul.msk.bf16.gmra.mxu2 %vm457_vm0, %v1672_v62  ;;  %v6861_v43 = vadd.f32 %v2825_v40, %v2179_v21  ;;  %v1002_v40 = vshll.u32 %v695_v25, 16  ;;  %v2577_v63 = vshrl.u32 %v5674_v33, 16  ;;  %v2580_v62 = vshll.u32 %v5674_v33, 16  ;;  %v697_v21 = vld [vmem:[%s6380_s24 + $0x98] sm:$0x1] }
  0xfd   : > { %5632 = vmatmul.msk.bf16.gmra.mxu3 %vm457_vm0, %v6103_v8  ;;  %5702 = vmatmul.msk.bf16.gmra.mxu0 %vm457_vm0, %v2749_v19  ;;  %v1566_v19 = vsel %vm6437_vm6, %v1564_v46, %v1565_v42  ;;  %v1014_v25 = vrot.slane %v1012_v41, 4  ;;  %v1652_v18 = vunpack.c.l.b16 %v1563_v52  ;;  %v1421_v33 = vld [vmem:[%s6380_s24 + $0x94] sm:$0xf]  ;;  %v6885_v44 = vrot.slane %v2586_v10, 5  ;;  %v1422_v41 = vld [vmem:[%s6380_s24 + $0x98] sm:$0x1] }
  0xfe   : > { %v1004_v37 = vrot.slane %v1002_v40, 5  ;;  %v2579_v46 = vrot.slane %v2577_v63, 4  ;;  %v2582_v42 = vrot.slane %v2580_v62, 5  ;;  %v1653_v59 = vunpack.c.l.b16 %v1566_v19 }
  0xff   : > { %v1751_v1 = vpop.f32.mrf.mxu2  ;;  %v2592_v48 = vrot.slane %v2590_v34, 4  ;;  %v2729_v9 = vunpack.c.l.b16 %v2565_v57  ;;  %v1018_v6 = vshll.u32 %v697_v21, 16  ;;  %v1172_v26 = vpack.c.b16 %v1152_v11, %v1151_v23 }
 0x100   : > { %v1825_v56 = vadd.f32 %v1751_v1, %v1324_v35  ;;  %v2106_v39 = vpop.f32.mrf.mxu3  ;;  %v1001_v35 = vrot.slane %v999_v17, 4  ;;  %v1015_v1 = vor.u32 %v1014_v25, %v6882_v7  ;;  %v1569_v63 = vrot.slane %v1421_v33, 5  ;;  %v698_v25 = vld [vmem:[%s6380_s24 + $0x9c] sm:$0xf] }
 0x101   : > { %v1252_v8 = vpop.f32.mrf.mxu1  ;;  %v2583_v52 = vor.u32 %v2582_v42, %v2579_v46  ;;  %v2593_v19 = vor.u32 %v2592_v48, %v6885_v44  ;;  %v2596_v10 = vshll.u32 %v5676_v58, 16 }
 0x102   : > { %v2180_v51 = vadd.f32 %v2106_v39, %v1825_v56  ;;  %v1325_v3 = vadd.f32 %v1252_v8, %v6696_v32  ;;  %v2830_v29 = vpop.f32.mrf.mxu0  ;;  %v2730_v32 = vunpack.c.l.b16 %v2575_v22  ;;  %v1005_v40 = vor.u32 %v1004_v37, %v1001_v35  ;;  %v6104_v8 = vld [vmem:[%s6380_s24 + $0x90] sm:$0xff] }
 0x103   : > { %v1673_v39 = vpack.c.b16 %v1653_v59, %v1652_v18  ;;  %v1020_v22 = vrot.slane %v1018_v6, 5  ;;  %v5494_v35 = vrot.slane %v1420_v13, 9  ;;  %v1572_v37 = vrot.slane %v1422_v41, 5 }
 0x104   : > { %v2750_v57 = vpack.c.b16 %v2730_v32, %v2729_v9  ;;  %v1006_v46 = vrot.slane %v1005_v40, 4  ;;  %v1571_v42 = vrot.slane %v1569_v63, 4  ;;  %v2584_v18 = vrot.slane %v2583_v52, 4  ;;  %v699_v9 = vld [vmem:[%s6380_s24 + $0xa0] sm:$0xf] }
 0x105   : > { %v2594_v59 = vrot.slane %v2593_v19, 4  ;;  %v2598_v33 = vrot.slane %v2596_v10, 5  ;;  %v1023_v32 = vshrl.u32 %v698_v25, 16  ;;  %v1026_v6 = vshll.u32 %v698_v25, 16 }
 0x106   : > { %v1570_v58 = vsel %vm6437_vm6, %v5494_v35, %v1569_v63  ;;  %v1011_v40 = vsel %vm6433_vm5, %v1006_v46, %v6882_v7  ;;  %v1032_v52 = vshll.u32 %v699_v9, 16 }
 0x107   : > { %v1753_v17 = vpop.f32.mrf.mxu2  ;;  %v2599_v63 = vsel %vm6433_vm5, %v2594_v59, %v2598_v33  ;;  %v1025_v7 = vrot.slane %v1023_v32, 4  ;;  %v1654_v35 = vunpack.c.l.b16 %v1570_v58  ;;  %v1424_v33 = vld [vmem:[%s6380_s24 + $0xa0] sm:$0xf] }
 0x108   : > { %v1826_v62 = vadd.f32 %v1753_v17, %v1325_v3  ;;  %v2108_v56 = vpop.f32.mrf.mxu3  ;;  %v1016_v3 = vrot.slane %v1015_v1, 4  ;;  %v5678_v1 = vld [vmem:[%s6380_s24 + $0xac] sm:$0xf]  ;;  %v6924_v25 = vrot.slane %v1032_v52, 5 }
 0x109   : > { %v1255_v34 = vpop.f32.mrf.mxu1 }
 0x10a   : > { %v2181_v23 = vadd.f32 %v2108_v56, %v1826_v62  ;;  %v1326_v11 = vadd.f32 %v1255_v34, %v6721_v14  ;;  %v6894_v21 = vpop.f32.mrf.mxu0  ;;  %v6900_v14 = vadd.f32 %v6851_v24, %v2180_v51  ;;  %v1021_v24 = vsel %vm6433_vm5, %v1016_v3, %v1020_v22 }
 0x10b   : > { %v1573_v51 = vsel %vm6437_vm6, %v1571_v42, %v1572_v37  ;;  %v1036_v62 = vshrl.u32 %v699_v9, 16  ;;  %v2614_v22 = vshrl.u32 %v5678_v1, 16  ;;  %v2732_v42 = vunpack.c.l.b16 %v2599_v63  ;;  %v1423_v9 = vld [vmem:[%s6380_s24 + $0x9c] sm:$0xe] }
 0x10c   : > { %5477 = vmatmul.msk.bf16.gmra.mxu1 %vm457_vm0, %v1172_v26  ;;  %5515 = vmatmul.msk.bf16.gmra.mxu2 %vm457_vm0, %v1673_v39  ;;  %v6902_v48 = vadd.f32 %v2830_v29, %v2181_v23  ;;  %v5677_v26 = vld [vmem:[%s6380_s24 + $0xa8] sm:$0xf]  ;;  %v2589_v29 = vsel %vm6433_vm5, %v2584_v18, %v6885_v44  ;;  %v1028_v39 = vrot.slane %v1026_v6, 5  ;;  %v1153_v23 = vunpack.c.l.b16 %v1011_v40  ;;  %v700_v18 = vld [vmem:[%s6380_s24 + $0xa4] sm:$0x1]  ;;  %v6105_v63 = vld [vmem:[%s6380_s24 + $0x9c] sm:$0xff] }
 0x10d   : > { %5633 = vmatmul.msk.bf16.gmra.mxu3 %vm457_vm0, %v6104_v8  ;;  %5703 = vmatmul.msk.bf16.gmra.mxu0 %vm457_vm0, %v2750_v57  ;;  %v2601_v19 = vshrl.u32 %v5677_v26, 16  ;;  %v2604_v10 = vshll.u32 %v5677_v26, 16  ;;  %v2610_v57 = vshll.u32 %v5678_v1, 16  ;;  %v1655_v37 = vunpack.c.l.b16 %v1573_v51  ;;  %v5679_v40 = vld [vmem:[%s6380_s24 + $0xb0] sm:$0x1] }
 0x10e   : > { %v1038_v46 = vrot.slane %v1036_v62, 4  ;;  %v2731_v3 = vunpack.c.l.b16 %v2589_v29  ;;  %v1029_v59 = vor.u32 %v1028_v39, %v1025_v7  ;;  %v2616_v26 = vrot.slane %v2614_v22, 4 }
 0x10f   : > { %v1756_v17 = vpop.f32.mrf.mxu2  ;;  %v2603_v32 = vrot.slane %v2601_v19, 4  ;;  %v6929_v6 = vrot.slane %v2610_v57, 5  ;;  %v1674_v1 = vpack.c.b16 %v1655_v37, %v1654_v35  ;;  %v1576_v7 = vrot.slane %v1424_v33, 5  ;;  %v701_v35 = vld [vmem:[%s6380_s24 + $0xa8] sm:$0xf] }
 0x110   : > { %v1827_v13 = vadd.f32 %v1756_v17, %v1326_v11  ;;  %v2111_v41 = vpop.f32.mrf.mxu3  ;;  %v1154_v11 = vunpack.c.l.b16 %v1021_v24  ;;  %v1039_v29 = vor.u32 %v1038_v46, %v6924_v25  ;;  %v2751_v52 = vpack.c.b16 %v2732_v42, %v2731_v3  ;;  %v702_v37 = vld [vmem:[%s6380_s24 + $0xac] sm:$0xf] }
 0x111   : > { %v1257_v56 = vpop.f32.mrf.mxu1  ;;  %v1030_v62 = vrot.slane %v1029_v59, 4  ;;  %v2620_v22 = vshll.u32 %v5679_v40, 16  ;;  %v1578_v59 = vrot.slane %v1576_v7, 4  ;;  %v1056_v40 = vshll.u32 %v702_v37, 16 }
 0x112   : > { %v2182_v34 = vadd.f32 %v2111_v41, %v1827_v13  ;;  %v1327_v8 = vadd.f32 %v1257_v56, %v6751_v12  ;;  %v2835_v44 = vpop.f32.mrf.mxu0  ;;  %v2606_v12 = vrot.slane %v2604_v10, 5  ;;  %v1173_v58 = vpack.c.b16 %v1154_v11, %v1153_v23  ;;  %v1425_v10 = vld [vmem:[%s6380_s24 + $0xa4] sm:$0x1] }
 0x113   : > { %v1042_v13 = vshll.u32 %v700_v18, 16  ;;  %v5495_v56 = vrot.slane %v1423_v9, 9  ;;  %v1040_v23 = vrot.slane %v1039_v29, 4  ;;  %v1035_v42 = vsel %vm6433_vm5, %v1030_v62, %v6924_v25  ;;  %v5680_v9 = vld [vmem:[%s6380_s24 + $0xb4] sm:$0xf] }
 0x114   : > { %v2607_v57 = vor.u32 %v2606_v12, %v2603_v32  ;;  %v6943_v46 = vadd.f32 %v6894_v21, %v2182_v34  ;;  %v1579_v33 = vrot.slane %v1425_v10, 5  ;;  %v5681_v12 = vld [vmem:[%s6380_s24 + $0xb8] sm:$0xf]  ;;  %v2625_v29 = vshrl.u32 %v5680_v9, 16 }
 0x115   : > { %v1044_v11 = vrot.slane %v1042_v13, 5  ;;  %v1577_v18 = vsel %vm6437_vm6, %v5495_v56, %v1576_v7  ;;  %v2628_v13 = vshll.u32 %v5680_v9, 16  ;;  %v2638_v62 = vshrl.u32 %v5681_v12, 16 }
 0x116   : > { %v2608_v21 = vrot.slane %v2607_v57, 4 }
 0x117   : > { %v1758_v17 = vpop.f32.mrf.mxu2 }
 0x118   : > { %v1828_v24 = vadd.f32 %v1758_v17, %v1327_v8  ;;  %v2113_v51 = vpop.f32.mrf.mxu3  ;;  %v2617_v8 = vor.u32 %v2616_v26, %v6929_v6  ;;  %v1047_v17 = vshrl.u32 %v701_v35, 16  ;;  %v2613_v10 = vsel %vm6433_vm5, %v2608_v21, %v6929_v6 }
 0x119   : > { %v1260_v41 = vpop.f32.mrf.mxu1  ;;  %v2733_v9 = vunpack.c.l.b16 %v2613_v10  ;;  %v2640_v21 = vrot.slane %v2638_v62, 4  ;;  %v6106_v10 = vld [vmem:[%s6380_s24 + $0xa8] sm:$0xff] }
 0x11a   : > { %v2183_v39 = vadd.f32 %v2113_v51, %v1828_v24  ;;  %v6934_v19 = vpop.f32.mrf.mxu0  ;;  %v1328_v32 = vadd.f32 %v1260_v41, %v6570_v30  ;;  %v2618_v34 = vrot.slane %v2617_v8, 4  ;;  %v1060_v24 = vshrl.u32 %v702_v37, 16  ;;  %v703_v8 = vld [vmem:[%s6380_s24 + $0xb0] sm:$0x1] }
 0x11b   : > { %v1580_v30 = vsel %vm6437_vm6, %v1578_v59, %v1579_v33  ;;  %v1656_v41 = vunpack.c.l.b16 %v1577_v18  ;;  %v1427_v59 = vld [vmem:[%s6380_s24 + $0xac] sm:$0xf]  ;;  %v2627_v33 = vrot.slane %v2625_v29, 4 }
 0x11c   : > { %5478 = vmatmul.msk.bf16.gmra.mxu1 %vm457_vm0, %v1173_v58  ;;  %5516 = vmatmul.msk.bf16.gmra.mxu2 %vm457_vm0, %v1674_v1  ;;  %v6945_v3 = vadd.f32 %v2835_v44, %v2183_v39  ;;  %v2622_v44 = vrot.slane %v2620_v22, 5  ;;  %v1050_v58 = vshll.u32 %v701_v35, 16  ;;  %v1045_v1 = vsel %vm6433_vm5, %v1040_v23, %v1044_v11 }
 0x11d   : > { %5634 = vmatmul.msk.bf16.gmra.mxu3 %vm457_vm0, %v6105_v63  ;;  %5704 = vmatmul.msk.bf16.gmra.mxu0 %vm457_vm0, %v2751_v52  ;;  %v2634_v52 = vshll.u32 %v5681_v12, 16  ;;  %v1155_v39 = vunpack.c.l.b16 %v1035_v42  ;;  %v1049_v22 = vrot.slane %v1047_v17, 4  ;;  %v6967_v11 = vrot.slane %v1056_v40, 5  ;;  %v5682_v12 = vld [vmem:[%s6380_s24 + $0xbc] sm:$0x1] }
 0x11e   : > { %v2623_v57 = vsel %vm6433_vm5, %v2618_v34, %v2622_v44  ;;  %v1052_v23 = vrot.slane %v1050_v58, 5  ;;  %v1062_v35 = vrot.slane %v1060_v24, 4  ;;  %v1156_v37 = vunpack.c.l.b16 %v1045_v1  ;;  %v1426_v40 = vld [vmem:[%s6380_s24 + $0xa8] sm:$0xe] }
 0x11f   : > { %v1761_v26 = vpop.f32.mrf.mxu2  ;;  %v1657_v18 = vunpack.c.l.b16 %v1580_v30  ;;  %v2630_v42 = vrot.slane %v2628_v13, 5  ;;  %v6970_v6 = vrot.slane %v2634_v52, 5  ;;  %v1066_v44 = vshll.u32 %v703_v8, 16  ;;  %v1428_v13 = vld [vmem:[%s6380_s24 + $0xb0] sm:$0x1] }
 0x120   : > { %v1829_v51 = vadd.f32 %v1761_v26, %v1328_v32  ;;  %v2116_v25 = vpop.f32.mrf.mxu3  ;;  %v2734_v32 = vunpack.c.l.b16 %v2623_v57  ;;  %v1053_v17 = vor.u32 %v1052_v23, %v1049_v22  ;;  %v1063_v58 = vor.u32 %v1062_v35, %v6967_v11 }
 0x121   : > { %v1262_v63 = vpop.f32.mrf.mxu1  ;;  %v1583_v24 = vrot.slane %v1427_v59, 5  ;;  %v1174_v1 = vpack.c.b16 %v1156_v37, %v1155_v39  ;;  %v1675_v29 = vpack.c.b16 %v1657_v18, %v1656_v41  ;;  %v2631_v30 = vor.u32 %v2630_v42, %v2627_v33 }
 0x122   : > { %v2184_v56 = vadd.f32 %v2116_v25, %v1829_v51  ;;  %v2840_v7 = vpop.f32.mrf.mxu0  ;;  %v1329_v34 = vadd.f32 %v1262_v63, %v6599_v61  ;;  %v2752_v62 = vpack.c.b16 %v2734_v32, %v2733_v9  ;;  %v2641_v57 = vor.u32 %v2640_v21, %v6970_v6  ;;  %v704_v9 = vld [vmem:[%s6380_s24 + $0xb4] sm:$0xf]  ;;  %v705_v21 = vld [vmem:[%s6380_s24 + $0xb8] sm:$0xf] }
 0x123   : > { %v2644_v61 = vshll.u32 %v5682_v12, 16  ;;  %v1068_v22 = vrot.slane %v1066_v44, 5  ;;  %v5496_v23 = vrot.slane %v1426_v40, 9  ;;  %v1054_v35 = vrot.slane %v1053_v17, 4  ;;  %v5683_v44 = vld [vmem:[%s6380_s24 + $0xc0] sm:$0xf] }
 0x124   : > { %v1064_v59 = vrot.slane %v1063_v58, 4  ;;  %v1586_v39 = vrot.slane %v1428_v13, 5  ;;  %v2632_v41 = vrot.slane %v2631_v30, 4  ;;  %v6982_v37 = vadd.f32 %v6934_v19, %v2184_v56  ;;  %v5684_v17 = vld [vmem:[%s6380_s24 + $0xc4] sm:$0xf] }
 0x125   : > { %v2642_v33 = vrot.slane %v2641_v57, 4  ;;  %v2646_v42 = vrot.slane %v2644_v61, 5  ;;  %v1584_v56 = vsel %vm6437_vm6, %v5496_v23, %v1583_v24  ;;  %v1084_v13 = vshrl.u32 %v705_v21, 16 }
 0x126   : > { %v1069_v19 = vsel %vm6433_vm5, %v1064_v59, %v1068_v22  ;;  %v2662_v57 = vshrl.u32 %v5684_v17, 16  ;;  %v706_v59 = vld [vmem:[%s6380_s24 + $0xbc] sm:$0x1] }
 0x127   : > { %v1763_v26 = vpop.f32.mrf.mxu2 }
 0x128   : > { %v1830_v51 = vadd.f32 %v1763_v26, %v1329_v34  ;;  %v2118_v25 = vpop.f32.mrf.mxu3  ;;  %v1585_v34 = vrot.slane %v1583_v24, 4  ;;  %v1059_v26 = vsel %vm6433_vm5, %v1054_v35, %v6967_v11  ;;  %v2647_v11 = vsel %vm6433_vm5, %v2642_v33, %v2646_v42  ;;  %v1430_v42 = vld [vmem:[%s6380_s24 + $0xb8] sm:$0xf] }
 0x129   : > { %v1265_v52 = vpop.f32.mrf.mxu1  ;;  %v2649_v24 = vshrl.u32 %v5683_v44, 16  ;;  %v1157_v61 = vunpack.c.l.b16 %v1059_v26  ;;  %v2736_v35 = vunpack.c.l.b16 %v2647_v11  ;;  %v1086_v33 = vrot.slane %v1084_v13, 4 }
 0x12a   : > { %v2185_v63 = vadd.f32 %v2118_v25, %v1830_v51  ;;  %v2843_v8 = vpop.f32.mrf.mxu0  ;;  %v1330_v32 = vadd.f32 %v1265_v52, %v6616_v31  ;;  %v2637_v31 = vsel %vm6433_vm5, %v2632_v41, %v6970_v6  ;;  %v1071_v51 = vshrl.u32 %v704_v9, 16 }
 0x12b   : > { %v1074_v25 = vshll.u32 %v704_v9, 16  ;;  %v1658_v6 = vunpack.c.l.b16 %v1584_v56  ;;  %v2735_v23 = vunpack.c.l.b16 %v2637_v31  ;;  %v2651_v9 = vrot.slane %v2649_v24, 4 }
 0x12c   : > { %5479 = vmatmul.msk.bf16.gmra.mxu1 %vm457_vm0, %v1174_v1  ;;  %5517 = vmatmul.msk.bf16.gmra.mxu2 %vm457_vm0, %v1675_v29  ;;  %v6984_v18 = vadd.f32 %v2840_v7, %v2185_v63  ;;  %v1587_v7 = vsel %vm6437_vm6, %v1585_v34, %v1586_v39  ;;  %v1080_v29 = vshll.u32 %v705_v21, 16  ;;  %v1158_v63 = vunpack.c.l.b16 %v1069_v19 }
 0x12d   : > { %5635 = vmatmul.msk.bf16.gmra.mxu3 %vm457_vm0, %v6106_v10  ;;  %5705 = vmatmul.msk.bf16.gmra.mxu0 %vm457_vm0, %v2752_v62  ;;  %v2652_v10 = vshll.u32 %v5683_v44, 16  ;;  %v2658_v62 = vshll.u32 %v5684_v17, 16  ;;  %v1659_v22 = vunpack.c.l.b16 %v1587_v7  ;;  %v1073_v34 = vrot.slane %v1071_v51, 4  ;;  %v1429_v44 = vld [vmem:[%s6380_s24 + $0xb4] sm:$0xe] }
 0x12e   : > { %v1076_v39 = vrot.slane %v1074_v25, 5  ;;  %v7008_v41 = vrot.slane %v1080_v29, 5  ;;  %v2664_v19 = vrot.slane %v2662_v57, 4  ;;  %v1175_v7 = vpack.c.b16 %v1158_v63, %v1157_v61  ;;  %v5685_v17 = vld [vmem:[%s6380_s24 + $0xc8] sm:$0x1] }
 0x12f   : > { %v1766_v12 = vpop.f32.mrf.mxu2  ;;  %v7015_v26 = vrot.slane %v2658_v62, 5  ;;  %v1676_v31 = vpack.c.b16 %v1659_v22, %v1658_v6  ;;  %v2753_v51 = vpack.c.b16 %v2736_v35, %v2735_v23  ;;  %v1090_v25 = vshll.u32 %v706_v59, 16  ;;  %v5912_v22 = vld [vmem:[%s6380_s24 + $0x18] sm:$0xf]  ;;  %v5913_v23 = vld [vmem:[%s6380_s24 + $0x1c] sm:$0xf] }
 0x130   : > { %v1831_v58 = vadd.f32 %v1766_v12, %v1330_v32  ;;  %v2121_v40 = vpop.f32.mrf.mxu3  ;;  %v2654_v12 = vrot.slane %v2652_v10, 5  ;;  %v1077_v29 = vor.u32 %v1076_v39, %v1073_v34  ;;  %v5497_v13 = vrot.slane %v1429_v44, 9 }
 0x131   : > { %v1267_v1 = vpop.f32.mrf.mxu1  ;;  %v1590_v24 = vrot.slane %v1430_v42, 5  ;;  %v2665_v57 = vor.u32 %v2664_v19, %v7015_v26  ;;  %v2668_v61 = vshll.u32 %v5685_v17, 16  ;;  %v1092_v63 = vrot.slane %v1090_v25, 5 }
 0x132   : > { %v2186_v30 = vadd.f32 %v2121_v40, %v1831_v58  ;;  %v2845_v52 = vpop.f32.mrf.mxu0  ;;  %v1331_v21 = vadd.f32 %v1267_v1, %v6644_v4  ;;  %v1087_v4 = vor.u32 %v1086_v33, %v7008_v41  ;;  %v1431_v1 = vld [vmem:[%s6380_s24 + $0xbc] sm:$0x1]  ;;  %v2655_v62 = vor.u32 %v2654_v12, %v2651_v9 }
 0x133   : > { %v1593_v6 = vrot.slane %v1431_v1, 5  ;;  %v1078_v59 = vrot.slane %v1077_v29, 4  ;;  %v1591_v39 = vsel %vm6437_vm6, %v5497_v13, %v1590_v24  ;;  %v1592_v33 = vrot.slane %v1590_v24, 4  ;;  %v5709_v1 = vld [vmem:[%s6380_s24 + $0x10] sm:$0xf] }
 0x134   : > { %v7011_v32 = vadd.f32 %v2843_v8, %v2186_v30  ;;  %v6107_v8 = vld [vmem:[%s6380_s24 + $0xb4] sm:$0xff]  ;;  %v1088_v34 = vrot.slane %v1087_v4, 4  ;;  %v2656_v9 = vrot.slane %v2655_v62, 4  ;;  %v2670_v44 = vrot.slane %v2668_v61, 5 }
 0x135   : > { %v3864_v19 = vshrl.u32 %v5912_v22, 16 }
 0x136   : > { %v2661_v29 = vsel %vm6433_vm5, %v2656_v9, %v7015_v26  ;;  %v5983_v26 = vld [vmem:[%s6380_s24 + $0x1c] sm:$0xf] }
 0x137   : > { %v1768_v56 = vpop.f32.mrf.mxu2 }
 0x138   : > { %v1832_v58 = vadd.f32 %v1768_v56, %v1331_v21  ;;  %v2123_v40 = vpop.f32.mrf.mxu3  ;;  %v2666_v21 = vrot.slane %v2665_v57, 4  ;;  %v3873_v56 = vshll.u32 %v5913_v23, 16 }
 0x139   : > { %v1270_v11 = vpop.f32.mrf.mxu1 }
 0x13a   : > { %v2187_v30 = vadd.f32 %v2123_v40, %v1832_v58  ;;  %v2848_v10 = vpop.f32.mrf.mxu0  ;;  %v1332_v42 = vadd.f32 %v1270_v11, %v6667_v45  ;;  %v1093_v45 = vsel %vm6433_vm5, %v1088_v34, %v1092_v63  ;;  %v2671_v4 = vsel %vm6433_vm5, %v2666_v21, %v2670_v44  ;;  %v5914_v63 = vld [vmem:[%s6380_s24 + $0x20] sm:$0x1] }
 0x13b   : > { %v7046_v24 = vrot.slane %v3873_v56, 5  ;;  %v1160_v57 = vunpack.c.l.b16 %v1093_v45  ;;  %v3060_v34 = vrot.slane %v5709_v1, 5  ;;  %v3883_v21 = vshll.u32 %v5914_v63, 16  ;;  %v5916_v63 = vld [vmem:[%s6380_s24 + $0x28] sm:$0xf] }
 0x13c   : > { %5480 = vmatmul.msk.bf16.gmra.mxu1 %vm457_vm0, %v1175_v7  ;;  %5518 = vmatmul.msk.bf16.gmra.mxu2 %vm457_vm0, %v1676_v31  ;;  %v7026_v35 = vadd.f32 %v2845_v52, %v2187_v30  ;;  %v3867_v52 = vshll.u32 %v5912_v22, 16  ;;  %v3877_v7 = vshrl.u32 %v5913_v23, 16  ;;  %v1083_v31 = vsel %vm6433_vm5, %v1078_v59, %v7008_v41 }
 0x13d   : > { %5636 = vmatmul.msk.bf16.gmra.mxu3 %vm457_vm0, %v6107_v8  ;;  %5706 = vmatmul.msk.bf16.gmra.mxu0 %vm457_vm0, %v2753_v51  ;;  %v1594_v51 = vsel %vm6437_vm6, %v1592_v33, %v1593_v6  ;;  %v1660_v8 = vunpack.c.l.b16 %v1591_v39  ;;  %v3866_v41 = vrot.slane %v3864_v19, 4  ;;  %v1159_v62 = vunpack.c.l.b16 %v1083_v31  ;;  %v5708_v33 = vld [vmem:[%s6380_s24 + $0xc] sm:$0xe]  ;;  %v5982_v31 = vld [vmem:[%s6380_s24 + $0x18] sm:$0xe] }
 0x13e   : > { %v3869_v13 = vrot.slane %v3867_v52, 5  ;;  %v3879_v30 = vrot.slane %v3877_v7, 4  ;;  %v1661_v61 = vunpack.c.l.b16 %v1594_v51  ;;  %v2737_v22 = vunpack.c.l.b16 %v2661_v29  ;;  %v5710_v52 = vld [vmem:[%s6380_s24 + $0x14] sm:$0x1] }
 0x13f   : > { %v1771_v12 = vpop.f32.mrf.mxu2  ;;  %v2738_v23 = vunpack.c.l.b16 %v2671_v4  ;;  %v1176_v19 = vpack.c.b16 %v1160_v57, %v1159_v62  ;;  %v4635_v56 = vrot.slane %v5983_v26, 5  ;;  %v5756_v51 = vrot.slane %v5708_v33, 9 }
 0x140   : > { %v1833_v17 = vadd.f32 %v1771_v12, %v1332_v42  ;;  %v2126_v58 = vpop.f32.mrf.mxu3  ;;  %v3870_v42 = vor.u32 %v3869_v13, %v3866_v41  ;;  %v3880_v9 = vor.u32 %v3879_v30, %v7046_v24  ;;  %v3063_v29 = vrot.slane %v5710_v52, 5 }
 0x141   : > { %v1272_v40 = vpop.f32.mrf.mxu1  ;;  %v3885_v41 = vrot.slane %v3883_v21, 5  ;;  %v4637_v13 = vrot.slane %v4635_v56, 4 }
 0x142   : > { %v2188_v25 = vadd.f32 %v2126_v58, %v1833_v17  ;;  %v2850_v11 = vpop.f32.mrf.mxu0  ;;  %v1333_v59 = vadd.f32 %v1272_v40, %v6694_v27  ;;  %v6108_v17 = vld [vmem:[%s6380_s24 + $0xc0] sm:$0xff]  ;;  %v2754_v58 = vpack.c.b16 %v2738_v23, %v2737_v22  ;;  %v3871_v4 = vrot.slane %v3870_v42, 4 }
 0x143   : > { %v5984_v27 = vld [vmem:[%s6380_s24 + $0x20] sm:$0x1]  ;;  %v3881_v1 = vrot.slane %v3880_v9, 4  ;;  %v3061_v23 = vsel %vm6437_vm6, %v5756_v51, %v3060_v34 }
 0x144   : > { %v7049_v6 = vadd.f32 %v2848_v10, %v2188_v25  ;;  %v1677_v10 = vpack.c.b16 %v1661_v61, %v1660_v8  ;;  %v3062_v25 = vrot.slane %v3060_v34, 4  ;;  %v6030_v8 = vrot.slane %v5982_v31, 9  ;;  %v5915_v61 = vld [vmem:[%s6380_s24 + $0x24] sm:$0xf] }
 0x145   : > { %v4638_v30 = vrot.slane %v5984_v27, 5  ;;  %v3886_v33 = vsel %vm6433_vm5, %v3881_v1, %v3885_v41  ;;  %v3888_v9 = vshrl.u32 %v5915_v61, 16  ;;  %v3891_v21 = vshll.u32 %v5915_v61, 16  ;;  %v5712_v27 = vld [vmem:[%s6380_s24 + $0x1c] sm:$0xf] }
 0x146   : > { %v3064_v26 = vsel %vm6437_vm6, %v3062_v25, %v3063_v29  ;;  %v5917_v1 = vld [vmem:[%s6380_s24 + $0x2c] sm:$0x1] }
 0x147   : > { %v1773_v39 = vpop.f32.mrf.mxu2  ;;  %v4639_v42 = vsel %vm6437_vm6, %v4637_v13, %v4638_v30  ;;  %v3206_v52 = vunpack.c.l.b16 %v3064_v26  ;;  %v3893_v51 = vrot.slane %v3891_v21, 5  ;;  %v5711_v26 = vld [vmem:[%s6380_s24 + $0x18] sm:$0xe] }
 0x148   : > { %v1834_v44 = vadd.f32 %v1773_v39, %v1333_v59  ;;  %v2128_v12 = vpop.f32.mrf.mxu3  ;;  %v5757_v21 = vrot.slane %v5711_v26, 9 }
 0x149   : > { %v1275_v7 = vpop.f32.mrf.mxu1 }
 0x14a   : > { %v2189_v40 = vadd.f32 %v2128_v12, %v1834_v44  ;;  %v2853_v45 = vpop.f32.mrf.mxu0  ;;  %v1334_v57 = vadd.f32 %v1275_v7, %v6717_v15  ;;  %v4636_v15 = vsel %vm6437_vm6, %v6030_v8, %v4635_v56  ;;  %v3897_v44 = vshll.u32 %v5916_v63, 16  ;;  %v5986_v8 = vld [vmem:[%s6380_s24 + $0x28] sm:$0xf] }
 0x14b   : > { %v3901_v12 = vshrl.u32 %v5916_v63, 16  ;;  %v4781_v56 = vunpack.c.l.b16 %v4639_v42  ;;  %v3067_v63 = vrot.slane %v5712_v27, 5  ;;  %v4642_v42 = vrot.slane %v5986_v8, 5 }
 0x14c   : > { %5481 = vmatmul.msk.bf16.gmra.mxu1 %vm457_vm0, %v1176_v19  ;;  %5519 = vmatmul.msk.bf16.gmra.mxu2 %vm457_vm0, %v1677_v10  ;;  %v7061_v62 = vadd.f32 %v2850_v11, %v2189_v40  ;;  %v3876_v11 = vsel %vm6433_vm5, %v3871_v4, %v7046_v24  ;;  %v3205_v10 = vunpack.c.l.b16 %v3061_v23  ;;  %v3890_v40 = vrot.slane %v3888_v9, 4  ;;  %v5987_v9 = vld [vmem:[%s6380_s24 + $0x2c] sm:$0x1] }
 0x14d   : > { %5637 = vmatmul.msk.bf16.gmra.mxu3 %vm457_vm0, %v6108_v17  ;;  %5707 = vmatmul.msk.bf16.gmra.mxu0 %vm457_vm0, %v2754_v58  ;;  %v4282_v7 = vunpack.c.l.b16 %v3876_v11  ;;  %v4283_v17 = vunpack.c.l.b16 %v3886_v33  ;;  %v4780_v58 = vunpack.c.l.b16 %v4636_v15  ;;  %v7084_v25 = vrot.slane %v3897_v44, 5  ;;  %v5713_v15 = vld [vmem:[%s6380_s24 + $0x20] sm:$0x1] }
 0x14e   : > { %v3903_v29 = vrot.slane %v3901_v12, 4  ;;  %v3894_v11 = vor.u32 %v3893_v51, %v3890_v40  ;;  %v3069_v44 = vrot.slane %v3067_v63, 4  ;;  %v5918_v12 = vld [vmem:[%s6380_s24 + $0x30] sm:$0xf]  ;;  %v4644_v40 = vrot.slane %v4642_v42, 4 }
 0x14f   : > { %v1776_v22 = vpop.f32.mrf.mxu2  ;;  %v4314_v61 = vpack.c.b16 %v4283_v17, %v4282_v7  ;;  %v4812_v23 = vpack.c.b16 %v4781_v56, %v4780_v58  ;;  %v4645_v51 = vrot.slane %v5987_v9, 5  ;;  %v5920_v9 = vld [vmem:[%s6380_s24 + $0x38] sm:$0x1] }
 0x150   : > { %v1835_v59 = vadd.f32 %v1776_v22, %v1334_v57  ;;  %v2131_v39 = vpop.f32.mrf.mxu3  ;;  %v3237_v57 = vpack.c.b16 %v3206_v52, %v3205_v10  ;;  %v3070_v52 = vrot.slane %v5713_v15, 5  ;;  %v3895_v7 = vrot.slane %v3894_v11, 4 }
 0x151   : > { %v1277_v34 = vpop.f32.mrf.mxu1  ;;  %v4646_v11 = vsel %vm6437_vm6, %v4644_v40, %v4645_v51  ;;  %v3931_v51 = vshll.u32 %v5920_v9, 16 }
 0x152   : > { %v2190_v19 = vadd.f32 %v2131_v39, %v1835_v59  ;;  %v2855_v24 = vpop.f32.mrf.mxu0  ;;  %v1335_v4 = vadd.f32 %v1277_v34, %v6749_v5  ;;  %v3904_v5 = vor.u32 %v3903_v29, %v7084_v25  ;;  %v3907_v59 = vshll.u32 %v5917_v1, 16  ;;  %v5985_v34 = vld [vmem:[%s6380_s24 + $0x24] sm:$0xe] }
 0x153   : > { %v6031_v27 = vrot.slane %v5985_v34, 9  ;;  %v3915_v1 = vshll.u32 %v5918_v12, 16 }
 0x154   : > { %v7081_v31 = vadd.f32 %v2853_v45, %v2190_v19  ;;  %v6112_v45 = vld [vmem:[%s6380_s24 + $0x18] sm:$0xff]  ;;  %v5919_v19 = vld [vmem:[%s6380_s24 + $0x34] sm:$0xf]  ;;  %v3905_v17 = vrot.slane %v3904_v5, 4  ;;  %v3909_v58 = vrot.slane %v3907_v59, 5 }
 0x155   : > { %v4643_v26 = vsel %vm6437_vm6, %v6031_v27, %v4642_v42  ;;  %v3917_v59 = vrot.slane %v3915_v1, 5  ;;  %v6113_v1 = vld [vmem:[%s6380_s24 + $0x24] sm:$0xff] }
 0x156   : > { %v4782_v42 = vunpack.c.l.b16 %v4643_v26 }
 0x157   : > { %v1778_v41 = vpop.f32.mrf.mxu2 }
 0x158   : > { %v1836_v13 = vadd.f32 %v1778_v41, %v1335_v4  ;;  %v2133_v30 = vpop.f32.mrf.mxu3  ;;  %v3912_v4 = vshrl.u32 %v5918_v12, 16  ;;  %v3921_v41 = vshll.u32 %v5919_v19, 16 }
 0x159   : > { %v1280_v22 = vpop.f32.mrf.mxu1 }
 0x15a   : > { %v2191_v39 = vadd.f32 %v2133_v30, %v1836_v13  ;;  %v2858_v33 = vpop.f32.mrf.mxu0  ;;  %v1336_v56 = vadd.f32 %v1280_v22, %v6587_v49  ;;  %v3900_v49 = vsel %vm6433_vm5, %v3895_v7, %v7084_v25  ;;  %v3914_v5 = vrot.slane %v3912_v4, 4 }
 0x15c   : > { %5778 = vmatmul.msk.bf16.vlgmr.msra.gmra.mxu1 %vm457_vm0, %v3237_v57  ;;  %5896 = vmatmul.msk.bf16.vlgmr.msra.gmra.mxu2 %vm457_vm0, %v6112_v45  ;;  %v7099_v10 = vadd.f32 %v2855_v24, %v2191_v39  ;;  %v3925_v24 = vshrl.u32 %v5919_v19, 16  ;;  %v3068_v57 = vsel %vm6437_vm6, %v5757_v21, %v3067_v63  ;;  %v3071_v45 = vsel %vm6437_vm6, %v3069_v44, %v3070_v52  ;;  %v5715_v63 = vld [vmem:[%s6380_s24 + $0x28] sm:$0xf]  ;;  %v5989_v52 = vld [vmem:[%s6380_s24 + $0x34] sm:$0xf] }
 0x15d   : > { %5966 = vmatmul.msk.bf16.vlgmr.msra.gmra.mxu3 %vm457_vm0, %v4314_v61  ;;  %6052 = vmatmul.msk.bf16.vlgmr.msra.gmra.mxu0 %vm457_vm0, %v4812_v23  ;;  %v3910_v23 = vsel %vm6433_vm5, %v3905_v17, %v3909_v58  ;;  %v7118_v39 = vrot.slane %v3921_v41, 5  ;;  %v3207_v25 = vunpack.c.l.b16 %v3068_v57  ;;  %v3208_v34 = vunpack.c.l.b16 %v3071_v45  ;;  %v5716_v41 = vld [vmem:[%s6380_s24 + $0x2c] sm:$0x1]  ;;  %v5988_v45 = vld [vmem:[%s6380_s24 + $0x30] sm:$0xe] }
 0x15e   : > { %v3927_v15 = vrot.slane %v3925_v24, 4  ;;  %v4284_v44 = vunpack.c.l.b16 %v3900_v49  ;;  %v4285_v12 = vunpack.c.l.b16 %v3910_v23  ;;  %v4783_v19 = vunpack.c.l.b16 %v4646_v11 }
 0x15f   : > { %v1781_v29 = vpop.f32.mrf.mxu2  ;;  %v3074_v17 = vrot.slane %v5715_v63, 5  ;;  %v3918_v27 = vor.u32 %v3917_v59, %v3914_v5  ;;  %v3238_v4 = vpack.c.b16 %v3208_v34, %v3207_v25  ;;  %v4649_v24 = vrot.slane %v5989_v52, 5 }
 0x160   : > { %v1837_v8 = vadd.f32 %v1781_v29, %v1336_v56  ;;  %v2136_v13 = vpop.f32.mrf.mxu3  ;;  %v5714_v56 = vld [vmem:[%s6380_s24 + $0x24] sm:$0xe]  ;;  %v3928_v40 = vor.u32 %v3927_v15, %v7118_v39  ;;  %v4813_v57 = vpack.c.b16 %v4783_v19, %v4782_v42  ;;  %v3077_v26 = vrot.slane %v5716_v41, 5 }
 0x161   : > { %v1282_v30 = vpop.f32.mrf.mxu1  ;;  %v3076_v23 = vrot.slane %v3074_v17, 4  ;;  %v3919_v11 = vrot.slane %v3918_v27, 4  ;;  %v3933_v5 = vrot.slane %v3931_v51, 5  ;;  %v6032_v59 = vrot.slane %v5988_v45, 9 }
 0x162   : > { %v2192_v61 = vadd.f32 %v2136_v13, %v1837_v8  ;;  %v2860_v22 = vpop.f32.mrf.mxu0  ;;  %v1337_v7 = vadd.f32 %v1282_v30, %v6610_v20  ;;  %v4315_v13 = vpack.c.b16 %v4285_v12, %v4284_v44  ;;  %v5990_v20 = vld [vmem:[%s6380_s24 + $0x38] sm:$0x1]  ;;  %v3929_v63 = vrot.slane %v3928_v40, 4  ;;  %v5921_v44 = vld [vmem:[%s6380_s24 + $0x3c] sm:$0xf] }
 0x163   : > { %v4651_v15 = vrot.slane %v4649_v24, 4  ;;  %v4652_v25 = vrot.slane %v5990_v20, 5  ;;  %v5922_v12 = vld [vmem:[%s6380_s24 + $0x40] sm:$0xf]  ;;  %v3078_v52 = vsel %vm6437_vm6, %v3076_v23, %v3077_v26  ;;  %v3936_v40 = vshrl.u32 %v5921_v44, 16 }
 0x164   : > { %v7121_v21 = vadd.f32 %v2858_v33, %v2192_v61  ;;  %v5758_v61 = vrot.slane %v5714_v56, 9  ;;  %v3934_v56 = vsel %vm6433_vm5, %v3929_v63, %v3933_v5  ;;  %v3939_v51 = vshll.u32 %v5921_v44, 16  ;;  %v5718_v20 = vld [vmem:[%s6380_s24 + $0x34] sm:$0xf]  ;;  %v5923_v63 = vld [vmem:[%s6380_s24 + $0x44] sm:$0x1] }
 0x165   : > { %v4653_v27 = vsel %vm6437_vm6, %v4651_v15, %v4652_v25  ;;  %v3210_v41 = vunpack.c.l.b16 %v3078_v52  ;;  %v5717_v52 = vld [vmem:[%s6380_s24 + $0x30] sm:$0xe] }
 0x166   : > { %v3075_v19 = vsel %vm6437_vm6, %v5758_v61, %v3074_v17  ;;  %v3941_v61 = vrot.slane %v3939_v51, 5  ;;  %v5759_v51 = vrot.slane %v5717_v52, 9 }
 0x167   : > { %v1783_v58 = vpop.f32.mrf.mxu2 }
 0x168   : > { %v1838_v33 = vadd.f32 %v1783_v58, %v1337_v7  ;;  %v2138_v29 = vpop.f32.mrf.mxu3 }
 0x169   : > { %v1285_v8 = vpop.f32.mrf.mxu1 }
 0x16a   : > { %v2193_v30 = vadd.f32 %v2138_v29, %v1838_v33  ;;  %v2863_v49 = vpop.f32.mrf.mxu0  ;;  %v1338_v9 = vadd.f32 %v1285_v8, %v6629_v53  ;;  %v4650_v53 = vsel %vm6437_vm6, %v6032_v59, %v4649_v24  ;;  %v3945_v33 = vshll.u32 %v5922_v12, 16  ;;  %v5992_v59 = vld [vmem:[%s6380_s24 + $0x40] sm:$0xf] }
 0x16b   : > { %v3949_v29 = vshrl.u32 %v5922_v12, 16  ;;  %v4785_v24 = vunpack.c.l.b16 %v4653_v27  ;;  %v3081_v12 = vrot.slane %v5718_v20, 5  ;;  %v4656_v27 = vrot.slane %v5992_v59, 5 }
 0x16c   : > { %5779 = vmatmul.msk.bf16.gmra.mxu1 %vm457_vm0, %v3238_v4  ;;  %5897 = vmatmul.msk.bf16.gmra.mxu2 %vm457_vm0, %v6113_v1  ;;  %v7133_v34 = vadd.f32 %v2860_v22, %v2193_v30  ;;  %v3924_v22 = vsel %vm6433_vm5, %v3919_v11, %v7118_v39  ;;  %v3209_v1 = vunpack.c.l.b16 %v3075_v19  ;;  %v3938_v30 = vrot.slane %v3936_v40, 4  ;;  %v5993_v40 = vld [vmem:[%s6380_s24 + $0x44] sm:$0x1] }
 0x16d   : > { %5967 = vmatmul.msk.bf16.gmra.mxu3 %vm457_vm0, %v4315_v13  ;;  %6053 = vmatmul.msk.bf16.gmra.mxu0 %vm457_vm0, %v4813_v57  ;;  %v4286_v8 = vunpack.c.l.b16 %v3924_v22  ;;  %v4287_v13 = vunpack.c.l.b16 %v3934_v56  ;;  %v4784_v57 = vunpack.c.l.b16 %v4650_v53  ;;  %v7156_v23 = vrot.slane %v3945_v33, 5  ;;  %v5719_v53 = vld [vmem:[%s6380_s24 + $0x38] sm:$0x1] }
 0x16e   : > { %v3951_v26 = vrot.slane %v3949_v29, 4  ;;  %v3942_v22 = vor.u32 %v3941_v61, %v3938_v30  ;;  %v3083_v33 = vrot.slane %v3081_v12, 4  ;;  %v5924_v29 = vld [vmem:[%s6380_s24 + $0x48] sm:$0xf]  ;;  %v4658_v30 = vrot.slane %v4656_v27, 4 }
 0x16f   : > { %v1786_v42 = vpop.f32.mrf.mxu2  ;;  %v4316_v44 = vpack.c.b16 %v4287_v13, %v4286_v8  ;;  %v4814_v19 = vpack.c.b16 %v4785_v24, %v4784_v57  ;;  %v4659_v61 = vrot.slane %v5993_v40, 5  ;;  %v5926_v40 = vld [vmem:[%s6380_s24 + $0x50] sm:$0x1] }
 0x170   : > { %v1839_v7 = vadd.f32 %v1786_v42, %v1338_v9  ;;  %v2141_v58 = vpop.f32.mrf.mxu3  ;;  %v3239_v9 = vpack.c.b16 %v3210_v41, %v3209_v1  ;;  %v3084_v41 = vrot.slane %v5719_v53, 5  ;;  %v3943_v8 = vrot.slane %v3942_v22, 4 }
 0x171   : > { %v1287_v17 = vpop.f32.mrf.mxu1  ;;  %v4660_v22 = vsel %vm6437_vm6, %v4658_v30, %v4659_v61  ;;  %v3979_v61 = vshll.u32 %v5926_v40, 16 }
 0x172   : > { %v2194_v4 = vadd.f32 %v2141_v58, %v1839_v7  ;;  %v2865_v39 = vpop.f32.mrf.mxu0  ;;  %v1339_v11 = vadd.f32 %v1287_v17, %v6661_v36  ;;  %v3952_v36 = vor.u32 %v3951_v26, %v7156_v23  ;;  %v3955_v7 = vshll.u32 %v5923_v63, 16  ;;  %v5991_v17 = vld [vmem:[%s6380_s24 + $0x3c] sm:$0xe] }
 0x173   : > { %v6033_v20 = vrot.slane %v5991_v17, 9  ;;  %v3963_v63 = vshll.u32 %v5924_v29, 16 }
 0x174   : > { %v7153_v45 = vadd.f32 %v2863_v49, %v2194_v4  ;;  %v6114_v49 = vld [vmem:[%s6380_s24 + $0x30] sm:$0xff]  ;;  %v5925_v4 = vld [vmem:[%s6380_s24 + $0x4c] sm:$0xf]  ;;  %v3953_v13 = vrot.slane %v3952_v36, 4  ;;  %v3957_v57 = vrot.slane %v3955_v7, 5 }
 0x175   : > { %v4657_v52 = vsel %vm6437_vm6, %v6033_v20, %v4656_v27  ;;  %v3965_v7 = vrot.slane %v3963_v63, 5  ;;  %v6115_v63 = vld [vmem:[%s6380_s24 + $0x3c] sm:$0xff] }
 0x176   : > { %v4786_v27 = vunpack.c.l.b16 %v4657_v52 }
 0x177   : > { %v1788_v5 = vpop.f32.mrf.mxu2 }
 0x178   : > { %v1840_v15 = vadd.f32 %v1788_v5, %v1339_v11  ;;  %v2143_v25 = vpop.f32.mrf.mxu3  ;;  %v3960_v11 = vshrl.u32 %v5924_v29, 16  ;;  %v3969_v5 = vshll.u32 %v5925_v4, 16 }
 0x179   : > { %v1290_v42 = vpop.f32.mrf.mxu1 }
 0x17a   : > { %v2195_v58 = vadd.f32 %v2143_v25, %v1840_v15  ;;  %v2868_v56 = vpop.f32.mrf.mxu0  ;;  %v1340_v24 = vadd.f32 %v1290_v42, %v6686_v16  ;;  %v3948_v16 = vsel %vm6433_vm5, %v3943_v8, %v7156_v23  ;;  %v3962_v36 = vrot.slane %v3960_v11, 4 }
 0x17c   : > { %5780 = vmatmul.msk.bf16.gmra.mxu1 %vm457_vm0, %v3239_v9  ;;  %5898 = vmatmul.msk.bf16.gmra.mxu2 %vm457_vm0, %v6114_v49  ;;  %v7171_v1 = vadd.f32 %v2865_v39, %v2195_v58  ;;  %v3973_v39 = vshrl.u32 %v5925_v4, 16  ;;  %v3082_v9 = vsel %vm6437_vm6, %v5759_v51, %v3081_v12  ;;  %v3085_v49 = vsel %vm6437_vm6, %v3083_v33, %v3084_v41  ;;  %v5721_v12 = vld [vmem:[%s6380_s24 + $0x40] sm:$0xf]  ;;  %v5995_v41 = vld [vmem:[%s6380_s24 + $0x4c] sm:$0xf] }
 0x17d   : > { %5968 = vmatmul.msk.bf16.gmra.mxu3 %vm457_vm0, %v4316_v44  ;;  %6054 = vmatmul.msk.bf16.gmra.mxu0 %vm457_vm0, %v4814_v19  ;;  %v3958_v19 = vsel %vm6433_vm5, %v3953_v13, %v3957_v57  ;;  %v7190_v58 = vrot.slane %v3969_v5, 5  ;;  %v3211_v23 = vunpack.c.l.b16 %v3082_v9  ;;  %v3212_v17 = vunpack.c.l.b16 %v3085_v49  ;;  %v5722_v5 = vld [vmem:[%s6380_s24 + $0x44] sm:$0x1]  ;;  %v5994_v49 = vld [vmem:[%s6380_s24 + $0x48] sm:$0xe] }
 0x17e   : > { %v3975_v53 = vrot.slane %v3973_v39, 4  ;;  %v4288_v33 = vunpack.c.l.b16 %v3948_v16  ;;  %v4289_v29 = vunpack.c.l.b16 %v3958_v19  ;;  %v4787_v4 = vunpack.c.l.b16 %v4660_v22 }
 0x17f   : > { %v1791_v26 = vpop.f32.mrf.mxu2  ;;  %v3088_v13 = vrot.slane %v5721_v12, 5  ;;  %v3966_v20 = vor.u32 %v3965_v7, %v3962_v36  ;;  %v3240_v11 = vpack.c.b16 %v3212_v17, %v3211_v23  ;;  %v4663_v39 = vrot.slane %v5995_v41, 5 }
 0x180   : > { %v1841_v59 = vadd.f32 %v1791_v26, %v1340_v24  ;;  %v2146_v15 = vpop.f32.mrf.mxu3  ;;  %v5720_v24 = vld [vmem:[%s6380_s24 + $0x3c] sm:$0xe]  ;;  %v3976_v30 = vor.u32 %v3975_v53, %v7190_v58  ;;  %v4815_v9 = vpack.c.b16 %v4787_v4, %v4786_v27  ;;  %v3091_v52 = vrot.slane %v5722_v5, 5 }
 0x181   : > { %v1292_v25 = vpop.f32.mrf.mxu1  ;;  %v3090_v19 = vrot.slane %v3088_v13, 4  ;;  %v3967_v22 = vrot.slane %v3966_v20, 4  ;;  %v3981_v36 = vrot.slane %v3979_v61, 5  ;;  %v6034_v7 = vrot.slane %v5994_v49, 9 }
 0x182   : > { %v2196_v44 = vadd.f32 %v2146_v15, %v1841_v59  ;;  %v2870_v42 = vpop.f32.mrf.mxu0  ;;  %v1341_v8 = vadd.f32 %v1292_v25, %v6710_v0  ;;  %v4317_v15 = vpack.c.b16 %v4289_v29, %v4288_v33  ;;  %v5996_v0 = vld [vmem:[%s6380_s24 + $0x50] sm:$0x1]  ;;  %v3977_v12 = vrot.slane %v3976_v30, 4  ;;  %v5927_v33 = vld [vmem:[%s6380_s24 + $0x54] sm:$0xf] }
 0x183   : > { %v4665_v53 = vrot.slane %v4663_v39, 4  ;;  %v4666_v23 = vrot.slane %v5996_v0, 5  ;;  %v5928_v29 = vld [vmem:[%s6380_s24 + $0x58] sm:$0xf]  ;;  %v3092_v41 = vsel %vm6437_vm6, %v3090_v19, %v3091_v52  ;;  %v3984_v30 = vshrl.u32 %v5927_v33, 16 }
 0x184   : > { %v7193_v51 = vadd.f32 %v2868_v56, %v2196_v44  ;;  %v5760_v44 = vrot.slane %v5720_v24, 9  ;;  %v3982_v24 = vsel %vm6433_vm5, %v3977_v12, %v3981_v36  ;;  %v3987_v61 = vshll.u32 %v5927_v33, 16  ;;  %v5724_v0 = vld [vmem:[%s6380_s24 + $0x4c] sm:$0xf]  ;;  %v5929_v12 = vld [vmem:[%s6380_s24 + $0x5c] sm:$0x1] }
 0x185   : > { %v4667_v20 = vsel %vm6437_vm6, %v4665_v53, %v4666_v23  ;;  %v3214_v5 = vunpack.c.l.b16 %v3092_v41  ;;  %v5723_v41 = vld [vmem:[%s6380_s24 + $0x48] sm:$0xe] }
 0x186   : > { %v3089_v4 = vsel %vm6437_vm6, %v5760_v44, %v3088_v13  ;;  %v3989_v44 = vrot.slane %v3987_v61, 5  ;;  %v5761_v61 = vrot.slane %v5723_v41, 9 }
 0x187   : > { %v1793_v57 = vpop.f32.mrf.mxu2 }
 0x188   : > { %v1842_v56 = vadd.f32 %v1793_v57, %v1341_v8  ;;  %v2148_v26 = vpop.f32.mrf.mxu3 }
 0x189   : > { %v1295_v59 = vpop.f32.mrf.mxu1 }
 0x18a   : > { %v2197_v25 = vadd.f32 %v2148_v26, %v1842_v56  ;;  %v2873_v16 = vpop.f32.mrf.mxu0  ;;  %v1342_v40 = vadd.f32 %v1295_v59, %v6731_v50  ;;  %v4664_v50 = vsel %vm6437_vm6, %v6034_v7, %v4663_v39  ;;  %v3993_v56 = vshll.u32 %v5928_v29, 16  ;;  %v5998_v7 = vld [vmem:[%s6380_s24 + $0x58] sm:$0xf] }
 0x18b   : > { %v3997_v26 = vshrl.u32 %v5928_v29, 16  ;;  %v4789_v39 = vunpack.c.l.b16 %v4667_v20  ;;  %v3095_v29 = vrot.slane %v5724_v0, 5  ;;  %v4670_v20 = vrot.slane %v5998_v7, 5 }
 0x18c   : > { %5781 = vmatmul.msk.bf16.gmra.mxu1 %vm457_vm0, %v3240_v11  ;;  %5899 = vmatmul.msk.bf16.gmra.mxu2 %vm457_vm0, %v6115_v63  ;;  %v7205_v17 = vadd.f32 %v2870_v42, %v2197_v25  ;;  %v3972_v42 = vsel %vm6433_vm5, %v3967_v22, %v7190_v58  ;;  %v3213_v63 = vunpack.c.l.b16 %v3089_v4  ;;  %v3986_v25 = vrot.slane %v3984_v30, 4  ;;  %v5999_v30 = vld [vmem:[%s6380_s24 + $0x5c] sm:$0x1] }
 0x18d   : > { %5969 = vmatmul.msk.bf16.gmra.mxu3 %vm457_vm0, %v4317_v15  ;;  %6055 = vmatmul.msk.bf16.gmra.mxu0 %vm457_vm0, %v4815_v9  ;;  %v4290_v59 = vunpack.c.l.b16 %v3972_v42  ;;  %v4291_v15 = vunpack.c.l.b16 %v3982_v24  ;;  %v4788_v9 = vunpack.c.l.b16 %v4664_v50  ;;  %v7228_v19 = vrot.slane %v3993_v56, 5  ;;  %v5725_v50 = vld [vmem:[%s6380_s24 + $0x50] sm:$0x1] }
 0x18e   : > { %v3999_v52 = vrot.slane %v3997_v26, 4  ;;  %v3990_v42 = vor.u32 %v3989_v44, %v3986_v25  ;;  %v3097_v56 = vrot.slane %v3095_v29, 4  ;;  %v5930_v26 = vld [vmem:[%s6380_s24 + $0x60] sm:$0xf]  ;;  %v4672_v25 = vrot.slane %v4670_v20, 4 }
 0x18f   : > { %v1796_v27 = vpop.f32.mrf.mxu2  ;;  %v4318_v33 = vpack.c.b16 %v4291_v15, %v4290_v59  ;;  %v4816_v4 = vpack.c.b16 %v4789_v39, %v4788_v9  ;;  %v4673_v44 = vrot.slane %v5999_v30, 5  ;;  %v5932_v30 = vld [vmem:[%s6380_s24 + $0x68] sm:$0x1] }
 0x190   : > { %v1843_v8 = vadd.f32 %v1796_v27, %v1342_v40  ;;  %v2151_v57 = vpop.f32.mrf.mxu3  ;;  %v3241_v40 = vpack.c.b16 %v3214_v5, %v3213_v63  ;;  %v3098_v5 = vrot.slane %v5725_v50, 5  ;;  %v3991_v59 = vrot.slane %v3990_v42, 4 }
 0x191   : > { %v1297_v13 = vpop.f32.mrf.mxu1  ;;  %v4674_v42 = vsel %vm6437_vm6, %v4672_v25, %v4673_v44 }
 0x192   : > { %v2198_v11 = vadd.f32 %v2151_v57, %v1843_v8  ;;  %v2875_v58 = vpop.f32.mrf.mxu0  ;;  %v1343_v22 = vadd.f32 %v1297_v13, %v6760_v47  ;;  %v4000_v47 = vor.u32 %v3999_v52, %v7228_v19  ;;  %v4003_v8 = vshll.u32 %v5929_v12, 16  ;;  %v5997_v13 = vld [vmem:[%s6380_s24 + $0x54] sm:$0xe] }
 0x193   : > { %v6035_v0 = vrot.slane %v5997_v13, 9  ;;  %v4011_v12 = vshll.u32 %v5930_v26, 16 }
 0x194   : > { %v7225_v49 = vadd.f32 %v2873_v16, %v2198_v11  ;;  %v6116_v16 = vld [vmem:[%s6380_s24 + $0x48] sm:$0xff]  ;;  %v5931_v11 = vld [vmem:[%s6380_s24 + $0x64] sm:$0xf]  ;;  %v4001_v15 = vrot.slane %v4000_v47, 4  ;;  %v4005_v9 = vrot.slane %v4003_v8, 5 }
 0x195   : > { %v4671_v41 = vsel %vm6437_vm6, %v6035_v0, %v4670_v20  ;;  %v4013_v8 = vrot.slane %v4011_v12, 5  ;;  %v5726_v0 = vld [vmem:[%s6380_s24 + $0x54] sm:$0xe] }
 0x196   : > { %v4790_v20 = vunpack.c.l.b16 %v4671_v41  ;;  %v5762_v41 = vrot.slane %v5726_v0, 9 }
 0x197   : > { %v1798_v36 = vpop.f32.mrf.mxu2 }
 0x198   : > { %v1844_v53 = vadd.f32 %v1798_v36, %v1343_v22  ;;  %v2153_v23 = vpop.f32.mrf.mxu3  ;;  %v4008_v22 = vshrl.u32 %v5930_v26, 16  ;;  %v4017_v36 = vshll.u32 %v5931_v11, 16 }
 0x199   : > { %v1300_v27 = vpop.f32.mrf.mxu1 }
 0x19a   : > { %v2199_v57 = vadd.f32 %v2153_v23, %v1844_v53  ;;  %v2878_v24 = vpop.f32.mrf.mxu0  ;;  %v1344_v39 = vadd.f32 %v1300_v27, %v6593_v54  ;;  %v3996_v54 = vsel %vm6433_vm5, %v3991_v59, %v7228_v19  ;;  %v4010_v47 = vrot.slane %v4008_v22, 4  ;;  %v7796_v59 = vld [vmem:[#allocation6_spill] sm:$0xff] }
 0x19c   : > { %5782 = vmatmul.msk.bf16.gmra.mxu1 %vm457_vm0, %v3241_v40  ;;  %5900 = vmatmul.msk.bf16.gmra.mxu2 %vm457_vm0, %v6116_v16  ;;  %v7243_v63 = vadd.f32 %v2875_v58, %v2199_v57  ;;  %v4021_v58 = vshrl.u32 %v5931_v11, 16  ;;  %v3096_v40 = vsel %vm6437_vm6, %v5761_v61, %v3095_v29  ;;  %v3099_v16 = vsel %vm6437_vm6, %v3097_v56, %v3098_v5  ;;  %v5727_v29 = vld [vmem:[%s6380_s24 + $0x58] sm:$0xf]  ;;  %v6001_v5 = vld [vmem:[%s6380_s24 + $0x64] sm:$0xf] }
 0x19d   : > { %5970 = vmatmul.msk.bf16.gmra.mxu3 %vm457_vm0, %v4318_v33  ;;  %6056 = vmatmul.msk.bf16.gmra.mxu0 %vm457_vm0, %v4816_v4  ;;  %v4006_v4 = vsel %vm6433_vm5, %v4001_v15, %v4005_v9  ;;  %v7262_v57 = vrot.slane %v4017_v36, 5  ;;  %v3215_v19 = vunpack.c.l.b16 %v3096_v40  ;;  %v3216_v13 = vunpack.c.l.b16 %v3099_v16  ;;  %v6117_v36 = vld [vmem:[%s6380_s24 + $0x54] sm:$0xff] }
 0x19e   : > { %v4023_v50 = vrot.slane %v4021_v58, 4  ;;  %v4292_v56 = vunpack.c.l.b16 %v3996_v54  ;;  %v4293_v26 = vunpack.c.l.b16 %v4006_v4  ;;  %v4791_v11 = vunpack.c.l.b16 %v4674_v42  ;;  %v5728_v58 = vld [vmem:[%s6380_s24 + $0x5c] sm:$0x1]  ;;  %v6000_v54 = vld [vmem:[%s6380_s24 + $0x60] sm:$0xe] }
 0x19f   : > { %v1801_v52 = vpop.f32.mrf.mxu2  ;;  %v3102_v9 = vrot.slane %v5727_v29, 5  ;;  %v4014_v25 = vor.u32 %v4013_v8, %v4010_v47  ;;  %v3242_v12 = vpack.c.b16 %v3216_v13, %v3215_v19  ;;  %v3105_v29 = vrot.slane %v5728_v58, 5 }
 0x1a0   : > { %v1845_v7 = vadd.f32 %v1801_v52, %v1344_v39  ;;  %v2156_v53 = vpop.f32.mrf.mxu3  ;;  %v4024_v44 = vor.u32 %v4023_v50, %v7262_v57  ;;  %v4027_v52 = vshll.u32 %v5932_v30, 16  ;;  %v4319_v40 = vpack.c.b16 %v4293_v26, %v4292_v56  ;;  %v7797_v26 = vld [vmem:[#allocation7_spill] sm:$0xff] }
 0x1a1   : > { %v1302_v23 = vpop.f32.mrf.mxu1  ;;  %v4817_v16 = vpack.c.b16 %v4791_v11, %v4790_v20  ;;  %v3104_v42 = vrot.slane %v3102_v9, 4  ;;  %v4015_v47 = vrot.slane %v4014_v25, 4  ;;  %v6036_v19 = vrot.slane %v6000_v54, 9  ;;  %v5933_v11 = vld [vmem:[%s6380_s24 + $0x6c] sm:$0xf] }
 0x1a2   : > { %v2200_v33 = vadd.f32 %v2156_v53, %v1845_v7  ;;  %v2880_v27 = vpop.f32.mrf.mxu0  ;;  %v1345_v15 = vadd.f32 %v1302_v23, %v7796_v59  ;;  %v4677_v7 = vrot.slane %v6001_v5, 5  ;;  %v6002_v23 = vld [vmem:[%s6380_s24 + $0x68] sm:$0x1]  ;;  %v4025_v8 = vrot.slane %v4024_v44, 4  ;;  %v5934_v5 = vld [vmem:[%s6380_s24 + $0x70] sm:$0xf] }
 0x1a3   : > { %v4029_v50 = vrot.slane %v4027_v52, 5  ;;  %v4680_v30 = vrot.slane %v6002_v23, 5  ;;  %v4045_v58 = vshrl.u32 %v5934_v5, 16 }
 0x1a4   : > { %v7265_v61 = vadd.f32 %v2878_v24, %v2200_v33  ;;  %v4679_v13 = vrot.slane %v4677_v7, 4  ;;  %v4678_v52 = vsel %vm6437_vm6, %v6036_v19, %v4677_v7  ;;  %v7799_v19 = vld [vmem:[#allocation8_spill] sm:$0xff] }
 0x1a5   : > { %v4030_v44 = vsel %vm6433_vm5, %v4025_v8, %v4029_v50  ;;  %v4047_v50 = vrot.slane %v4045_v58, 4  ;;  %v6003_v58 = vld [vmem:[%s6380_s24 + $0x6c] sm:$0xe] }
 0x1a6   : > { %v4295_v23 = vunpack.c.l.b16 %v4030_v44 }
 0x1a7   : > { %v1803_v39 = vpop.f32.mrf.mxu2 }
 0x1a8   : > { %v1846_v24 = vadd.f32 %v1803_v39, %v1345_v15  ;;  %v2158_v22 = vpop.f32.mrf.mxu3  ;;  %v3103_v15 = vsel %vm6437_vm6, %v5762_v41, %v3102_v9  ;;  %v3106_v39 = vsel %vm6437_vm6, %v3104_v42, %v3105_v29  ;;  %v5730_v42 = vld [vmem:[%s6380_s24 + $0x64] sm:$0xf] }
 0x1a9   : > { %v1305_v53 = vpop.f32.mrf.mxu1 }
 0x1aa   : > { %v2201_v33 = vadd.f32 %v2158_v22, %v1846_v24  ;;  %v2883_v4 = vpop.f32.mrf.mxu0  ;;  %v1346_v20 = vadd.f32 %v1305_v53, %v7797_v26  ;;  %v4681_v24 = vsel %vm6437_vm6, %v4679_v13, %v4680_v30  ;;  %v4032_v22 = vshrl.u32 %v5933_v11, 16  ;;  %v5935_v30 = vld [vmem:[%s6380_s24 + $0x74] sm:$0x1] }
 0x1ab   : > { %v4793_v7 = vunpack.c.l.b16 %v4681_v24  ;;  %v4051_v24 = vshll.u32 %v5935_v30, 16 }
 0x1ac   : > { %5783 = vmatmul.msk.bf16.gmra.mxu1 %vm457_vm0, %v3242_v12  ;;  %5901 = vmatmul.msk.bf16.gmra.mxu2 %vm457_vm0, %v6117_v36  ;;  %v7277_v56 = vadd.f32 %v2880_v27, %v2201_v33  ;;  %v4020_v27 = vsel %vm6433_vm5, %v4015_v47, %v7262_v57  ;;  %v4035_v12 = vshll.u32 %v5933_v11, 16  ;;  %v4041_v36 = vshll.u32 %v5934_v5, 16 }
 0x1ad   : > { %5971 = vmatmul.msk.bf16.gmra.mxu3 %vm457_vm0, %v4319_v40  ;;  %6057 = vmatmul.msk.bf16.gmra.mxu0 %vm457_vm0, %v4817_v16  ;;  %v3217_v40 = vunpack.c.l.b16 %v3103_v15  ;;  %v3218_v16 = vunpack.c.l.b16 %v3106_v39  ;;  %v4294_v54 = vunpack.c.l.b16 %v4020_v27  ;;  %v4792_v33 = vunpack.c.l.b16 %v4678_v52 }
 0x1ae   : > { %v4034_v29 = vrot.slane %v4032_v22, 4  ;;  %v4037_v47 = vrot.slane %v4035_v12, 5  ;;  %v7300_v8 = vrot.slane %v4041_v36, 5  ;;  %v3109_v39 = vrot.slane %v5730_v42, 5  ;;  %v5731_v12 = vld [vmem:[%s6380_s24 + $0x68] sm:$0x1] }
 0x1af   : > { %v1806_v59 = vpop.f32.mrf.mxu2  ;;  %v4320_v15 = vpack.c.b16 %v4295_v23, %v4294_v54  ;;  %v5936_v54 = vld [vmem:[%s6380_s24 + $0x78] sm:$0xf]  ;;  %v5937_v23 = vld [vmem:[%s6380_s24 + $0x7c] sm:$0xf] }
 0x1b0   : > { %v1847_v0 = vadd.f32 %v1806_v59, %v1346_v20  ;;  %v2161_v25 = vpop.f32.mrf.mxu3  ;;  %v6004_v20 = vld [vmem:[%s6380_s24 + $0x70] sm:$0xf]  ;;  %v3243_v59 = vpack.c.b16 %v3218_v16, %v3217_v40  ;;  %v4038_v44 = vor.u32 %v4037_v47, %v4034_v29  ;;  %v4048_v52 = vor.u32 %v4047_v50, %v7300_v8  ;;  %v7801_v50 = vld [vmem:[#allocation9_spill] sm:$0xff] }
 0x1b1   : > { %v1307_v9 = vpop.f32.mrf.mxu1  ;;  %v4684_v36 = vrot.slane %v6004_v20, 5  ;;  %v3111_v16 = vrot.slane %v3109_v39, 4  ;;  %v4053_v47 = vrot.slane %v4051_v24, 5 }
 0x1b2   : > { %v2202_v53 = vadd.f32 %v2161_v25, %v1847_v0  ;;  %v2885_v57 = vpop.f32.mrf.mxu0  ;;  %v1347_v13 = vadd.f32 %v1307_v9, %v7799_v19  ;;  %v4818_v0 = vpack.c.b16 %v4793_v7, %v4792_v33  ;;  %v5729_v25 = vld [vmem:[%s6380_s24 + $0x60] sm:$0xe]  ;;  %v3112_v7 = vrot.slane %v5731_v12, 5 }
 0x1b3   : > { %v5763_v40 = vrot.slane %v5729_v25, 9  ;;  %v4039_v42 = vrot.slane %v4038_v44, 4  ;;  %v4049_v29 = vrot.slane %v4048_v52, 4  ;;  %v4686_v30 = vrot.slane %v4684_v36, 4 }
 0x1b4   : > { %v7297_v41 = vadd.f32 %v2883_v4, %v2202_v53  ;;  %v6118_v4 = vld [vmem:[%s6380_s24 + $0x60] sm:$0xff]  ;;  %v6005_v53 = vld [vmem:[%s6380_s24 + $0x74] sm:$0x1]  ;;  %v3113_v44 = vsel %vm6437_vm6, %v3111_v16, %v3112_v7 }
 0x1b5   : > { %v5938_v7 = vld [vmem:[%s6380_s24 + $0x80] sm:$0x1] }
 0x1b6   : > { %7798 = vst [vmem:[#allocation6_spill] sm:$0xff] %v7297_v41 }
 0x1b7   : > { %v1808_v26 = vpop.f32.mrf.mxu2 }
 0x1b8   : > { %v1848_v11 = vadd.f32 %v1808_v26, %v1347_v13  ;;  %v2163_v5 = vpop.f32.mrf.mxu3  ;;  %v6037_v13 = vrot.slane %v6003_v58, 9  ;;  %v4687_v26 = vrot.slane %v6005_v53, 5 }
 0x1b9   : > { %v1310_v27 = vpop.f32.mrf.mxu1 }
 0x1ba   : > { %v2203_v9 = vadd.f32 %v2163_v5, %v1848_v11  ;;  %v2888_v22 = vpop.f32.mrf.mxu0  ;;  %v1348_v19 = vadd.f32 %v1310_v27, %v7801_v50  ;;  %v4056_v11 = vshrl.u32 %v5936_v54, 16  ;;  %v4059_v5 = vshll.u32 %v5936_v54, 16 }
 0x1bb   : > { %v4044_v27 = vsel %vm6433_vm5, %v4039_v42, %v7300_v8  ;;  %v4685_v12 = vsel %vm6437_vm6, %v6037_v13, %v4684_v36  ;;  %v4688_v58 = vsel %vm6437_vm6, %v4686_v30, %v4687_v26  ;;  %v3220_v54 = vunpack.c.l.b16 %v3113_v44  ;;  %v7803_v13 = vld [vmem:[#allocation10_spill] sm:$0xff]  ;;  %v6119_v44 = vld [vmem:[%s6380_s24 + $0x6c] sm:$0xff] }
 0x1bc   : > { %5784 = vmatmul.msk.bf16.gmra.mxu1 %vm457_vm0, %v3243_v59  ;;  %5902 = vmatmul.msk.bf16.gmra.mxu2 %vm457_vm0, %v6118_v4  ;;  %v7315_v33 = vadd.f32 %v2885_v57, %v2203_v9  ;;  %v4065_v59 = vshll.u32 %v5937_v23, 16  ;;  %v4069_v4 = vshrl.u32 %v5937_v23, 16  ;;  %v4054_v9 = vsel %vm6433_vm5, %v4049_v29, %v4053_v47  ;;  %v5733_v23 = vld [vmem:[%s6380_s24 + $0x70] sm:$0xf] }
 0x1bd   : > { %5972 = vmatmul.msk.bf16.gmra.mxu3 %vm457_vm0, %v4320_v15  ;;  %6058 = vmatmul.msk.bf16.gmra.mxu0 %vm457_vm0, %v4818_v0  ;;  %v3110_v0 = vsel %vm6437_vm6, %v5763_v40, %v3109_v39  ;;  %v4058_v39 = vrot.slane %v4056_v11, 4  ;;  %v4061_v53 = vrot.slane %v4059_v5, 5  ;;  %v4296_v29 = vunpack.c.l.b16 %v4044_v27  ;;  %v5734_v11 = vld [vmem:[%s6380_s24 + $0x74] sm:$0x1] }
 0x1be   : > { %7800 = vst [vmem:[#allocation7_spill] sm:$0xff] %v7315_v33  ;;  %v7333_v40 = vrot.slane %v4065_v59, 5  ;;  %v4071_v16 = vrot.slane %v4069_v4, 4  ;;  %v3219_v8 = vunpack.c.l.b16 %v3110_v0  ;;  %v4297_v47 = vunpack.c.l.b16 %v4054_v9 }
 0x1bf   : > { %v1811_v20 = vpop.f32.mrf.mxu2  ;;  %v4794_v36 = vunpack.c.l.b16 %v4685_v12  ;;  %v4795_v50 = vunpack.c.l.b16 %v4688_v58  ;;  %v3116_v5 = vrot.slane %v5733_v23, 5  ;;  %v4062_v59 = vor.u32 %v4061_v53, %v4058_v39  ;;  %v6006_v58 = vld [vmem:[%s6380_s24 + $0x78] sm:$0xe] }
 0x1c0   : > { %v1849_v57 = vadd.f32 %v1811_v20, %v1348_v19  ;;  %v2166_v25 = vpop.f32.mrf.mxu3  ;;  %v6007_v19 = vld [vmem:[%s6380_s24 + $0x7c] sm:$0xf]  ;;  %v5732_v20 = vld [vmem:[%s6380_s24 + $0x6c] sm:$0xe]  ;;  %v4072_v4 = vor.u32 %v4071_v16, %v7333_v40  ;;  %v3244_v0 = vpack.c.b16 %v3220_v54, %v3219_v8  ;;  %v4321_v9 = vpack.c.b16 %v4297_v47, %v4296_v29 }
 0x1c1   : > { %v1312_v15 = vpop.f32.mrf.mxu1  ;;  %v4691_v27 = vrot.slane %v6007_v19, 5  ;;  %v4819_v12 = vpack.c.b16 %v4795_v50, %v4794_v36  ;;  %v5764_v33 = vrot.slane %v5732_v20, 9  ;;  %v3119_v23 = vrot.slane %v5734_v11, 5  ;;  %v7805_v36 = vld [vmem:[#allocation11_spill] sm:$0xff]  ;;  %v5939_v19 = vld [vmem:[%s6380_s24 + $0x84] sm:$0xf] }
 0x1c2   : > { %v2204_v52 = vadd.f32 %v2166_v25, %v1849_v57  ;;  %v2890_v24 = vpop.f32.mrf.mxu0  ;;  %v1349_v30 = vadd.f32 %v1312_v15, %v7803_v13  ;;  %v4075_v57 = vshll.u32 %v5938_v7, 16  ;;  %v6008_v15 = vld [vmem:[%s6380_s24 + $0x80] sm:$0x1]  ;;  %v3118_v39 = vrot.slane %v3116_v5, 4 }
 0x1c3   : > { %v4063_v53 = vrot.slane %v4062_v59, 4  ;;  %v4073_v16 = vrot.slane %v4072_v4, 4  ;;  %v6038_v8 = vrot.slane %v6006_v58, 9  ;;  %v4693_v54 = vrot.slane %v4691_v27, 4 }
 0x1c4   : > { %v7337_v42 = vadd.f32 %v2888_v22, %v2204_v52  ;;  %v4077_v7 = vrot.slane %v4075_v57, 5  ;;  %v4694_v29 = vrot.slane %v6008_v15, 5  ;;  %v3117_v20 = vsel %vm6437_vm6, %v5764_v33, %v3116_v5 }
 0x1c5   : > { %v3120_v11 = vsel %vm6437_vm6, %v3118_v39, %v3119_v23  ;;  %v4080_v5 = vshrl.u32 %v5939_v19, 16 }
 0x1c6   : > { %7802 = vst [vmem:[#allocation8_spill] sm:$0xff] %v7337_v42  ;;  %v4078_v57 = vsel %vm6433_vm5, %v4073_v16, %v4077_v7  ;;  %v3222_v58 = vunpack.c.l.b16 %v3120_v11 }
 0x1c7   : > { %v1813_v26 = vpop.f32.mrf.mxu2  ;;  %v4082_v16 = vrot.slane %v4080_v5, 4 }
 0x1c8   : > { %v1850_v22 = vadd.f32 %v1813_v26, %v1349_v30  ;;  %v2168_v25 = vpop.f32.mrf.mxu3  ;;  %v5940_v30 = vld [vmem:[%s6380_s24 + $0x88] sm:$0xf] }
 0x1c9   : > { %v1315_v52 = vpop.f32.mrf.mxu1 }
 0x1ca   : > { %v2205_v13 = vadd.f32 %v2168_v25, %v1850_v22  ;;  %v2893_v42 = vpop.f32.mrf.mxu0  ;;  %v1350_v50 = vadd.f32 %v1315_v52, %v7805_v36  ;;  %v4692_v22 = vsel %vm6437_vm6, %v6038_v8, %v4691_v27  ;;  %v4695_v25 = vsel %vm6437_vm6, %v4693_v54, %v4694_v29  ;;  %v7807_v29 = vld [vmem:[#allocation12_spill] sm:$0xff] }
 0x1cb   : > { %v4093_v52 = vshrl.u32 %v5940_v30, 16  ;;  %v4796_v23 = vunpack.c.l.b16 %v4692_v22  ;;  %v4797_v27 = vunpack.c.l.b16 %v4695_v25  ;;  %v5735_v22 = vld [vmem:[%s6380_s24 + $0x78] sm:$0xe] }
 0x1cc   : > { %5785 = vmatmul.msk.bf16.gmra.mxu1 %vm457_vm0, %v3244_v0  ;;  %5903 = vmatmul.msk.bf16.gmra.mxu2 %vm457_vm0, %v6119_v44  ;;  %v7349_v47 = vadd.f32 %v2890_v24, %v2205_v13  ;;  %v4068_v24 = vsel %vm6433_vm5, %v4063_v53, %v7333_v40  ;;  %v4083_v0 = vshll.u32 %v5939_v19, 16  ;;  %v4089_v44 = vshll.u32 %v5940_v30, 16  ;;  %v5736_v53 = vld [vmem:[%s6380_s24 + $0x7c] sm:$0xf]  ;;  %v6010_v30 = vld [vmem:[%s6380_s24 + $0x88] sm:$0xf] }
 0x1cd   : > { %5973 = vmatmul.msk.bf16.gmra.mxu3 %vm457_vm0, %v4321_v9  ;;  %6059 = vmatmul.msk.bf16.gmra.mxu0 %vm457_vm0, %v4819_v12  ;;  %v3221_v12 = vunpack.c.l.b16 %v3117_v20  ;;  %v4298_v15 = vunpack.c.l.b16 %v4068_v24  ;;  %v4299_v13 = vunpack.c.l.b16 %v4078_v57  ;;  %v4095_v54 = vrot.slane %v4093_v52, 4  ;;  %v5737_v52 = vld [vmem:[%s6380_s24 + $0x80] sm:$0x1] }
 0x1ce   : > { %7804 = vst [vmem:[#allocation9_spill] sm:$0xff] %v7349_v47  ;;  %v4085_v7 = vrot.slane %v4083_v0, 5  ;;  %v7372_v8 = vrot.slane %v4089_v44, 5  ;;  %v4820_v57 = vpack.c.b16 %v4797_v27, %v4796_v23  ;;  %v3126_v27 = vrot.slane %v5737_v52, 5 }
 0x1cf   : > { %v1816_v26 = vpop.f32.mrf.mxu2  ;;  %v3245_v11 = vpack.c.b16 %v3222_v58, %v3221_v12  ;;  %v4322_v24 = vpack.c.b16 %v4299_v13, %v4298_v15  ;;  %v5765_v12 = vrot.slane %v5735_v22, 9  ;;  %v5942_v15 = vld [vmem:[%s6380_s24 + $0x90] sm:$0xf]  ;;  %v5943_v13 = vld [vmem:[%s6380_s24 + $0x94] sm:$0xf] }
 0x1d0   : > { %v1851_v59 = vadd.f32 %v1816_v26, %v1350_v50  ;;  %v2171_v4 = vpop.f32.mrf.mxu3  ;;  %v5941_v50 = vld [vmem:[%s6380_s24 + $0x8c] sm:$0x1]  ;;  %v4086_v25 = vor.u32 %v4085_v7, %v4082_v16 }
 0x1d1   : > { %v1317_v33 = vpop.f32.mrf.mxu1  ;;  %v4099_v5 = vshll.u32 %v5941_v50, 16 }
 0x1d2   : > { %v2206_v9 = vadd.f32 %v2171_v4, %v1851_v59  ;;  %v2895_v40 = vpop.f32.mrf.mxu0  ;;  %v1351_v36 = vadd.f32 %v1317_v33, %v7807_v29  ;;  %v3123_v59 = vrot.slane %v5736_v53, 5  ;;  %v4096_v33 = vor.u32 %v4095_v54, %v7372_v8  ;;  %v6009_v29 = vld [vmem:[%s6380_s24 + $0x84] sm:$0xe] }
 0x1d3   : > { %v4087_v53 = vrot.slane %v4086_v25, 4  ;;  %v4101_v7 = vrot.slane %v4099_v5, 5  ;;  %v6039_v50 = vrot.slane %v6009_v29, 9  ;;  %v7418_v29 = vld [vmem:[%s6380_s24 + $0x88] sm:$0xf] }
 0x1d4   : > { %v7369_v39 = vadd.f32 %v2893_v42, %v2206_v9  ;;  %v6120_v42 = vld [vmem:[%s6380_s24 + $0x78] sm:$0xff]  ;;  %v4698_v9 = vrot.slane %v6010_v30, 5  ;;  %v3125_v58 = vrot.slane %v3123_v59, 4  ;;  %v4097_v16 = vrot.slane %v4096_v33, 4 }
 0x1d5   : > { %v3124_v25 = vsel %vm6437_vm6, %v5765_v12, %v3123_v59  ;;  %v7409_v59 = vld [vmem:[%s7780_s2] ss:$0 sm:$0xff] }
 0x1d6   : > { %7806 = vst [vmem:[#allocation10_spill] sm:$0xff] %v7369_v39 }
 0x1d7   : > { %v1818_v19 = vpop.f32.mrf.mxu2 }
 0x1d8   : > { %v1852_v26 = vadd.f32 %v1818_v19, %v1351_v36  ;;  %v2173_v20 = vpop.f32.mrf.mxu3  ;;  %v6011_v36 = vld [vmem:[%s6380_s24 + $0x8c] sm:$0x1]  ;;  %v4700_v19 = vrot.slane %v4698_v9, 4 }
 0x1d9   : > { %v3316_v4 = vpop.f32.mrf.mxu1  ;;  %v4701_v30 = vrot.slane %v6011_v36, 5 }
 0x1da   : > { %v2207_v0 = vadd.f32 %v2173_v20, %v1852_v26  ;;  %v4891_v44 = vpop.f32.mrf.mxu0  ;;  %v3396_v54 = vadd.f32 %v3316_v4, %v6815_v2  ;;  %v4104_v20 = vshrl.u32 %v5942_v15, 16  ;;  %v3127_v2 = vsel %vm6437_vm6, %v3125_v58, %v3126_v27 }
 0x1db   : > { %v4092_v4 = vsel %vm6433_vm5, %v4087_v53, %v7372_v8  ;;  %v4699_v8 = vsel %vm6437_vm6, %v6039_v50, %v4698_v9  ;;  %v4702_v52 = vsel %vm6437_vm6, %v4700_v19, %v4701_v30  ;;  %v3223_v27 = vunpack.c.l.b16 %v3124_v25  ;;  %v6013_v19 = vld [vmem:[%s6380_s24 + $0x94] sm:$0xf] }
 0x1dc   : > { %5786 = vmatmul.msk.bf16.gmra.mxu1 %vm457_vm0, %v3245_v11  ;;  %5904 = vmatmul.msk.bf16.gmra.mxu2 %vm457_vm0, %v6120_v42  ;;  %v7387_v23 = vadd.f32 %v2895_v40, %v2207_v0  ;;  %v4107_v11 = vshll.u32 %v5942_v15, 16  ;;  %v4113_v40 = vshll.u32 %v5943_v13, 16  ;;  %v4117_v42 = vshrl.u32 %v5943_v13, 16 }
 0x1dd   : > { %5974 = vmatmul.msk.bf16.gmra.mxu3 %vm457_vm0, %v4322_v24  ;;  %6060 = vmatmul.msk.bf16.gmra.mxu0 %vm457_vm0, %v4820_v57  ;;  %v4102_v0 = vsel %vm6433_vm5, %v4097_v16, %v4101_v7  ;;  %v4106_v36 = vrot.slane %v4104_v20, 4  ;;  %v3224_v53 = vunpack.c.l.b16 %v3127_v2  ;;  %v5944_v16 = vld [vmem:[%s6380_s24 + $0x98] sm:$0x1]  ;;  %v5103_v7 = vld [vmem:[%s7404_s14] sm:$0xff]  ;;  %v4798_v50 = vunpack.c.l.b16 %v4699_v8  ;;  %v5740_v8 = vld [vmem:[%s6380_s24 + $0x8c] sm:$0x1] }
 0x1de   : > { %7808 = vst [vmem:[#allocation11_spill] sm:$0xff] %v7387_v23  ;;  %v4109_v12 = vrot.slane %v4107_v11, 5  ;;  %v7420_v58 = vrot.slane %v4113_v40, 5  ;;  %v4119_v15 = vrot.slane %v4117_v42, 4  ;;  %v4301_v9 = vunpack.c.l.b16 %v4102_v0  ;;  %v5738_v40 = vld [vmem:[%s6380_s24 + $0x84] sm:$0xe] }
 0x1df   : > { %v3671_v26 = vpop.f32.mrf.mxu2  ;;  %v3130_v11 = vrot.slane %v7418_v29, 5  ;;  %v6121_v0 = vld [vmem:[%s6380_s24 + $0x84] sm:$0xff]  ;;  %v6014_v29 = vld [vmem:[%s6380_s24 + $0x98] sm:$0x1] }
 0x1e0   : > { %v3751_v24 = vadd.f32 %v3671_v26, %v3396_v54  ;;  %v4393_v22 = vpop.f32.mrf.mxu3  ;;  %v4300_v54 = vunpack.c.l.b16 %v4092_v4  ;;  %v4799_v26 = vunpack.c.l.b16 %v4702_v52  ;;  %v4110_v42 = vor.u32 %v4109_v12, %v4106_v36 }
 0x1e1   : > { %v3318_v57 = vpop.f32.mrf.mxu1  ;;  %v4705_v52 = vrot.slane %v6013_v19, 5  ;;  %v5766_v36 = vrot.slane %v5738_v40, 9  ;;  %v3132_v12 = vrot.slane %v3130_v11, 4 }
 0x1e2   : > { %v4473_v33 = vadd.f32 %v4393_v22, %v3751_v24  ;;  %v4893_v5 = vpop.f32.mrf.mxu0  ;;  %v3397_v20 = vadd.f32 %v3318_v57, %v6817_v38  ;;  %v4120_v24 = vor.u32 %v4119_v15, %v7420_v58  ;;  %v4123_v22 = vshll.u32 %v5944_v16, 16  ;;  %v6012_v57 = vld [vmem:[%s6380_s24 + $0x90] sm:$0xe] }
 0x1e3   : > { %v4323_v23 = vpack.c.b16 %v4301_v9, %v4300_v54  ;;  %v4821_v38 = vpack.c.b16 %v4799_v26, %v4798_v50  ;;  %v3133_v15 = vrot.slane %v5740_v8, 5  ;;  %v4111_v16 = vrot.slane %v4110_v42, 4  ;;  %v5104_v26 = vld [vmem:[%s7404_s14 + $0x8] sm:$0xff] }
 0x1e4   : > { %v4971_v13 = vadd.f32 %v4891_v44, %v4473_v33  ;;  %v3246_v33 = vpack.c.b16 %v3224_v53, %v3223_v27  ;;  %v4125_v27 = vrot.slane %v4123_v22, 5  ;;  %v6040_v54 = vrot.slane %v6012_v57, 9 }
 0x1e5   : > { %v4707_v9 = vrot.slane %v4705_v52, 4  ;;  %v4708_v50 = vrot.slane %v6014_v29, 5  ;;  %v4116_v40 = vsel %vm6433_vm5, %v4111_v16, %v7420_v58  ;;  %v5742_v16 = vld [vmem:[%s6380_s24 + $0x94] sm:$0xf] }
 0x1e6   : > { %v5071_v30 = vadd.f32 %v7409_v59, %v4971_v13  ;;  %v4706_v22 = vsel %vm6437_vm6, %v6040_v54, %v4705_v52  ;;  %v4302_v29 = vunpack.c.l.b16 %v4116_v40  ;;  %v6122_v40 = vld [vmem:[%s6380_s24 + $0x90] sm:$0xff] }
 0x1e7   : > { %v3673_v44 = vpop.f32.mrf.mxu2 }
 0x1e8   : > { %v5135_v25 = vadd.f32 %v5103_v7, %v5071_v30  ;;  %v3752_v2 = vadd.f32 %v3673_v44, %v3397_v20  ;;  %v4395_v4 = vpop.f32.mrf.mxu3  ;;  %v4121_v7 = vrot.slane %v4120_v24, 4  ;;  %v5945_v20 = vld [vmem:[%s6380_s24 + $0x9c] sm:$0xf]  ;;  %v5946_v44 = vld [vmem:[%s6380_s24 + $0xa0] sm:$0xf] }
 0x1e9   : > { %v3321_v13 = vpop.f32.mrf.mxu1  ;;  %v4141_v58 = vshrl.u32 %v5946_v44, 16 }
 0x1ea   : > { %v5167_v39 = vmax.f32 %v5135_v25, 0.0  ;;  %v4474_v47 = vadd.f32 %v4395_v4, %v3752_v2  ;;  %v4896_v41 = vpop.f32.mrf.mxu0  ;;  %v3398_v30 = vadd.f32 %v3321_v13, %v6859_v28  ;;  %v4128_v2 = vshrl.u32 %v5945_v20, 16 }
 0x1eb   : > { %v4131_v4 = vshll.u32 %v5945_v20, 16  ;;  %v6016_v20 = vld [vmem:[%s6380_s24 + $0xa0] sm:$0xf] }
 0x1ec   : > { %5199 = vst [vmem:[%s7436_s29] sm:$0xff] %v5167_v39  ;;  %v4972_v53 = vadd.f32 %v4893_v5, %v4474_v47  ;;  %5787 = vmatmul.msk.bf16.gmra.mxu1 %vm457_vm0, %v3246_v33  ;;  %5905 = vmatmul.msk.bf16.gmra.mxu2 %vm457_vm0, %v6121_v0  ;;  %v3131_v47 = vsel %vm6437_vm6, %v5766_v36, %v3130_v11  ;;  %v4137_v33 = vshll.u32 %v5946_v44, 16 }
 0x1ed   : > { %5975 = vmatmul.msk.bf16.gmra.mxu3 %vm457_vm0, %v4323_v23  ;;  %6061 = vmatmul.msk.bf16.gmra.mxu0 %vm457_vm0, %v4821_v38  ;;  %v3134_v5 = vsel %vm6437_vm6, %v3132_v12, %v3133_v15  ;;  %v4126_v23 = vsel %vm6433_vm5, %v4121_v7, %v4125_v27  ;;  %v4709_v11 = vsel %vm6437_vm6, %v4707_v9, %v4708_v50  ;;  %v3225_v38 = vunpack.c.l.b16 %v3131_v47  ;;  %v5105_v7 = vld [vmem:[%s7404_s14 + $0x10] sm:$0xff] }
 0x1ee   : > { %v5072_v19 = vadd.f32 %v7409_v59, %v4972_v53  ;;  %v3226_v57 = vunpack.c.l.b16 %v3134_v5  ;;  %v4303_v36 = vunpack.c.l.b16 %v4126_v23  ;;  %v4800_v12 = vunpack.c.l.b16 %v4706_v22  ;;  %v5743_v22 = vld [vmem:[%s6380_s24 + $0x98] sm:$0x1] }
 0x1ef   : > { %v3676_v39 = vpop.f32.mrf.mxu2  ;;  %v4801_v15 = vunpack.c.l.b16 %v4709_v11  ;;  %v4130_v27 = vrot.slane %v4128_v2, 4  ;;  %v4133_v53 = vrot.slane %v4131_v4, 5  ;;  %v7464_v54 = vrot.slane %v4137_v33, 5 }
 0x1f0   : > { %v5136_v42 = vadd.f32 %v5104_v26, %v5072_v19  ;;  %v3753_v24 = vadd.f32 %v3676_v39, %v3398_v30  ;;  %v4398_v28 = vpop.f32.mrf.mxu3  ;;  %v4143_v9 = vrot.slane %v4141_v58, 4  ;;  %v5947_v19 = vld [vmem:[%s6380_s24 + $0xa4] sm:$0x1]  ;;  %v3247_v5 = vpack.c.b16 %v3226_v57, %v3225_v38  ;;  %v6015_v58 = vld [vmem:[%s6380_s24 + $0x9c] sm:$0xe] }
 0x1f1   : > { %v3323_v25 = vpop.f32.mrf.mxu1  ;;  %v4324_v23 = vpack.c.b16 %v4303_v36, %v4302_v29  ;;  %v4134_v11 = vor.u32 %v4133_v53, %v4130_v27  ;;  %v6017_v57 = vld [vmem:[%s6380_s24 + $0xa4] sm:$0x1]  ;;  %v5948_v36 = vld [vmem:[%s6380_s24 + $0xa8] sm:$0xf]  ;;  %v6041_v53 = vrot.slane %v6015_v58, 9 }
 0x1f2   : > { %v5168_v0 = vmax.f32 %v5136_v42, 0.0  ;;  %v4475_v8 = vadd.f32 %v4398_v28, %v3753_v24  ;;  %v4898_v13 = vpop.f32.mrf.mxu0  ;;  %v3399_v26 = vadd.f32 %v3323_v25, %v6861_v43  ;;  %v5741_v42 = vld [vmem:[%s6380_s24 + $0x90] sm:$0xe]  ;;  %v4822_v28 = vpack.c.b16 %v4801_v15, %v4800_v12  ;;  %v5949_v12 = vld [vmem:[%s6380_s24 + $0xac] sm:$0xf]  ;;  %v5106_v15 = vld [vmem:[%s7404_s14 + $0x18] sm:$0xff] }
 0x1f3   : > { %v4144_v43 = vor.u32 %v4143_v9, %v7464_v54  ;;  %v4147_v25 = vshll.u32 %v5947_v19, 16 }
 0x1f4   : > { %5200 = vst [vmem:[%s7436_s29 + $0x8] sm:$0xff] %v5168_v0  ;;  %v4973_v52 = vadd.f32 %v4896_v41, %v4475_v8  ;;  %v3137_v41 = vrot.slane %v5742_v16, 5  ;;  %v4712_v0 = vrot.slane %v6016_v20, 5  ;;  %v5767_v8 = vrot.slane %v5741_v42, 9 }
 0x1f5   : > { %v4135_v16 = vrot.slane %v4134_v11, 4  ;;  %v4149_v27 = vrot.slane %v4147_v25, 5  ;;  %v4155_v20 = vshll.u32 %v5948_v36, 16 }
 0x1f6   : > { %v5073_v50 = vadd.f32 %v7409_v59, %v4973_v52  ;;  %v3139_v38 = vrot.slane %v3137_v41, 4  ;;  %v3140_v52 = vrot.slane %v5743_v22, 5  ;;  %v3138_v42 = vsel %vm6437_vm6, %v5767_v8, %v3137_v41 }
 0x1f7   : > { %v3678_v30 = vpop.f32.mrf.mxu2  ;;  %v4713_v25 = vsel %vm6437_vm6, %v6041_v53, %v4712_v0  ;;  %v4157_v58 = vrot.slane %v4155_v20, 5 }
 0x1f8   : > { %v5137_v44 = vadd.f32 %v5105_v7, %v5073_v50  ;;  %v3754_v39 = vadd.f32 %v3678_v30, %v3399_v26  ;;  %v4400_v47 = vpop.f32.mrf.mxu3  ;;  %v4145_v7 = vrot.slane %v4144_v43, 4  ;;  %v4714_v50 = vrot.slane %v4712_v0, 4 }
 0x1f9   : > { %v3326_v24 = vpop.f32.mrf.mxu1  ;;  %v4715_v26 = vrot.slane %v6017_v57, 5  ;;  %v4152_v30 = vshrl.u32 %v5948_v36, 16  ;;  %v3227_v57 = vunpack.c.l.b16 %v3138_v42  ;;  %v5107_v36 = vld [vmem:[%s7404_s14 + $0x20] sm:$0xff]  ;;  %v4802_v0 = vunpack.c.l.b16 %v4713_v25 }
 0x1fa   : > { %v5169_v2 = vmax.f32 %v5137_v44, 0.0  ;;  %v4476_v4 = vadd.f32 %v4400_v47, %v3754_v39  ;;  %v4901_v33 = vpop.f32.mrf.mxu0  ;;  %v4161_v44 = vshll.u32 %v5949_v12, 16  ;;  %v4165_v39 = vshrl.u32 %v5949_v12, 16 }
 0x1fb   : > { %v4716_v41 = vsel %vm6437_vm6, %v4714_v50, %v4715_v26 }
 0x1fc   : > { %5201 = vst [vmem:[%s7436_s29 + $0x10] sm:$0xff] %v5169_v2  ;;  %v4974_v29 = vadd.f32 %v4898_v13, %v4476_v4  ;;  %5788 = vmatmul.msk.bf16.gmra.mxu1 %vm457_vm0, %v3247_v5  ;;  %5906 = vmatmul.msk.bf16.gmra.mxu2 %vm457_vm0, %v6122_v40  ;;  %v3400_v13 = vadd.f32 %v3326_v24, %v6900_v14  ;;  %v5745_v2 = vld [vmem:[%s6380_s24 + $0xa0] sm:$0xf]  ;;  %v4154_v4 = vrot.slane %v4152_v30, 4  ;;  %v7500_v8 = vrot.slane %v4161_v44, 5 }
 0x1fd   : > { %5976 = vmatmul.msk.bf16.gmra.mxu3 %vm457_vm0, %v4324_v23  ;;  %6062 = vmatmul.msk.bf16.gmra.mxu0 %vm457_vm0, %v4822_v28  ;;  %v3141_v28 = vsel %vm6437_vm6, %v3139_v38, %v3140_v52  ;;  %v4140_v14 = vsel %vm6433_vm5, %v4135_v16, %v7464_v54  ;;  %v4150_v24 = vsel %vm6433_vm5, %v4145_v7, %v4149_v27  ;;  %v4167_v54 = vrot.slane %v4165_v39, 4  ;;  %v5950_v52 = vld [vmem:[%s6380_s24 + $0xb0] sm:$0x1]  ;;  %v6019_v7 = vld [vmem:[%s6380_s24 + $0xac] sm:$0xf] }
 0x1fe   : > { %v5074_v9 = vadd.f32 %v7409_v59, %v4974_v29  ;;  %v3228_v29 = vunpack.c.l.b16 %v3141_v28  ;;  %v4304_v12 = vunpack.c.l.b16 %v4140_v14  ;;  %v4803_v16 = vunpack.c.l.b16 %v4716_v41  ;;  %v6020_v14 = vld [vmem:[%s6380_s24 + $0xb0] sm:$0x1] }
 0x1ff   : > { %v3681_v19 = vpop.f32.mrf.mxu2  ;;  %v4158_v50 = vor.u32 %v4157_v58, %v4154_v4  ;;  %v4168_v26 = vor.u32 %v4167_v54, %v7500_v8 }
 0x200   : > { %v5138_v47 = vadd.f32 %v5106_v15, %v5074_v9  ;;  %v3755_v5 = vadd.f32 %v3681_v19, %v3400_v13  ;;  %v4403_v40 = vpop.f32.mrf.mxu3  ;;  %v4305_v15 = vunpack.c.l.b16 %v4150_v24  ;;  %v3144_v9 = vrot.slane %v5745_v2, 5 }
 0x201   : > { %v3328_v23 = vpop.f32.mrf.mxu1  ;;  %v4171_v19 = vshll.u32 %v5950_v52, 16  ;;  %v3248_v39 = vpack.c.b16 %v3228_v29, %v3227_v57  ;;  %v4159_v4 = vrot.slane %v4158_v50, 4  ;;  %v4169_v58 = vrot.slane %v4168_v26, 4 }
 0x202   : > { %v5170_v22 = vmax.f32 %v5138_v47, 0.0  ;;  %v4477_v11 = vadd.f32 %v4403_v40, %v3755_v5  ;;  %v4903_v43 = vpop.f32.mrf.mxu0  ;;  %v3401_v53 = vadd.f32 %v3328_v23, %v6902_v48  ;;  %v6123_v47 = vld [vmem:[%s6380_s24 + $0x9c] sm:$0xff]  ;;  %v5746_v5 = vld [vmem:[%s6380_s24 + $0xa4] sm:$0x1]  ;;  %v4719_v40 = vrot.slane %v6019_v7, 5 }
 0x203   : > { %v4325_v28 = vpack.c.b16 %v4305_v15, %v4304_v12  ;;  %v4823_v48 = vpack.c.b16 %v4803_v16, %v4802_v0  ;;  %v6018_v23 = vld [vmem:[%s6380_s24 + $0xa8] sm:$0xe]  ;;  %v3146_v41 = vrot.slane %v3144_v9, 4  ;;  %v3147_v2 = vrot.slane %v5746_v5, 5  ;;  %v5951_v0 = vld [vmem:[%s6380_s24 + $0xb4] sm:$0xf] }
 0x204   : > { %5202 = vst [vmem:[%s7436_s29 + $0x18] sm:$0xff] %v5170_v22  ;;  %v4975_v38 = vadd.f32 %v4901_v33, %v4477_v11  ;;  %v5744_v33 = vld [vmem:[%s6380_s24 + $0x9c] sm:$0xe]  ;;  %v4173_v54 = vrot.slane %v4171_v19, 5  ;;  %v6042_v57 = vrot.slane %v6018_v23, 9  ;;  %v4721_v29 = vrot.slane %v4719_v40, 4 }
 0x205   : > { %v5768_v25 = vrot.slane %v5744_v33, 9  ;;  %v4722_v52 = vrot.slane %v6020_v14, 5  ;;  %v5952_v16 = vld [vmem:[%s6380_s24 + $0xb8] sm:$0xf] }
 0x206   : > { %v5075_v27 = vadd.f32 %v7409_v59, %v4975_v38  ;;  %v4720_v26 = vsel %vm6437_vm6, %v6042_v57, %v4719_v40  ;;  %v5953_v57 = vld [vmem:[%s6380_s24 + $0xbc] sm:$0x1] }
 0x207   : > { %v3683_v13 = vpop.f32.mrf.mxu2  ;;  %v4804_v14 = vunpack.c.l.b16 %v4720_v26 }
 0x208   : > { %v5139_v30 = vadd.f32 %v5107_v36, %v5075_v27  ;;  %v3756_v20 = vadd.f32 %v3683_v13, %v3401_v53  ;;  %v4405_v44 = vpop.f32.mrf.mxu3  ;;  %v5108_v36 = vld [vmem:[%s7404_s14 + $0x28] sm:$0xff]  ;;  %v3148_v27 = vsel %vm6437_vm6, %v3146_v41, %v3147_v2  ;;  %v4164_v53 = vsel %vm6433_vm5, %v4159_v4, %v7500_v8 }
 0x209   : > { %v3331_v42 = vpop.f32.mrf.mxu1  ;;  %v4174_v13 = vsel %vm6433_vm5, %v4169_v58, %v4173_v54  ;;  %v4189_v8 = vshrl.u32 %v5952_v16, 16 }
 0x20a   : > { %v5171_v24 = vmax.f32 %v5139_v30, 0.0  ;;  %v4478_v22 = vadd.f32 %v4405_v44, %v3756_v20  ;;  %v4906_v11 = vpop.f32.mrf.mxu0  ;;  %v3402_v15 = vadd.f32 %v3331_v42, %v6943_v46  ;;  %v4176_v30 = vshrl.u32 %v5951_v0, 16 }
 0x20b   : > { %v4179_v20 = vshll.u32 %v5951_v0, 16  ;;  %v4185_v44 = vshll.u32 %v5952_v16, 16  ;;  %v4307_v23 = vunpack.c.l.b16 %v4174_v13  ;;  %v4191_v58 = vrot.slane %v4189_v8, 4  ;;  %v6124_v16 = vld [vmem:[%s6380_s24 + $0xa8] sm:$0xff]  ;;  %v5749_v13 = vld [vmem:[%s6380_s24 + $0xb0] sm:$0x1] }
 0x20c   : > { %5203 = vst [vmem:[%s7436_s29 + $0x20] sm:$0xff] %v5171_v24  ;;  %v4976_v38 = vadd.f32 %v4903_v43, %v4478_v22  ;;  %5789 = vmatmul.msk.bf16.gmra.mxu1 %vm457_vm0, %v3248_v39  ;;  %5907 = vmatmul.msk.bf16.gmra.mxu2 %vm457_vm0, %v6123_v47  ;;  %v3145_v43 = vsel %vm6437_vm6, %v5768_v25, %v3144_v9  ;;  %v5748_v22 = vld [vmem:[%s6380_s24 + $0xac] sm:$0xf]  ;;  %v5109_v25 = vld [vmem:[%s7404_s14 + $0x30] sm:$0xff]  ;;  %v4178_v41 = vrot.slane %v4176_v30, 4 }
 0x20d   : > { %5977 = vmatmul.msk.bf16.gmra.mxu3 %vm457_vm0, %v4325_v28  ;;  %6063 = vmatmul.msk.bf16.gmra.mxu0 %vm457_vm0, %v4823_v48  ;;  %v4723_v9 = vsel %vm6437_vm6, %v4721_v29, %v4722_v52  ;;  %v3229_v42 = vunpack.c.l.b16 %v3145_v43  ;;  %v3230_v28 = vunpack.c.l.b16 %v3148_v27  ;;  %v4306_v48 = vunpack.c.l.b16 %v4164_v53  ;;  %v6022_v52 = vld [vmem:[%s6380_s24 + $0xb8] sm:$0xf]  ;;  %v5747_v43 = vld [vmem:[%s6380_s24 + $0xa8] sm:$0xe]  ;;  %v6023_v8 = vld [vmem:[%s6380_s24 + $0xbc] sm:$0x1] }
 0x20e   : > { %v5076_v12 = vadd.f32 %v7409_v59, %v4976_v38  ;;  %v4805_v24 = vunpack.c.l.b16 %v4723_v9  ;;  %v4181_v2 = vrot.slane %v4179_v20, 5  ;;  %v7540_v4 = vrot.slane %v4185_v44, 5 }
 0x20f   : > { %v3686_v7 = vpop.f32.mrf.mxu2  ;;  %v3249_v0 = vpack.c.b16 %v3230_v28, %v3229_v42  ;;  %v4726_v30 = vrot.slane %v6022_v52, 5  ;;  %v5769_v20 = vrot.slane %v5747_v43, 9  ;;  %v5954_v42 = vld [vmem:[%s6380_s24 + $0xc0] sm:$0xf]  ;;  %v5955_v28 = vld [vmem:[%s6380_s24 + $0xc4] sm:$0xf] }
 0x210   : > { %v5140_v33 = vadd.f32 %v5108_v36, %v5076_v12  ;;  %v3757_v50 = vadd.f32 %v3686_v7, %v3402_v15  ;;  %v4408_v46 = vpop.f32.mrf.mxu3  ;;  %v4326_v7 = vpack.c.b16 %v4307_v23, %v4306_v48  ;;  %v4824_v53 = vpack.c.b16 %v4805_v24, %v4804_v14  ;;  %v5110_v48 = vld [vmem:[%s7404_s14 + $0x38] sm:$0xff] }
 0x211   : > { %v3333_v19 = vpop.f32.mrf.mxu1 }
 0x212   : > { %v5172_v39 = vmax.f32 %v5140_v33, 0.0  ;;  %v4479_v47 = vadd.f32 %v4408_v46, %v3757_v50  ;;  %v4908_v5 = vpop.f32.mrf.mxu0  ;;  %v3403_v38 = vadd.f32 %v3333_v19, %v6945_v3  ;;  %v4182_v33 = vor.u32 %v4181_v2, %v4178_v41  ;;  %v6021_v19 = vld [vmem:[%s6380_s24 + $0xb4] sm:$0xe] }
 0x213   : > { %v4192_v3 = vor.u32 %v4191_v58, %v7540_v4  ;;  %v4195_v50 = vshll.u32 %v5953_v57, 16  ;;  %v6043_v24 = vrot.slane %v6021_v19, 9  ;;  %v4729_v41 = vrot.slane %v6023_v8, 5 }
 0x214   : > { %5204 = vst [vmem:[%s7436_s29 + $0x28] sm:$0xff] %v5172_v39  ;;  %v4977_v40 = vadd.f32 %v4906_v11, %v4479_v47  ;;  %v3151_v11 = vrot.slane %v5748_v22, 5  ;;  %v3154_v47 = vrot.slane %v5749_v13, 5  ;;  %v4200_v58 = vshrl.u32 %v5954_v42, 16  ;;  %v5751_v13 = vld [vmem:[%s6380_s24 + $0xb8] sm:$0xf] }
 0x215   : > { %v4193_v23 = vrot.slane %v4192_v3, 4  ;;  %v4197_v14 = vrot.slane %v4195_v50, 5  ;;  %v4213_v57 = vshrl.u32 %v5955_v28, 16 }
 0x216   : > { %v5077_v54 = vadd.f32 %v7409_v59, %v4977_v40  ;;  %v3153_v44 = vrot.slane %v3151_v11, 4  ;;  %v4183_v40 = vrot.slane %v4182_v33, 4  ;;  %v4202_v33 = vrot.slane %v4200_v58, 4  ;;  %v6125_v58 = vld [vmem:[%s6380_s24 + $0xb4] sm:$0xff] }
 0x217   : > { %v3688_v29 = vpop.f32.mrf.mxu2 }
 0x218   : > { %v5141_v36 = vadd.f32 %v5109_v25, %v5077_v54  ;;  %v3758_v12 = vadd.f32 %v3688_v29, %v3403_v38  ;;  %v4410_v15 = vpop.f32.mrf.mxu3  ;;  %v4728_v25 = vrot.slane %v4726_v30, 4  ;;  %v4203_v54 = vshll.u32 %v5954_v42, 16  ;;  %v6025_v42 = vld [vmem:[%s6380_s24 + $0xc4] sm:$0xf] }
 0x219   : > { %v3336_v27 = vpop.f32.mrf.mxu1  ;;  %v4209_v38 = vshll.u32 %v5955_v28, 16 }
 0x21a   : > { %v5173_v46 = vmax.f32 %v5141_v36, 0.0  ;;  %v4480_v26 = vadd.f32 %v4410_v15, %v3758_v12  ;;  %v4911_v9 = vpop.f32.mrf.mxu0  ;;  %v3152_v15 = vsel %vm6437_vm6, %v5769_v20, %v3151_v11  ;;  %v4730_v11 = vsel %vm6437_vm6, %v4728_v25, %v4729_v41  ;;  %v5956_v20 = vld [vmem:[%s6380_s24 + $0xc8] sm:$0x1] }
 0x21b   : > { %v4205_v3 = vrot.slane %v4203_v54, 5  ;;  %v7576_v50 = vrot.slane %v4209_v38, 5  ;;  %v5752_v54 = vld [vmem:[%s6380_s24 + $0xbc] sm:$0x1]  ;;  %v4733_v38 = vrot.slane %v6025_v42, 5 }
 0x21c   : > { %5205 = vst [vmem:[%s7436_s29 + $0x30] sm:$0xff] %v5173_v46  ;;  %v4978_v39 = vadd.f32 %v4908_v5, %v4480_v26  ;;  %5790 = vmatmul.msk.bf16.gmra.mxu1 %vm457_vm0, %v3249_v0  ;;  %5908 = vmatmul.msk.bf16.gmra.mxu2 %vm457_vm0, %v6124_v16  ;;  %v3404_v5 = vadd.f32 %v3336_v27, %v6982_v37  ;;  %v3231_v26 = vunpack.c.l.b16 %v3152_v15 }
 0x21d   : > { %5978 = vmatmul.msk.bf16.gmra.mxu3 %vm457_vm0, %v4326_v7  ;;  %6064 = vmatmul.msk.bf16.gmra.mxu0 %vm457_vm0, %v4824_v53  ;;  %v3155_v0 = vsel %vm6437_vm6, %v3153_v44, %v3154_v47  ;;  %v4188_v37 = vsel %vm6433_vm5, %v4183_v40, %v7540_v4  ;;  %v4198_v16 = vsel %vm6433_vm5, %v4193_v23, %v4197_v14  ;;  %v4215_v4 = vrot.slane %v4213_v57, 4  ;;  %v5111_v44 = vld [vmem:[%s7404_s14 + $0x40] sm:$0xff] }
 0x21e   : > { %v5078_v22 = vadd.f32 %v7409_v59, %v4978_v39  ;;  %v4727_v53 = vsel %vm6437_vm6, %v6043_v24, %v4726_v30  ;;  %v3232_v19 = vunpack.c.l.b16 %v3155_v0  ;;  %v4308_v8 = vunpack.c.l.b16 %v4188_v37 }
 0x21f   : > { %v3691_v2 = vpop.f32.mrf.mxu2  ;;  %v4309_v39 = vunpack.c.l.b16 %v4198_v16  ;;  %v4806_v30 = vunpack.c.l.b16 %v4727_v53  ;;  %v4807_v47 = vunpack.c.l.b16 %v4730_v11  ;;  %v3158_v40 = vrot.slane %v5751_v13, 5 }
 0x220   : > { %v5142_v29 = vadd.f32 %v5110_v48, %v5078_v22  ;;  %v3759_v52 = vadd.f32 %v3691_v2, %v3404_v5  ;;  %v4413_v36 = vpop.f32.mrf.mxu3  ;;  %v4206_v14 = vor.u32 %v4205_v3, %v4202_v33  ;;  %v4216_v24 = vor.u32 %v4215_v4, %v7576_v50 }
 0x221   : > { %v3338_v12 = vpop.f32.mrf.mxu1  ;;  %v4219_v22 = vshll.u32 %v5956_v20, 16  ;;  %v3250_v2 = vpack.c.b16 %v3232_v19, %v3231_v26  ;;  %v3160_v16 = vrot.slane %v3158_v40, 4  ;;  %v4735_v3 = vrot.slane %v4733_v38, 4  ;;  %v5957_v20 = vld [vmem:[%s6380_s24 + $0xcc] sm:$0xf] }
 0x222   : > { %v5174_v7 = vmax.f32 %v5142_v29, 0.0  ;;  %v4481_v43 = vadd.f32 %v4413_v36, %v3759_v52  ;;  %v4913_v27 = vpop.f32.mrf.mxu0  ;;  %v3405_v48 = vadd.f32 %v3338_v12, %v6984_v18  ;;  %v4327_v29 = vpack.c.b16 %v4309_v39, %v4308_v8  ;;  %v6024_v52 = vld [vmem:[%s6380_s24 + $0xc0] sm:$0xe]  ;;  %v6026_v36 = vld [vmem:[%s6380_s24 + $0xc8] sm:$0x1] }
 0x223   : > { %v4825_v18 = vpack.c.b16 %v4807_v47, %v4806_v30  ;;  %v4217_v53 = vrot.slane %v4216_v24, 4  ;;  %v4221_v11 = vrot.slane %v4219_v22, 5  ;;  %v6044_v33 = vrot.slane %v6024_v52, 9  ;;  %v5754_v52 = vld [vmem:[%s6380_s24 + $0xc4] sm:$0xf] }
 0x224   : > { %5206 = vst [vmem:[%s7436_s29 + $0x38] sm:$0xff] %v5174_v7  ;;  %v4979_v46 = vadd.f32 %v4911_v9, %v4481_v43  ;;  %v5750_v9 = vld [vmem:[%s6380_s24 + $0xb4] sm:$0xe]  ;;  %v3161_v7 = vrot.slane %v5752_v54, 5  ;;  %v4207_v43 = vrot.slane %v4206_v14, 4  ;;  %v4736_v4 = vrot.slane %v6026_v36, 5 }
 0x225   : > { %v5770_v37 = vrot.slane %v5750_v9, 9  ;;  %v4222_v47 = vsel %vm6433_vm5, %v4217_v53, %v4221_v11  ;;  %v4224_v9 = vshrl.u32 %v5957_v20, 16  ;;  %v4227_v14 = vshll.u32 %v5957_v20, 16  ;;  %v6028_v11 = vld [vmem:[%s6380_s24 + $0xd0] sm:$0xf] }
 0x226   : > { %v5079_v28 = vadd.f32 %v7409_v59, %v4979_v46  ;;  %v5112_v46 = vld [vmem:[%s7404_s14 + $0x48] sm:$0xff]  ;;  %v3162_v39 = vsel %vm6437_vm6, %v3160_v16, %v3161_v7  ;;  %v4212_v30 = vsel %vm6433_vm5, %v4207_v43, %v7576_v50  ;;  %v5959_v43 = vld [vmem:[%s6380_s24 + $0xd4] sm:$0x1] }
 0x227   : > { %v3693_v23 = vpop.f32.mrf.mxu2  ;;  %v4226_v36 = vrot.slane %v4224_v9, 4 }
 0x228   : > { %v5143_v5 = vadd.f32 %v5111_v44, %v5079_v28  ;;  %v3760_v25 = vadd.f32 %v3693_v23, %v3405_v48  ;;  %v4415_v41 = vpop.f32.mrf.mxu3  ;;  %v5958_v44 = vld [vmem:[%s6380_s24 + $0xd0] sm:$0xf]  ;;  %v4734_v48 = vsel %vm6437_vm6, %v6044_v33, %v4733_v38 }
 0x229   : > { %v3341_v57 = vpop.f32.mrf.mxu1  ;;  %v4233_v24 = vshll.u32 %v5958_v44, 16  ;;  %v4237_v50 = vshrl.u32 %v5958_v44, 16  ;;  %v5113_v38 = vld [vmem:[%s7404_s14 + $0x50] sm:$0xff]  ;;  %v5753_v44 = vld [vmem:[%s6380_s24 + $0xc0] sm:$0xe] }
 0x22a   : > { %v5175_v12 = vmax.f32 %v5143_v5, 0.0  ;;  %v4482_v15 = vadd.f32 %v4415_v41, %v3760_v25  ;;  %v4916_v0 = vpop.f32.mrf.mxu0  ;;  %v3406_v19 = vadd.f32 %v3341_v57, %v7011_v32  ;;  %v4311_v57 = vunpack.c.l.b16 %v4222_v47 }
 0x22c   : > { %5207 = vst [vmem:[%s7436_s29 + $0x40] sm:$0xff] %v5175_v12  ;;  %v4980_v13 = vadd.f32 %v4913_v27, %v4482_v15  ;;  %5791 = vmatmul.msk.bf16.gmra.mxu1 %vm457_vm0, %v3250_v2  ;;  %5909 = vmatmul.msk.bf16.gmra.mxu2 %vm457_vm0, %v6125_v58  ;;  %v3159_v27 = vsel %vm6437_vm6, %v5770_v37, %v3158_v40  ;;  %v3234_v2 = vunpack.c.l.b16 %v3162_v39  ;;  %v4310_v58 = vunpack.c.l.b16 %v4212_v30 }
 0x22d   : > { %5979 = vmatmul.msk.bf16.gmra.mxu3 %vm457_vm0, %v4327_v29  ;;  %6065 = vmatmul.msk.bf16.gmra.mxu0 %vm457_vm0, %v4825_v18  ;;  %v4737_v40 = vsel %vm6437_vm6, %v4735_v3, %v4736_v4  ;;  %v3233_v41 = vunpack.c.l.b16 %v3159_v27  ;;  %v4808_v29 = vunpack.c.l.b16 %v4734_v48  ;;  %v4229_v12 = vrot.slane %v4227_v14, 5  ;;  %v6126_v4 = vld [vmem:[%s6380_s24 + $0xc0] sm:$0xff]  ;;  %v6029_v48 = vld [vmem:[%s6380_s24 + $0xd4] sm:$0x1] }
 0x22e   : > { %v5080_v26 = vadd.f32 %v7409_v59, %v4980_v13  ;;  %v4809_v18 = vunpack.c.l.b16 %v4737_v40  ;;  %v7616_v15 = vrot.slane %v4233_v24, 5  ;;  %v4239_v37 = vrot.slane %v4237_v50, 4  ;;  %v5114_v24 = vld [vmem:[%s7404_s14 + $0x58] sm:$0xff] }
 0x22f   : > { %v3696_v8 = vpop.f32.mrf.mxu2  ;;  %v4230_v27 = vor.u32 %v4229_v12, %v4226_v36  ;;  %v4243_v39 = vshll.u32 %v5959_v43, 16 }
 0x230   : > { %v5144_v42 = vadd.f32 %v5112_v46, %v5080_v26  ;;  %v3761_v28 = vadd.f32 %v3696_v8, %v3406_v19  ;;  %v4418_v32 = vpop.f32.mrf.mxu3  ;;  %v4328_v46 = vpack.c.b16 %v4311_v57, %v4310_v58  ;;  %v3165_v26 = vrot.slane %v5754_v52, 5  ;;  %v5755_v8 = vld [vmem:[%s6380_s24 + $0xc8] sm:$0x1] }
 0x231   : > { %v3343_v23 = vpop.f32.mrf.mxu1  ;;  %v4826_v20 = vpack.c.b16 %v4809_v18, %v4808_v29  ;;  %v3168_v14 = vrot.slane %v5755_v8, 5  ;;  %v4231_v50 = vrot.slane %v4230_v27, 4 }
 0x232   : > { %v5176_v22 = vmax.f32 %v5144_v42, 0.0  ;;  %v4483_v5 = vadd.f32 %v4418_v32, %v3761_v28  ;;  %v4918_v25 = vpop.f32.mrf.mxu0  ;;  %v3407_v7 = vadd.f32 %v3343_v23, %v7026_v35  ;;  %v4240_v35 = vor.u32 %v4239_v37, %v7616_v15  ;;  %v6027_v28 = vld [vmem:[%s6380_s24 + $0xcc] sm:$0xe] }
 0x233   : > { %v4740_v32 = vrot.slane %v6028_v11, 5  ;;  %v5771_v23 = vrot.slane %v5753_v44, 9  ;;  %v3167_v9 = vrot.slane %v3165_v26, 4  ;;  %v4236_v37 = vsel %vm6433_vm5, %v4231_v50, %v7616_v15 }
 0x234   : > { %5208 = vst [vmem:[%s7436_s29 + $0x48] sm:$0xff] %v5176_v22  ;;  %v4981_v54 = vadd.f32 %v4916_v0, %v4483_v5  ;;  %v3251_v0 = vpack.c.b16 %v3234_v2, %v3233_v41  ;;  %v4241_v22 = vrot.slane %v4240_v35, 4  ;;  %v4245_v5 = vrot.slane %v4243_v39, 5  ;;  %v6127_v35 = vld [vmem:[%s6380_s24 + $0xcc] sm:$0xff] }
 0x235   : > { %v6045_v41 = vrot.slane %v6027_v28, 9  ;;  %v4742_v58 = vrot.slane %v4740_v32, 4  ;;  %v3166_v36 = vsel %vm6437_vm6, %v5771_v23, %v3165_v26  ;;  %v3169_v12 = vsel %vm6437_vm6, %v3167_v9, %v3168_v14 }
 0x236   : > { %v5081_v16 = vadd.f32 %v7409_v59, %v4981_v54  ;;  %v4743_v54 = vrot.slane %v6029_v48, 5 }
 0x237   : > { %v3698_v53 = vpop.f32.mrf.mxu2 }
 0x238   : > { %v5145_v13 = vadd.f32 %v5113_v38, %v5081_v16  ;;  %v3762_v33 = vadd.f32 %v3698_v53, %v3407_v7  ;;  %v4420_v3 = vpop.f32.mrf.mxu3  ;;  %v4741_v53 = vsel %vm6437_vm6, %v6045_v41, %v4740_v32 }
 0x239   : > { %v3346_v19 = vpop.f32.mrf.mxu1 }
 0x23a   : > { %v5177_v30 = vmax.f32 %v5145_v13, 0.0  ;;  %v4484_v47 = vadd.f32 %v4420_v3, %v3762_v33  ;;  %v4921_v42 = vpop.f32.mrf.mxu0  ;;  %v3235_v13 = vunpack.c.l.b16 %v3166_v36  ;;  %v3236_v33 = vunpack.c.l.b16 %v3169_v12  ;;  %v5115_v3 = vld [vmem:[%s7404_s14 + $0x60] sm:$0xff] }
 0x23c   : > { %5209 = vst [vmem:[%s7436_s29 + $0x50] sm:$0xff] %v5177_v30  ;;  %v4982_v40 = vadd.f32 %v4918_v25, %v4484_v47  ;;  %5792 = vmatmul.msk.bf16.gmra.mxu1 %vm457_vm0, %v3251_v0  ;;  %5910 = vmatmul.msk.bf16.gmra.mxu2 %vm457_vm0, %v6126_v4  ;;  %v3408_v25 = vadd.f32 %v3346_v19, %v7049_v6  ;;  %v4312_v4 = vunpack.c.l.b16 %v4236_v37 }
 0x23d   : > { %5980 = vmatmul.msk.bf16.gmra.mxu3 %vm457_vm0, %v4328_v46  ;;  %6066 = vmatmul.msk.bf16.gmra.mxu0 %vm457_vm0, %v4826_v20  ;;  %v4246_v6 = vsel %vm6433_vm5, %v4241_v22, %v4245_v5  ;;  %v4744_v0 = vsel %vm6437_vm6, %v4742_v58, %v4743_v54  ;;  %v4810_v46 = vunpack.c.l.b16 %v4741_v53  ;;  %v3252_v27 = vpack.c.b16 %v3236_v33, %v3235_v13  ;;  %v5117_v58 = vld [vmem:[%s7404_s14 + $0x70] sm:$0xff] }
 0x23e   : > { %v5082_v2 = vadd.f32 %v7409_v59, %v4982_v40  ;;  %v4313_v15 = vunpack.c.l.b16 %v4246_v6  ;;  %v4811_v55 = vunpack.c.l.b16 %v4744_v0 }
 0x23f   : > { %v3701_v38 = vpop.f32.mrf.mxu2 }
 0x240   : > { %v5146_v57 = vadd.f32 %v5114_v24, %v5082_v2  ;;  %v3763_v29 = vadd.f32 %v3701_v38, %v3408_v25  ;;  %v4423_v18 = vpop.f32.mrf.mxu3  ;;  %v4329_v30 = vpack.c.b16 %v4313_v15, %v4312_v4  ;;  %v4827_v47 = vpack.c.b16 %v4811_v55, %v4810_v46  ;;  %v5119_v46 = vld [vmem:[%s7404_s14 + $0x80] sm:$0xff] }
 0x241   : > { %v3348_v52 = vpop.f32.mrf.mxu1 }
 0x242   : > { %v5178_v16 = vmax.f32 %v5146_v57, 0.0  ;;  %v4485_v7 = vadd.f32 %v4423_v18, %v3763_v29  ;;  %v4923_v43 = vpop.f32.mrf.mxu0  ;;  %v3409_v19 = vadd.f32 %v3348_v52, %v7061_v62  ;;  %v5116_v62 = vld [vmem:[%s7404_s14 + $0x68] sm:$0xff] }
 0x244   : > { %5210 = vst [vmem:[%s7436_s29 + $0x58] sm:$0xff] %v5178_v16  ;;  %v4983_v11 = vadd.f32 %v4921_v42, %v4485_v7  ;;  %v5118_v16 = vld [vmem:[%s7404_s14 + $0x78] sm:$0xff]  ;;  %v7671_v7 = vld [vmem:[%s7780_s2] ss:$0 sm:$0xff] }
 0x246   : > { %v5083_v26 = vadd.f32 %v7409_v59, %v4983_v11 }
 0x247   : > { %v3703_v20 = vpop.f32.mrf.mxu2 }
 0x248   : > { %v5147_v44 = vadd.f32 %v5115_v3, %v5083_v26  ;;  %v3764_v60 = vadd.f32 %v3703_v20, %v3409_v19  ;;  %v4425_v8 = vpop.f32.mrf.mxu3 }
 0x249   : > { %v3351_v39 = vpop.f32.mrf.mxu1 }
 0x24a   : > { %v5179_v42 = vmax.f32 %v5147_v44, 0.0  ;;  %v4486_v28 = vadd.f32 %v4425_v8, %v3764_v60  ;;  %v4926_v32 = vpop.f32.mrf.mxu0  ;;  %v3410_v23 = vadd.f32 %v3351_v39, %v7081_v31 }
 0x24c   : > { %5211 = vst [vmem:[%s7436_s29 + $0x60] sm:$0xff] %v5179_v42  ;;  %v4984_v48 = vadd.f32 %v4923_v43, %v4486_v28  ;;  %5793 = vmatmul.msk.bf16.gmra.mxu1 %vm457_vm0, %v3252_v27  ;;  %5911 = vmatmul.msk.bf16.gmra.mxu2 %vm457_vm0, %v6127_v35 }
 0x24d   : > { %5981 = vmatmul.msk.bf16.gmra.mxu3 %vm457_vm0, %v4329_v30  ;;  %6067 = vmatmul.msk.bf16.gmra.mxu0 %vm457_vm0, %v4827_v47  ;;  %v5120_v30 = vld [vmem:[%s7404_s14 + $0x88] sm:$0xff] }
 0x24e   : > { %v5084_v40 = vadd.f32 %v7409_v59, %v4984_v48 }
 0x24f   : > { %v3706_v9 = vpop.f32.mrf.mxu2 }
 0x250   : > { %v5148_v14 = vadd.f32 %v5116_v62, %v5084_v40  ;;  %v3765_v24 = vadd.f32 %v3706_v9, %v3410_v23  ;;  %v4428_v50 = vpop.f32.mrf.mxu3 }
 0x251   : > { %v3353_v22 = vpop.f32.mrf.mxu1 }
 0x252   : > { %v5180_v5 = vmax.f32 %v5148_v14, 0.0  ;;  %v4487_v41 = vadd.f32 %v4428_v50, %v3765_v24  ;;  %v4928_v2 = vpop.f32.mrf.mxu0  ;;  %v3411_v38 = vadd.f32 %v3353_v22, %v7099_v10  ;;  %v5121_v24 = vld [vmem:[%s7404_s14 + $0x90] sm:$0xff] }
 0x254   : > { %5212 = vst [vmem:[%s7436_s29 + $0x68] sm:$0xff] %v5180_v5  ;;  %v4985_v25 = vadd.f32 %v4926_v32, %v4487_v41 }
 0x256   : > { %v5085_v54 = vadd.f32 %v7409_v59, %v4985_v25 }
 0x257   : > { %v3708_v57 = vpop.f32.mrf.mxu2 }
 0x258   : > { %v5149_v29 = vadd.f32 %v5117_v58, %v5085_v54  ;;  %v3766_v31 = vadd.f32 %v3708_v57, %v3411_v38  ;;  %v4430_v18 = vpop.f32.mrf.mxu3 }
 0x259   : > { %v3356_v52 = vpop.f32.mrf.mxu1 }
 0x25a   : > { %v5181_v36 = vmax.f32 %v5149_v29, 0.0  ;;  %v4488_v12 = vadd.f32 %v4430_v18, %v3766_v31  ;;  %v4931_v37 = vpop.f32.mrf.mxu0  ;;  %v3412_v59 = vadd.f32 %v3356_v52, %v7121_v21  ;;  %v5122_v29 = vld [vmem:[%s7404_s14 + $0x98] sm:$0xff] }
 0x25c   : > { %5213 = vst [vmem:[%s7436_s29 + $0x70] sm:$0xff] %v5181_v36  ;;  %v4986_v6 = vadd.f32 %v4928_v2, %v4488_v12 }
 0x25e   : > { %v5086_v10 = vadd.f32 %v7671_v7, %v4986_v6 }
 0x25f   : > { %v3711_v43 = vpop.f32.mrf.mxu2 }
 0x260   : > { %v5150_v53 = vadd.f32 %v5118_v16, %v5086_v10  ;;  %v3767_v0 = vadd.f32 %v3711_v43, %v3412_v59  ;;  %v4433_v11 = vpop.f32.mrf.mxu3  ;;  %v5123_v43 = vld [vmem:[%s7404_s14 + $0xa0] sm:$0xff] }
 0x261   : > { %v3358_v13 = vpop.f32.mrf.mxu1 }
 0x262   : > { %v5182_v33 = vmax.f32 %v5150_v53, 0.0  ;;  %v4489_v3 = vadd.f32 %v4433_v11, %v3767_v0  ;;  %v4933_v4 = vpop.f32.mrf.mxu0  ;;  %v3413_v26 = vadd.f32 %v3358_v13, %v7133_v34 }
 0x264   : > { %5214 = vst [vmem:[%s7436_s29 + $0x78] sm:$0xff] %v5182_v33  ;;  %v4987_v15 = vadd.f32 %v4931_v37, %v4489_v3 }
 0x266   : > { %v5087_v55 = vadd.f32 %v7671_v7, %v4987_v15 }
 0x267   : > { %v3713_v19 = vpop.f32.mrf.mxu2 }
 0x268   : > { %v5151_v20 = vadd.f32 %v5119_v46, %v5087_v55  ;;  %v3768_v21 = vadd.f32 %v3713_v19, %v3413_v26  ;;  %v4435_v44 = vpop.f32.mrf.mxu3  ;;  %v5124_v26 = vld [vmem:[%s7404_s14 + $0xa8] sm:$0xff] }
 0x269   : > { %v3361_v60 = vpop.f32.mrf.mxu1 }
 0x26a   : > { %v5183_v8 = vmax.f32 %v5151_v20, 0.0  ;;  %v4490_v27 = vadd.f32 %v4435_v44, %v3768_v21  ;;  %v4936_v35 = vpop.f32.mrf.mxu0  ;;  %v3414_v42 = vadd.f32 %v3361_v60, %v7153_v45 }
 0x26c   : > { %5215 = vst [vmem:[%s7436_s29 + $0x80] sm:$0xff] %v5183_v8  ;;  %v4988_v39 = vadd.f32 %v4933_v4, %v4490_v27 }
 0x26e   : > { %v5088_v47 = vadd.f32 %v7671_v7, %v4988_v39 }
 0x26f   : > { %v3716_v28 = vpop.f32.mrf.mxu2 }
 0x270   : > { %v5152_v32 = vadd.f32 %v5120_v30, %v5088_v47  ;;  %v3769_v34 = vadd.f32 %v3716_v28, %v3414_v42  ;;  %v4438_v48 = vpop.f32.mrf.mxu3  ;;  %v5125_v47 = vld [vmem:[%s7404_s14 + $0xb0] sm:$0xff] }
 0x271   : > { %v3363_v62 = vpop.f32.mrf.mxu1 }
 0x272   : > { %v5184_v40 = vmax.f32 %v5152_v32, 0.0  ;;  %v4491_v23 = vadd.f32 %v4438_v48, %v3769_v34  ;;  %v4938_v9 = vpop.f32.mrf.mxu0  ;;  %v3415_v22 = vadd.f32 %v3363_v62, %v7171_v1 }
 0x274   : > { %5216 = vst [vmem:[%s7436_s29 + $0x88] sm:$0xff] %v5184_v40  ;;  %v4989_v14 = vadd.f32 %v4936_v35, %v4491_v23 }
 0x276   : > { %v5089_v50 = vadd.f32 %v7671_v7, %v4989_v14 }
 0x277   : > { %v3718_v5 = vpop.f32.mrf.mxu2 }
 0x278   : > { %v5153_v41 = vadd.f32 %v5121_v24, %v5089_v50  ;;  %v3770_v45 = vadd.f32 %v3718_v5, %v3415_v22  ;;  %v4440_v2 = vpop.f32.mrf.mxu3  ;;  %v5126_v24 = vld [vmem:[%s7404_s14 + $0xb8] sm:$0xff] }
 0x279   : > { %v3366_v25 = vpop.f32.mrf.mxu1 }
 0x27a   : > { %v5185_v58 = vmax.f32 %v5153_v41, 0.0  ;;  %v4492_v54 = vadd.f32 %v4440_v2, %v3770_v45  ;;  %v4941_v38 = vpop.f32.mrf.mxu0  ;;  %v3416_v18 = vadd.f32 %v3366_v25, %v7193_v51 }
 0x27c   : > { %5217 = vst [vmem:[%s7436_s29 + $0x90] sm:$0xff] %v5185_v58  ;;  %v4990_v57 = vadd.f32 %v4938_v9, %v4492_v54 }
 0x27e   : > { %v5090_v31 = vadd.f32 %v7671_v7, %v4990_v57  ;;  %v5127_v57 = vld [vmem:[%s7404_s14 + $0xc0] sm:$0xff] }
 0x27f   : > { %v3721_v52 = vpop.f32.mrf.mxu2 }
 0x280   : > { %v5154_v36 = vadd.f32 %v5122_v29, %v5090_v31  ;;  %v3771_v1 = vadd.f32 %v3721_v52, %v3416_v18  ;;  %v4443_v12 = vpop.f32.mrf.mxu3 }
 0x281   : > { %v3368_v37 = vpop.f32.mrf.mxu1 }
 0x282   : > { %v5186_v6 = vmax.f32 %v5154_v36, 0.0  ;;  %v4493_v16 = vadd.f32 %v4443_v12, %v3771_v1  ;;  %v4943_v10 = vpop.f32.mrf.mxu0  ;;  %v3417_v0 = vadd.f32 %v3368_v37, %v7205_v17 }
 0x284   : > { %5218 = vst [vmem:[%s7436_s29 + $0x98] sm:$0xff] %v5186_v6  ;;  %v4991_v59 = vadd.f32 %v4941_v38, %v4493_v16 }
 0x286   : > { %v5091_v53 = vadd.f32 %v7671_v7, %v4991_v59 }
 0x287   : > { %v3723_v11 = vpop.f32.mrf.mxu2 }
 0x288   : > { %v5155_v13 = vadd.f32 %v5123_v43, %v5091_v53  ;;  %v3772_v51 = vadd.f32 %v3723_v11, %v3417_v0  ;;  %v4445_v33 = vpop.f32.mrf.mxu3  ;;  %v7809_v43 = vld [vmem:[#allocation6_spill] sm:$0xff] }
 0x289   : > { %v3371_v3 = vpop.f32.mrf.mxu1 }
 0x28a   : > { %v5187_v4 = vmax.f32 %v5155_v13, 0.0  ;;  %v4494_v15 = vadd.f32 %v4445_v33, %v3772_v51  ;;  %v4946_v46 = vpop.f32.mrf.mxu0  ;;  %v3418_v20 = vadd.f32 %v3371_v3, %v7225_v49 }
 0x28c   : > { %5219 = vst [vmem:[%s7436_s29 + $0xa0] sm:$0xff] %v5187_v4  ;;  %v4992_v55 = vadd.f32 %v4943_v10, %v4494_v15  ;;  %v5128_v10 = vld [vmem:[%s7404_s14 + $0xc8] sm:$0xff] }
 0x28e   : > { %v5092_v19 = vadd.f32 %v7671_v7, %v4992_v55 }
 0x28f   : > { %v3726_v21 = vpop.f32.mrf.mxu2 }
 0x290   : > { %v5156_v44 = vadd.f32 %v5124_v26, %v5092_v19  ;;  %v3773_v17 = vadd.f32 %v3726_v21, %v3418_v20  ;;  %v4448_v60 = vpop.f32.mrf.mxu3  ;;  %v7810_v26 = vld [vmem:[#allocation7_spill] sm:$0xff] }
 0x291   : > { %v3373_v8 = vpop.f32.mrf.mxu1 }
 0x292   : > { %v5188_v27 = vmax.f32 %v5156_v44, 0.0  ;;  %v4495_v35 = vadd.f32 %v4448_v60, %v3773_v17  ;;  %v4948_v39 = vpop.f32.mrf.mxu0  ;;  %v3419_v28 = vadd.f32 %v3373_v8, %v7243_v63 }
 0x294   : > { %5220 = vst [vmem:[%s7436_s29 + $0xa8] sm:$0xff] %v5188_v27  ;;  %v4993_v30 = vadd.f32 %v4946_v46, %v4495_v35  ;;  %v5129_v46 = vld [vmem:[%s7404_s14 + $0xd0] sm:$0xff] }
 0x296   : > { %v5093_v42 = vadd.f32 %v7671_v7, %v4993_v30 }
 0x297   : > { %v3728_v32 = vpop.f32.mrf.mxu2 }
 0x298   : > { %v5157_v34 = vadd.f32 %v5125_v47, %v5093_v42  ;;  %v3774_v49 = vadd.f32 %v3728_v32, %v3419_v28  ;;  %v4450_v48 = vpop.f32.mrf.mxu3  ;;  %v7811_v42 = vld [vmem:[#allocation8_spill] sm:$0xff] }
 0x299   : > { %v3376_v62 = vpop.f32.mrf.mxu1 }
 0x29a   : > { %v5189_v40 = vmax.f32 %v5157_v34, 0.0  ;;  %v4496_v23 = vadd.f32 %v4450_v48, %v3774_v49  ;;  %v4951_v9 = vpop.f32.mrf.mxu0  ;;  %v3420_v22 = vadd.f32 %v3376_v62, %v7265_v61 }
 0x29c   : > { %5221 = vst [vmem:[%s7436_s29 + $0xb0] sm:$0xff] %v5189_v40  ;;  %v4994_v14 = vadd.f32 %v4948_v39, %v4496_v23  ;;  %v5130_v39 = vld [vmem:[%s7404_s14 + $0xd8] sm:$0xff] }
 0x29e   : > { %v5094_v50 = vadd.f32 %v7671_v7, %v4994_v14  ;;  %v5131_v14 = vld [vmem:[%s7404_s14 + $0xe0] sm:$0xff] }
 0x29f   : > { %v3731_v5 = vpop.f32.mrf.mxu2 }
 0x2a0   : > { %v5158_v41 = vadd.f32 %v5126_v24, %v5094_v50  ;;  %v3775_v63 = vadd.f32 %v3731_v5, %v3420_v22  ;;  %v4453_v45 = vpop.f32.mrf.mxu3  ;;  %v7812_v50 = vld [vmem:[#allocation9_spill] sm:$0xff] }
 0x2a1   : > { %v3378_v2 = vpop.f32.mrf.mxu1 }
 0x2a2   : > { %v5190_v25 = vmax.f32 %v5158_v41, 0.0  ;;  %v4497_v58 = vadd.f32 %v4453_v45, %v3775_v63  ;;  %v4953_v54 = vpop.f32.mrf.mxu0  ;;  %v3421_v31 = vadd.f32 %v3378_v2, %v7277_v56 }
 0x2a4   : > { %5222 = vst [vmem:[%s7436_s29 + $0xb8] sm:$0xff] %v5190_v25  ;;  %v4995_v38 = vadd.f32 %v4951_v9, %v4497_v58 }
 0x2a6   : > { %v5095_v29 = vadd.f32 %v7671_v7, %v4995_v38 }
 0x2a7   : > { %v3733_v18 = vpop.f32.mrf.mxu2 }
 0x2a8   : > { %v5159_v52 = vadd.f32 %v5127_v57, %v5095_v29  ;;  %v3776_v61 = vadd.f32 %v3733_v18, %v3421_v31  ;;  %v4455_v36 = vpop.f32.mrf.mxu3  ;;  %v5132_v57 = vld [vmem:[%s7404_s14 + $0xe8] sm:$0xff]  ;;  %v7813_v31 = vld [vmem:[#allocation10_spill] sm:$0xff] }
 0x2a9   : > { %v3381_v1 = vpop.f32.mrf.mxu1 }
 0x2aa   : > { %v5191_v12 = vmax.f32 %v5159_v52, 0.0  ;;  %v4498_v37 = vadd.f32 %v4455_v36, %v3776_v61  ;;  %v4956_v6 = vpop.f32.mrf.mxu0  ;;  %v3422_v53 = vadd.f32 %v3381_v1, %v7809_v43 }
 0x2ac   : > { %5223 = vst [vmem:[%s7436_s29 + $0xc0] sm:$0xff] %v5191_v12  ;;  %v4996_v16 = vadd.f32 %v4953_v54, %v4498_v37 }
 0x2ae   : > { %v5096_v59 = vadd.f32 %v7671_v7, %v4996_v16 }
 0x2af   : > { %v3736_v0 = vpop.f32.mrf.mxu2 }
 0x2b0   : > { %v5160_v11 = vadd.f32 %v5128_v10, %v5096_v59  ;;  %v3777_v56 = vadd.f32 %v3736_v0, %v3422_v53  ;;  %v4458_v13 = vpop.f32.mrf.mxu3  ;;  %v5133_v59 = vld [vmem:[%s7404_s14 + $0xf0] sm:$0xff]  ;;  %v7814_v53 = vld [vmem:[#allocation11_spill] sm:$0xff] }
 0x2b1   : > { %v3383_v51 = vpop.f32.mrf.mxu1 }
 0x2b2   : > { %v5192_v33 = vmax.f32 %v5160_v11, 0.0  ;;  %v4499_v3 = vadd.f32 %v4458_v13, %v3777_v56  ;;  %v4958_v4 = vpop.f32.mrf.mxu0  ;;  %v3423_v19 = vadd.f32 %v3383_v51, %v7810_v26 }
 0x2b4   : > { %5224 = vst [vmem:[%s7436_s29 + $0xc8] sm:$0xff] %v5192_v33  ;;  %v4997_v15 = vadd.f32 %v4956_v6, %v4499_v3 }
 0x2b6   : > { %v5097_v55 = vadd.f32 %v7671_v7, %v4997_v15 }
 0x2b7   : > { %v3738_v20 = vpop.f32.mrf.mxu2 }
 0x2b8   : > { %v5161_v21 = vadd.f32 %v5129_v46, %v5097_v55  ;;  %v3778_v44 = vadd.f32 %v3738_v20, %v3423_v19  ;;  %v4460_v17 = vpop.f32.mrf.mxu3  ;;  %v5134_v46 = vld [vmem:[%s7404_s14 + $0xf8] sm:$0xff] }
 0x2b9   : > { %v3386_v60 = vpop.f32.mrf.mxu1 }
 0x2ba   : > { %v5193_v8 = vmax.f32 %v5161_v21, 0.0  ;;  %v4500_v27 = vadd.f32 %v4460_v17, %v3778_v44  ;;  %v4961_v30 = vpop.f32.mrf.mxu0  ;;  %v3424_v28 = vadd.f32 %v3386_v60, %v7811_v42 }
 0x2bc   : > { %5225 = vst [vmem:[%s7436_s29 + $0xd0] sm:$0xff] %v5193_v8  ;;  %v4998_v35 = vadd.f32 %v4958_v4, %v4500_v27 }
 0x2be   : > { %v5098_v47 = vadd.f32 %v7671_v7, %v4998_v35 }
 0x2bf   : > { %v3741_v32 = vpop.f32.mrf.mxu2 }
 0x2c0   : > { %v5162_v34 = vadd.f32 %v5130_v39, %v5098_v47  ;;  %v3779_v49 = vadd.f32 %v3741_v32, %v3424_v28  ;;  %v4463_v48 = vpop.f32.mrf.mxu3 }
 0x2c1   : > { %v3388_v62 = vpop.f32.mrf.mxu1 }
 0x2c2   : > { %v5194_v40 = vmax.f32 %v5162_v34, 0.0  ;;  %v4501_v23 = vadd.f32 %v4463_v48, %v3779_v49  ;;  %v3425_v22 = vadd.f32 %v3388_v62, %v7812_v50  ;;  %v4963_v5 = vpop.f32.mrf.mxu0 }
 0x2c4   : > { %5226 = vst [vmem:[%s7436_s29 + $0xd8] sm:$0xff] %v5194_v40  ;;  %v4999_v9 = vadd.f32 %v4961_v30, %v4501_v23 }
 0x2c6   : > { %v5099_v24 = vadd.f32 %v7671_v7, %v4999_v9 }
 0x2c7   : > { %v3743_v41 = vpop.f32.mrf.mxu2 }
 0x2c8   : > { %v5163_v63 = vadd.f32 %v5131_v14, %v5099_v24  ;;  %v3780_v45 = vadd.f32 %v3743_v41, %v3425_v22  ;;  %v4465_v2 = vpop.f32.mrf.mxu3 }
 0x2c9   : > { %v3391_v25 = vpop.f32.mrf.mxu1 }
 0x2ca   : > { %v5195_v58 = vmax.f32 %v5163_v63, 0.0  ;;  %v4502_v54 = vadd.f32 %v4465_v2, %v3780_v45  ;;  %v3426_v18 = vadd.f32 %v3391_v25, %v7813_v31  ;;  %v4966_v12 = vpop.f32.mrf.mxu0 }
 0x2cc   : > { %5227 = vst [vmem:[%s7436_s29 + $0xe0] sm:$0xff] %v5195_v58  ;;  %v5000_v38 = vadd.f32 %v4963_v5, %v4502_v54 }
 0x2ce   : > { %v5100_v29 = vadd.f32 %v7671_v7, %v5000_v38 }
 0x2cf   : > { %v3746_v52 = vpop.f32.mrf.mxu2 }
 0x2d0   : > { %v5164_v61 = vadd.f32 %v5132_v57, %v5100_v29  ;;  %v3781_v36 = vadd.f32 %v3746_v52, %v3426_v18  ;;  %v4468_v1 = vpop.f32.mrf.mxu3 }
 0x2d1   : > { %v3393_v16 = vpop.f32.mrf.mxu1 }
 0x2d2   : > { %v5196_v37 = vmax.f32 %v5164_v61, 0.0  ;;  %v4503_v6 = vadd.f32 %v4468_v1, %v3781_v36  ;;  %v3427_v0 = vadd.f32 %v3393_v16, %v7814_v53  ;;  %v4968_v4 = vpop.f32.mrf.mxu0 }
 0x2d4   : > { %5228 = vst [vmem:[%s7436_s29 + $0xe8] sm:$0xff] %v5196_v37  ;;  %v5001_v10 = vadd.f32 %v4966_v12, %v4503_v6 }
 0x2d6   : > { %v5101_v43 = vadd.f32 %v7671_v7, %v5001_v10 }
 0x2d7   : > { %v3748_v11 = vpop.f32.mrf.mxu2 }
 0x2d8   : > { %v5165_v56 = vadd.f32 %v5133_v59, %v5101_v43  ;;  %v3782_v13 = vadd.f32 %v3748_v11, %v3427_v0  ;;  %v4470_v51 = vpop.f32.mrf.mxu3 }
 0x2da   : > { %v5197_v33 = vmax.f32 %v5165_v56, 0.0  ;;  %v4504_v3 = vadd.f32 %v4470_v51, %v3782_v13 }
 0x2dc   : > { %5229 = vst [vmem:[%s7436_s29 + $0xf0] sm:$0xff] %v5197_v33  ;;  %v5002_v15 = vadd.f32 %v4968_v4, %v4504_v3 }
 0x2de   : > { %v5102_v55 = vadd.f32 %v7671_v7, %v5002_v15 }
 0x2e0   : > { %v5166_v26 = vadd.f32 %v5134_v46, %v5102_v55 }
 0x2e2   : > { %v5198_v19 = vmax.f32 %v5166_v26, 0.0 }
 0x2e4   : > { %5230 = vst [vmem:[%s7436_s29 + $0xf8] sm:$0xff] %v5198_v19 }
 0x2e5   : > { %6222 = shalt.err (!%p6219_p5)
}
 0x2e6   : > { %s6275_s11 = smov 128   ;;  %s6276_s29 = smov 8  }
 0x2e7   : > { %6136 = dma.vmem_to_hbm [thread:$0]  (%p6342_p4), %s5246_s9, 4096, %s5248_s10, %s5232_s18, %s6275_s11, %s6275_s11, %s6276_s29  }
 0x2e8 PF: > { %p6142_p6 = scmp.ge.s32.totalorder %s6273_s20, 2  ;;  %s5262_s30 = sand.u32 1, %s6253_s15  }
 0x2e9   : > { %s5263_s5 = scalar_lea.sflag [#allocation4], %s5262_s30 }
 0x2ea   : > { %p6139_p7 = pnand %p6142_p6, %p6349_p8 }
 0x2ec   : > { %p6140_p9 = pneg %p6139_p7 }
 0x2ee   : > { %6248 = dma.done.wait (%p6140_p9), %s5263_s5, 4096  }
 0x2ef   : > { %6250 = vsyncadd (%p6140_p9), %s5263_s5, 4294963200  ;;  %s17_s20 = sadd.s32 1, %s6273_s20   ;;  %s7815_s15 = smov %s6257_s16 }
 0x2f0   : > { %p14_p10 = scmp.ge.s32.totalorder %s17_s20, 4   ;;  %s7816_s16 = smov %s6261_s17 }
 0x2f1   : > { %s7817_s17 = smov %s6355_s28  ;;  %s7818_s18 = smov %s6269_s19 }
 0x2f2   : > { %s7819_s19 = smov %s7821_s23  ;;  %16 = sbr.rel (!%p14_p10) target bundleno = 4 (0x4), region = 90 }
 0x2f7   :  { %5269 = vsyncpa [#allocation4], 1 }
 0x2f8   :  { %5271 = vsyncpa [#allocation4 + $0x1], 1 }

</bundles_post_ra>
